<compile_context>
chip_gen: v7x
topology: tpu7x:2x2x1
jax: 0.10.0
libtpu: 0.0.40
codegen_flags: <defaults>
</compile_context>

<pallas_src>
import functools
import math

import jax
import jax.numpy as jnp
import numpy as np
from jax.experimental import pallas as pl
from jax.experimental.pallas import tpu as pltpu

NEG_INF = float(np.finfo(np.float32).min)


# ----------------------------- the Pallas kernel ---------------------------

def sync_bidir_decoder_block_kernel(
        # data (per-batch blocks)
        yscat_ref, yym_ref, idm_ref, xs_ref, xym_ref,
        # layer norms
        n1g_ref, n1b_ref, n2g_ref, n2b_ref, n3g_ref, n3b_ref,
        # SyncBidirMHA: fused K|V|Q projection + output projection
        sa_wkvq_ref, sa_bkvq_ref, sa_wo_ref, sa_bo_ref,
        # source MHA: fused K|V projection, Q projection, output projection
        ca_wkv_ref, ca_bkv_ref, ca_wq_ref, ca_bq_ref, ca_wo_ref, ca_bo_ref,
        # FFN
        ffw1_ref, ffb1_ref, ffw2_ref, ffb2_ref,
        # outputs
        out_ref, outb_ref, awh_ref, awf_ref, awbh_ref, awbf_ref, xyaw_ref, xyawb_ref,
        *, n_heads, d_k, eps):
    f32 = jnp.float32
    ys_cat = yscat_ref[0]      # [2L, D]  (fwd rows 0..L, bwd rows L..2L)
    yym = yym_ref[0]           # [L, L]
    idm = idm_ref[0]           # [L, L]
    xs = xs_ref[0]             # [T, D]
    xym = xym_ref[0]           # [L, T]

    L = yym.shape[0]
    D = ys_cat.shape[-1]
    inv_scale = 1.0 / math.sqrt(d_k)

    # Block masks for the stacked (fwd|bwd) query axis, compared once.
    keep_fk = jnp.concatenate([yym, idm], axis=0) > 0.0    # keys = fwd stream
    keep_bk = jnp.concatenate([idm, yym], axis=0) > 0.0    # keys = bwd stream
    keep_x = jnp.concatenate([xym, xym], axis=0) > 0.0     # keys = encoder

    def layernorm(x, g, b):
        mu = jnp.mean(x, axis=-1, keepdims=True)
        xc = x - mu
        var = jnp.mean(xc * xc, axis=-1, keepdims=True)
        return xc * jax.lax.rsqrt(var + eps) * g + b

    def split_heads(x):        # [S, D] -> [H, S, d_k]
        return x.reshape(x.shape[0], n_heads, d_k).transpose(1, 0, 2)

    def merge_heads(x):        # [H, S, d_k] -> [S, D]
        return x.transpose(1, 0, 2).reshape(x.shape[1], n_heads * d_k)

    def masked_softmax(e, keep):   # e: [H, Q, K], keep: [Q, K]
        e = jnp.where(keep[None, :, :], e, NEG_INF)
        m = jnp.max(e, axis=-1, keepdims=True)
        p = jnp.exp(e - m)
        s = jnp.sum(p, axis=-1, keepdims=True)
        return p * (1.0 / s)       # one divide per row, multiply elementwise

    # ---------------- synchronous bidirectional self-attention ----------------
    ys_n = layernorm(ys_cat, n1g_ref[...], n1b_ref[...])                  # [2L, D]
    kvq = jnp.dot(ys_n, sa_wkvq_ref[...], preferred_element_type=f32) + sa_bkvq_ref[...]
    k_all = split_heads(kvq[:, :D])                                       # [H, 2L, dk]
    v_all = split_heads(kvq[:, D:2 * D])
    q_all = split_heads(kvq[:, 2 * D:]) * inv_scale                       # pre-scaled

    k_f, k_b = k_all[:, :L, :], k_all[:, L:, :]
    v_f, v_b = v_all[:, :L, :], v_all[:, L:, :]

    e_fk = jnp.einsum('hqd,hkd->hqk', q_all, k_f, preferred_element_type=f32)  # [H, 2L, L]
    e_bk = jnp.einsum('hqd,hkd->hqk', q_all, k_b, preferred_element_type=f32)
    aw_fk = masked_softmax(e_fk, keep_fk)
    aw_bk = masked_softmax(e_bk, keep_bk)

    awh_ref[0] = aw_fk[:, :L, :]    # fwd q  -> fwd k  (history)
    awbf_ref[0] = aw_fk[:, L:, :]   # bwd q  -> fwd k  (future)
    awf_ref[0] = aw_bk[:, :L, :]    # fwd q  -> bwd k  (future)
    awbh_ref[0] = aw_bk[:, L:, :]   # bwd q  -> bwd k  (history)

    cv = (jnp.einsum('hqk,hkd->hqd', aw_fk, v_f, preferred_element_type=f32)
          + jnp.einsum('hqk,hkd->hqd', aw_bk, v_b, preferred_element_type=f32))  # [H, 2L, dk]
    sa_out = jnp.dot(merge_heads(cv), sa_wo_ref[...], preferred_element_type=f32) + sa_bo_ref[...]
    out_all = sa_out + ys_cat                                              # residual

    # ---------------- source (encoder-decoder) attention ----------------
    kv_x = jnp.dot(xs, ca_wkv_ref[...], preferred_element_type=f32) + ca_bkv_ref[...]  # [T, 2D]
    k_x = split_heads(kv_x[:, :D])                                         # [H, T, dk]
    v_x = split_heads(kv_x[:, D:])

    out_n = layernorm(out_all, n2g_ref[...], n2b_ref[...])
    q_x = split_heads(jnp.dot(out_n, ca_wq_ref[...], preferred_element_type=f32)
                      + ca_bq_ref[...]) * inv_scale                        # [H, 2L, dk]
    e_x = jnp.einsum('hqd,hkd->hqk', q_x, k_x, preferred_element_type=f32)  # [H, 2L, T]
    aw_x = masked_softmax(e_x, keep_x)
    xyaw_ref[0] = aw_x[:, :L, :]
    xyawb_ref[0] = aw_x[:, L:, :]
    cv_x = jnp.einsum('hqk,hkd->hqd', aw_x, v_x, preferred_element_type=f32)
    src_out = jnp.dot(merge_heads(cv_x), ca_wo_ref[...], preferred_element_type=f32) + ca_bo_ref[...]
    out_all = src_out + out_all

    # ---------------- position-wise feed-forward (relu) ----------------
    out_n = layernorm(out_all, n3g_ref[...], n3b_ref[...])
    h1 = jnp.maximum(
        jnp.dot(out_n, ffw1_ref[...], preferred_element_type=f32) + ffb1_ref[...], 0.0)
    ffn_out = jnp.dot(h1, ffw2_ref[...], preferred_element_type=f32) + ffb2_ref[...]
    final = ffn_out + out_all                                              # [2L, D]

    out_ref[0] = final[:L]
    outb_ref[0] = final[L:]


# ----------------------------- wrapper -----------------------------

def sync_bidir_block(ys, ys_bwd, yy_mask, identity_mask, xs, xy_mask, params,
                     n_heads, eps=1e-12):
    B, L, D = ys.shape
    T = xs.shape[1]
    d_k = D // n_heads
    f32 = jnp.float32

    # Stack fwd/bwd streams along the sequence axis (host-side, cheap XLA concat).
    ys_cat = jnp.concatenate([ys, ys_bwd], axis=1)                 # [B, 2L, D]

    # Fuse projection weights (host-side).
    sa_wkvq = jnp.concatenate([params['sa_wk'], params['sa_wv'], params['sa_wq']], axis=1)
    sa_bkvq = jnp.concatenate([params['sa_bk'], params['sa_bv'], params['sa_bq']], axis=1)
    ca_wkv = jnp.concatenate([params['ca_wk'], params['ca_wv']], axis=1)
    ca_bkv = jnp.concatenate([params['ca_bk'], params['ca_bv']], axis=1)

    weights = [
        params['n1_g'], params['n1_b'], params['n2_g'], params['n2_b'],
        params['n3_g'], params['n3_b'],
        sa_wkvq, sa_bkvq, params['sa_wo'], params['sa_bo'],
        ca_wkv, ca_bkv, params['ca_wq'], params['ca_bq'],
        params['ca_wo'], params['ca_bo'],
        params['ff_w1'], params['ff_b1'], params['ff_w2'], params['ff_b2'],
    ]

    in_specs = [
        pl.BlockSpec((1, 2 * L, D), lambda b: (b, 0, 0)),   # ys_cat
        pl.BlockSpec((1, L, L), lambda b: (b, 0, 0)),       # yy_mask
        pl.BlockSpec((1, L, L), lambda b: (b, 0, 0)),       # identity_mask
        pl.BlockSpec((1, T, D), lambda b: (b, 0, 0)),       # xs
        pl.BlockSpec((1, L, T), lambda b: (b, 0, 0)),       # xy_mask
    ] + [pl.BlockSpec(w.shape, lambda b: (0, 0)) for w in weights]   # all weights 2-D

    out_shape = (
        jax.ShapeDtypeStruct((B, L, D), f32),
        jax.ShapeDtypeStruct((B, L, D), f32),
        jax.ShapeDtypeStruct((B, n_heads, L, L), f32),
        jax.ShapeDtypeStruct((B, n_heads, L, L), f32),
        jax.ShapeDtypeStruct((B, n_heads, L, L), f32),
        jax.ShapeDtypeStruct((B, n_heads, L, L), f32),
        jax.ShapeDtypeStruct((B, n_heads, L, T), f32),
        jax.ShapeDtypeStruct((B, n_heads, L, T), f32),
    )
    out_specs = (
        pl.BlockSpec((1, L, D), lambda b: (b, 0, 0)),
        pl.BlockSpec((1, L, D), lambda b: (b, 0, 0)),
        pl.BlockSpec((1, n_heads, L, L), lambda b: (b, 0, 0, 0)),
        pl.BlockSpec((1, n_heads, L, L), lambda b: (b, 0, 0, 0)),
        pl.BlockSpec((1, n_heads, L, L), lambda b: (b, 0, 0, 0)),
        pl.BlockSpec((1, n_heads, L, L), lambda b: (b, 0, 0, 0)),
        pl.BlockSpec((1, n_heads, L, T), lambda b: (b, 0, 0, 0)),
        pl.BlockSpec((1, n_heads, L, T), lambda b: (b, 0, 0, 0)),
    )

    kernel = functools.partial(sync_bidir_decoder_block_kernel,
                               n_heads=n_heads, d_k=d_k, eps=eps)

    return pl.pallas_call(
        kernel,
        grid=(B,),
        in_specs=in_specs,
        out_specs=out_specs,
        out_shape=out_shape,
        compiler_params=pltpu.CompilerParams(
            dimension_semantics=("parallel",),
            vmem_limit_bytes=64 * 1024 * 1024,
        ),
    )(ys_cat, yy_mask, identity_mask, xs, xy_mask, *weights)


# ----------------------------- pure-JAX reference -----------------------------

def reference_forward(ys, ysb, yym, idm, xs, xym, p, n_heads, eps=1e-12):
    B, L, D = ys.shape
    d_k = D // n_heads
    scale = math.sqrt(d_k)

    def ln(x, g, b):
        mu = x.mean(-1, keepdims=True)
        var = ((x - mu) ** 2).mean(-1, keepdims=True)
        return (x - mu) / jnp.sqrt(var + eps) * g + b

    def lin(x, w, b):
        return x @ w + b

    def split(x):   # [B,S,D] -> [B,H,S,dk]
        return x.reshape(B, -1, n_heads, d_k).transpose(0, 2, 1, 3)

    def merge(x):   # [B,H,S,dk] -> [B,S,D]
        return x.transpose(0, 2, 1, 3).reshape(B, -1, D)

    def softmax(e):
        m = e.max(-1, keepdims=True)
        q = jnp.exp(e - m)
        return q / q.sum(-1, keepdims=True)

    def att_w(q, k, mask):
        e = jnp.einsum('bhqd,bhkd->bhqk', q, k) / scale
        e = jnp.where(mask[:, None] > 0, e, NEG_INF)
        return softmax(e)

    # self attention (sync bidirectional)
    ys_n = ln(ys, p['n1_g'], p['n1_b'])
    ysb_n = ln(ysb, p['n1_g'], p['n1_b'])
    kf, vf = split(lin(ys_n, p['sa_wk'], p['sa_bk'])), split(lin(ys_n, p['sa_wv'], p['sa_bv']))
    qf = split(lin(ys_n, p['sa_wq'], p['sa_bq']))
    kb, vb = split(lin(ysb_n, p['sa_wk'], p['sa_bk'])), split(lin(ysb_n, p['sa_wv'], p['sa_bv']))
    qb = split(lin(ysb_n, p['sa_wq'], p['sa_bq']))

    aw_h, aw_f = att_w(qf, kf, yym), att_w(qf, kb, idm)
    aw_bh, aw_bf = att_w(qb, kb, yym), att_w(qb, kf, idm)
    cv_f = jnp.einsum('bhqk,bhkd->bhqd', aw_h, vf) + jnp.einsum('bhqk,bhkd->bhqd', aw_f, vb)
    cv_b = jnp.einsum('bhqk,bhkd->bhqd', aw_bh, vb) + jnp.einsum('bhqk,bhkd->bhqd', aw_bf, vf)
    out = lin(merge(cv_f), p['sa_wo'], p['sa_bo']) + ys
    out_b = lin(merge(cv_b), p['sa_wo'], p['sa_bo']) + ysb

    # source attention
    kx, vx = split(lin(xs, p['ca_wk'], p['ca_bk'])), split(lin(xs, p['ca_wv'], p['ca_bv']))

    def src(y):
        y_n = ln(y, p['n2_g'], p['n2_b'])
        qx = split(lin(y_n, p['ca_wq'], p['ca_bq']))
        aw = att_w(qx, kx, xym)
        cv = jnp.einsum('bhqk,bhkd->bhqd', aw, vx)
        return lin(merge(cv), p['ca_wo'], p['ca_bo']) + y, aw

    out, xy_aw = src(out)
    out_b, xy_aw_b = src(out_b)

    def ffn(y):
        y_n = ln(y, p['n3_g'], p['n3_b'])
        h1 = jnp.maximum(lin(y_n, p['ff_w1'], p['ff_b1']), 0.0)
        return lin(h1, p['ff_w2'], p['ff_b2']) + y

    return ffn(out), ffn(out_b), aw_h, aw_f, aw_bh, aw_bf, xy_aw, xy_aw_b


# ----------------------------- main -----------------------------

if __name__ == "__main__":
    B, L, T = 2, 8, 16
    d_model, d_ff, n_heads = 32, 64, 4
    f32 = jnp.float32

    base_key = jax.random.PRNGKey(0)
    _ctr = [0]

    def w(shape, scale=0.05):
        _ctr[0] += 1
        return jax.random.normal(jax.random.fold_in(base_key, _ctr[0]),
                                 shape, dtype=f32) * scale

    params = {
        'n1_g': 1.0 + w((1, d_model)), 'n1_b': w((1, d_model)),
        'n2_g': 1.0 + w((1, d_model)), 'n2_b': w((1, d_model)),
        'n3_g': 1.0 + w((1, d_model)), 'n3_b': w((1, d_model)),
        # SyncBidirMHA projections (weights stored [in, out])
        'sa_wk': w((d_model, d_model)), 'sa_bk': w((1, d_model)),
        'sa_wv': w((d_model, d_model)), 'sa_bv': w((1, d_model)),
        'sa_wq': w((d_model, d_model)), 'sa_bq': w((1, d_model)),
        'sa_wo': w((d_model, d_model)), 'sa_bo': w((1, d_model)),
        # source MHA projections
        'ca_wk': w((d_model, d_model)), 'ca_bk': w((1, d_model)),
        'ca_wv': w((d_model, d_model)), 'ca_bv': w((1, d_model)),
        'ca_wq': w((d_model, d_model)), 'ca_bq': w((1, d_model)),
        'ca_wo': w((d_model, d_model)), 'ca_bo': w((1, d_model)),
        # FFN (relu)
        'ff_w1': w((d_model, d_ff)), 'ff_b1': w((1, d_ff)),
        'ff_w2': w((d_ff, d_model)), 'ff_b2': w((1, d_model)),
    }

    ys = jax.random.normal(jax.random.fold_in(base_key, 1001), (B, L, d_model), dtype=f32)
    ys_bwd = jax.random.normal(jax.random.fold_in(base_key, 1002), (B, L, d_model), dtype=f32)
    xs = jax.random.normal(jax.random.fold_in(base_key, 1003), (B, T, d_model), dtype=f32)

    # masks: 1.0 = attend, 0.0 = masked (== 0 -> NEG_INF in neural_sp)
    yy_mask = jnp.broadcast_to(jnp.tril(jnp.ones((L, L), f32)), (B, L, L))
    identity_mask = jnp.broadcast_to(1.0 - jnp.eye(L, dtype=f32), (B, L, L))
    src_lens = jnp.array([T, T - 3])
    xy_mask = (jnp.arange(T)[None, None, :] < src_lens[:, None, None]).astype(f32)
    xy_mask = jnp.broadcast_to(xy_mask, (B, L, T))

    outs = sync_bidir_block(ys, ys_bwd, yy_mask, identity_mask, xs, xy_mask,
                            params, n_heads=n_heads, eps=1e-12)
    outs = jax.block_until_ready(outs)

    refs = reference_forward(ys, ys_bwd, yy_mask, identity_mask, xs, xy_mask,
                             params, n_heads=n_heads, eps=1e-12)
    refs = jax.block_until_ready(refs)

    names = ['out', 'out_bwd', 'yy_aws_h', 'yy_aws_f', 'yy_aws_bwd_h',
             'yy_aws_bwd_f', 'xy_aws', 'xy_aws_bwd']
    for name, got, want in zip(names, outs, refs):
        np.testing.assert_allclose(np.asarray(got), np.asarray(want),
                                   rtol=2e-5, atol=2e-5, err_msg=name)

    print("KERNEL_OK")
</pallas_src>

<mosaic_0001>
module attributes {stable_mosaic.version = 11 : i64} {
  func.func @sync_bidir_decoder_block_kernel(%arg0: i32, %arg1: memref<1x16x32xf32, #tpu.memory_space<vmem>>, %arg2: memref<1x8x8xf32, #tpu.memory_space<vmem>>, %arg3: memref<1x8x8xf32, #tpu.memory_space<vmem>>, %arg4: memref<1x16x32xf32, #tpu.memory_space<vmem>>, %arg5: memref<1x8x16xf32, #tpu.memory_space<vmem>>, %arg6: memref<1x32xf32, #tpu.memory_space<vmem>>, %arg7: memref<1x32xf32, #tpu.memory_space<vmem>>, %arg8: memref<1x32xf32, #tpu.memory_space<vmem>>, %arg9: memref<1x32xf32, #tpu.memory_space<vmem>>, %arg10: memref<1x32xf32, #tpu.memory_space<vmem>>, %arg11: memref<1x32xf32, #tpu.memory_space<vmem>>, %arg12: memref<32x96xf32, #tpu.memory_space<vmem>>, %arg13: memref<1x96xf32, #tpu.memory_space<vmem>>, %arg14: memref<32x32xf32, #tpu.memory_space<vmem>>, %arg15: memref<1x32xf32, #tpu.memory_space<vmem>>, %arg16: memref<32x64xf32, #tpu.memory_space<vmem>>, %arg17: memref<1x64xf32, #tpu.memory_space<vmem>>, %arg18: memref<32x32xf32, #tpu.memory_space<vmem>>, %arg19: memref<1x32xf32, #tpu.memory_space<vmem>>, %arg20: memref<32x32xf32, #tpu.memory_space<vmem>>, %arg21: memref<1x32xf32, #tpu.memory_space<vmem>>, %arg22: memref<32x64xf32, #tpu.memory_space<vmem>>, %arg23: memref<1x64xf32, #tpu.memory_space<vmem>>, %arg24: memref<64x32xf32, #tpu.memory_space<vmem>>, %arg25: memref<1x32xf32, #tpu.memory_space<vmem>>, %arg26: memref<1x8x32xf32, #tpu.memory_space<vmem>>, %arg27: memref<1x8x32xf32, #tpu.memory_space<vmem>>, %arg28: memref<1x4x8x8xf32, #tpu.memory_space<vmem>>, %arg29: memref<1x4x8x8xf32, #tpu.memory_space<vmem>>, %arg30: memref<1x4x8x8xf32, #tpu.memory_space<vmem>>, %arg31: memref<1x4x8x8xf32, #tpu.memory_space<vmem>>, %arg32: memref<1x4x8x16xf32, #tpu.memory_space<vmem>>, %arg33: memref<1x4x8x16xf32, #tpu.memory_space<vmem>>) attributes {dimension_semantics = [#tpu.dimension_semantics<parallel>], iteration_bounds = array<i64: 2>, scalar_prefetch = 0 : i64, scratch_operands = 0 : i64, tpu.core_type = #tpu.core_type<tc>, window_params = [{transform_indices = @transform_0, window_bounds = array<i64: 1, 16, 32>}, {transform_indices = @transform_1, window_bounds = array<i64: 1, 8, 8>}, {transform_indices = @transform_2, window_bounds = array<i64: 1, 8, 8>}, {transform_indices = @transform_3, window_bounds = array<i64: 1, 16, 32>}, {transform_indices = @transform_4, window_bounds = array<i64: 1, 8, 16>}, {pipeline_mode = #tpu.pipeline_mode<synchronous>, transform_indices = @transform_5, window_bounds = array<i64: 1, 32>}, {pipeline_mode = #tpu.pipeline_mode<synchronous>, transform_indices = @transform_6, window_bounds = array<i64: 1, 32>}, {pipeline_mode = #tpu.pipeline_mode<synchronous>, transform_indices = @transform_7, window_bounds = array<i64: 1, 32>}, {pipeline_mode = #tpu.pipeline_mode<synchronous>, transform_indices = @transform_8, window_bounds = array<i64: 1, 32>}, {pipeline_mode = #tpu.pipeline_mode<synchronous>, transform_indices = @transform_9, window_bounds = array<i64: 1, 32>}, {pipeline_mode = #tpu.pipeline_mode<synchronous>, transform_indices = @transform_10, window_bounds = array<i64: 1, 32>}, {pipeline_mode = #tpu.pipeline_mode<synchronous>, transform_indices = @transform_11, window_bounds = array<i64: 32, 96>}, {pipeline_mode = #tpu.pipeline_mode<synchronous>, transform_indices = @transform_12, window_bounds = array<i64: 1, 96>}, {pipeline_mode = #tpu.pipeline_mode<synchronous>, transform_indices = @transform_13, window_bounds = array<i64: 32, 32>}, {pipeline_mode = #tpu.pipeline_mode<synchronous>, transform_indices = @transform_14, window_bounds = array<i64: 1, 32>}, {pipeline_mode = #tpu.pipeline_mode<synchronous>, transform_indices = @transform_15, window_bounds = array<i64: 32, 64>}, {pipeline_mode = #tpu.pipeline_mode<synchronous>, transform_indices = @transform_16, window_bounds = array<i64: 1, 64>}, {pipeline_mode = #tpu.pipeline_mode<synchronous>, transform_indices = @transform_17, window_bounds = array<i64: 32, 32>}, {pipeline_mode = #tpu.pipeline_mode<synchronous>, transform_indices = @transform_18, window_bounds = array<i64: 1, 32>}, {pipeline_mode = #tpu.pipeline_mode<synchronous>, transform_indices = @transform_19, window_bounds = array<i64: 32, 32>}, {pipeline_mode = #tpu.pipeline_mode<synchronous>, transform_indices = @transform_20, window_bounds = array<i64: 1, 32>}, {pipeline_mode = #tpu.pipeline_mode<synchronous>, transform_indices = @transform_21, window_bounds = array<i64: 32, 64>}, {pipeline_mode = #tpu.pipeline_mode<synchronous>, transform_indices = @transform_22, window_bounds = array<i64: 1, 64>}, {pipeline_mode = #tpu.pipeline_mode<synchronous>, transform_indices = @transform_23, window_bounds = array<i64: 64, 32>}, {pipeline_mode = #tpu.pipeline_mode<synchronous>, transform_indices = @transform_24, window_bounds = array<i64: 1, 32>}, {transform_indices = @transform_25, window_bounds = array<i64: 1, 8, 32>}, {transform_indices = @transform_26, window_bounds = array<i64: 1, 8, 32>}, {transform_indices = @transform_27, window_bounds = array<i64: 1, 4, 8, 8>}, {transform_indices = @transform_28, window_bounds = array<i64: 1, 4, 8, 8>}, {transform_indices = @transform_29, window_bounds = array<i64: 1, 4, 8, 8>}, {transform_indices = @transform_30, window_bounds = array<i64: 1, 4, 8, 8>}, {transform_indices = @transform_31, window_bounds = array<i64: 1, 4, 8, 16>}, {transform_indices = @transform_32, window_bounds = array<i64: 1, 4, 8, 16>}]} {
    %c0 = arith.constant 0 : index
    %c0_0 = arith.constant 0 : index
    %c0_1 = arith.constant 0 : index
    %0 = vector.load %arg1[%c0, %c0_0, %c0_1] : memref<1x16x32xf32, #tpu.memory_space<vmem>>, vector<1x16x32xf32>
    %1 = vector.shape_cast %0 : vector<1x16x32xf32> to vector<16x32xf32>
    %c0_2 = arith.constant 0 : index
    %c0_3 = arith.constant 0 : index
    %c0_4 = arith.constant 0 : index
    %2 = vector.load %arg2[%c0_2, %c0_3, %c0_4] : memref<1x8x8xf32, #tpu.memory_space<vmem>>, vector<1x8x8xf32>
    %3 = vector.shape_cast %2 : vector<1x8x8xf32> to vector<8x8xf32>
    %c0_5 = arith.constant 0 : index
    %c0_6 = arith.constant 0 : index
    %c0_7 = arith.constant 0 : index
    %4 = vector.load %arg3[%c0_5, %c0_6, %c0_7] : memref<1x8x8xf32, #tpu.memory_space<vmem>>, vector<1x8x8xf32>
    %5 = vector.shape_cast %4 : vector<1x8x8xf32> to vector<8x8xf32>
    %c0_8 = arith.constant 0 : index
    %c0_9 = arith.constant 0 : index
    %c0_10 = arith.constant 0 : index
    %6 = vector.load %arg4[%c0_8, %c0_9, %c0_10] : memref<1x16x32xf32, #tpu.memory_space<vmem>>, vector<1x16x32xf32>
    %7 = vector.shape_cast %6 : vector<1x16x32xf32> to vector<16x32xf32>
    %c0_11 = arith.constant 0 : index
    %c0_12 = arith.constant 0 : index
    %c0_13 = arith.constant 0 : index
    %8 = vector.load %arg5[%c0_11, %c0_12, %c0_13] : memref<1x8x16xf32, #tpu.memory_space<vmem>>, vector<1x8x16xf32>
    %9 = vector.shape_cast %8 : vector<1x8x16xf32> to vector<8x16xf32>
    %10 = tpu.concatenate %3, %5 in 0 : vector<8x8xf32>, vector<8x8xf32> -> vector<16x8xf32>
    %cst = arith.constant 0.000000e+00 : f32
    %11 = vector.broadcast %cst : f32 to vector<16x8xf32>
    %12 = arith.cmpf ogt, %10, %11 : vector<16x8xf32>
    %13 = tpu.concatenate %5, %3 in 0 : vector<8x8xf32>, vector<8x8xf32> -> vector<16x8xf32>
    %cst_14 = arith.constant 0.000000e+00 : f32
    %14 = vector.broadcast %cst_14 : f32 to vector<16x8xf32>
    %15 = arith.cmpf ogt, %13, %14 : vector<16x8xf32>
    %16 = tpu.concatenate %9, %9 in 0 : vector<8x16xf32>, vector<8x16xf32> -> vector<16x16xf32>
    %cst_15 = arith.constant 0.000000e+00 : f32
    %17 = vector.broadcast %cst_15 : f32 to vector<16x16xf32>
    %18 = arith.cmpf ogt, %16, %17 : vector<16x16xf32>
    %c0_16 = arith.constant 0 : index
    %c0_17 = arith.constant 0 : index
    %19 = vector.load %arg6[%c0_16, %c0_17] : memref<1x32xf32, #tpu.memory_space<vmem>>, vector<1x32xf32>
    %c0_18 = arith.constant 0 : index
    %c0_19 = arith.constant 0 : index
    %20 = vector.load %arg7[%c0_18, %c0_19] : memref<1x32xf32, #tpu.memory_space<vmem>>, vector<1x32xf32>
    %cst_20 = arith.constant dense<0.000000e+00> : vector<16xf32>
    %21 = vector.multi_reduction <add>, %1, %cst_20 [1] : vector<16x32xf32> to vector<16xf32>
    %22 = vector.shape_cast %21 : vector<16xf32> to vector<16x1xf32>
    %cst_21 = arith.constant 3.200000e+01 : f32
    %23 = vector.broadcast %cst_21 : f32 to vector<16x1xf32>
    %24 = arith.divf %22, %23 : vector<16x1xf32>
    %25 = vector.broadcast %24 : vector<16x1xf32> to vector<16x32xf32>
    %26 = arith.subf %1, %25 : vector<16x32xf32>
    %27 = arith.mulf %26, %26 : vector<16x32xf32>
    %cst_22 = arith.constant dense<0.000000e+00> : vector<16xf32>
    %28 = vector.multi_reduction <add>, %27, %cst_22 [1] : vector<16x32xf32> to vector<16xf32>
    %29 = vector.shape_cast %28 : vector<16xf32> to vector<16x1xf32>
    %cst_23 = arith.constant 3.200000e+01 : f32
    %30 = vector.broadcast %cst_23 : f32 to vector<16x1xf32>
    %31 = arith.divf %29, %30 : vector<16x1xf32>
    %cst_24 = arith.constant 9.99999996E-13 : f32
    %32 = vector.broadcast %cst_24 : f32 to vector<16x1xf32>
    %33 = arith.addf %31, %32 : vector<16x1xf32>
    %34 = math.rsqrt %33 : vector<16x1xf32>
    %35 = vector.broadcast %34 : vector<16x1xf32> to vector<16x32xf32>
    %36 = arith.mulf %26, %35 : vector<16x32xf32>
    %37 = vector.broadcast %19 : vector<1x32xf32> to vector<16x32xf32>
    %38 = arith.mulf %36, %37 : vector<16x32xf32>
    %39 = vector.broadcast %20 : vector<1x32xf32> to vector<16x32xf32>
    %40 = arith.addf %38, %39 : vector<16x32xf32>
    %c0_25 = arith.constant 0 : index
    %c0_26 = arith.constant 0 : index
    %41 = vector.load %arg12[%c0_25, %c0_26] : memref<32x96xf32, #tpu.memory_space<vmem>>, vector<32x96xf32>
    %cst_27 = arith.constant dense<0.000000e+00> : vector<16x96xf32>
    %42 = tpu.matmul %40, %41, %cst_27 {dimension_numbers = #tpu.dot_dimension_numbers<[1], [0], [0], [1], [0, 0, 1, 1], [], []>} : vector<16x32xf32>, vector<32x96xf32>, vector<16x96xf32> -> vector<16x96xf32>
    %c0_28 = arith.constant 0 : index
    %c0_29 = arith.constant 0 : index
    %43 = vector.load %arg13[%c0_28, %c0_29] : memref<1x96xf32, #tpu.memory_space<vmem>>, vector<1x96xf32>
    %44 = vector.broadcast %43 : vector<1x96xf32> to vector<16x96xf32>
    %45 = arith.addf %42, %44 : vector<16x96xf32>
    %46 = vector.extract_strided_slice %45 {offsets = [0, 0], sizes = [16, 32], strides = [1, 1]} : vector<16x96xf32> to vector<16x32xf32>
    %47 = vector.shape_cast %46 : vector<16x32xf32> to vector<16x4x8xf32>
    %48 = tpu.transpose %47, [1, 0, 2] : vector<16x4x8xf32> -> vector<4x16x8xf32>
    %49 = vector.extract_strided_slice %45 {offsets = [0, 32], sizes = [16, 32], strides = [1, 1]} : vector<16x96xf32> to vector<16x32xf32>
    %50 = vector.shape_cast %49 : vector<16x32xf32> to vector<16x4x8xf32>
    %51 = tpu.transpose %50, [1, 0, 2] : vector<16x4x8xf32> -> vector<4x16x8xf32>
    %52 = vector.extract_strided_slice %45 {offsets = [0, 64], sizes = [16, 32], strides = [1, 1]} : vector<16x96xf32> to vector<16x32xf32>
    %53 = vector.shape_cast %52 : vector<16x32xf32> to vector<16x4x8xf32>
    %54 = tpu.transpose %53, [1, 0, 2] : vector<16x4x8xf32> -> vector<4x16x8xf32>
    %cst_30 = arith.constant 0.353553385 : f32
    %55 = vector.broadcast %cst_30 : f32 to vector<4x16x8xf32>
    %56 = arith.mulf %54, %55 : vector<4x16x8xf32>
    %57 = vector.extract_strided_slice %48 {offsets = [0, 0, 0], sizes = [4, 8, 8], strides = [1, 1, 1]} : vector<4x16x8xf32> to vector<4x8x8xf32>
    %58 = vector.extract_strided_slice %48 {offsets = [0, 8, 0], sizes = [4, 8, 8], strides = [1, 1, 1]} : vector<4x16x8xf32> to vector<4x8x8xf32>
    %59 = vector.extract_strided_slice %51 {offsets = [0, 0, 0], sizes = [4, 8, 8], strides = [1, 1, 1]} : vector<4x16x8xf32> to vector<4x8x8xf32>
    %60 = vector.extract_strided_slice %51 {offsets = [0, 8, 0], sizes = [4, 8, 8], strides = [1, 1, 1]} : vector<4x16x8xf32> to vector<4x8x8xf32>
    "tpu.trace_start"() <{level = 10 : i32, message = "hqd,hkd->hqk"}> : () -> ()
    %cst_31 = arith.constant dense<0.000000e+00> : vector<4x16x8xf32>
    %61 = tpu.matmul %56, %57, %cst_31 {dimension_numbers = #tpu.dot_dimension_numbers<[2], [2], [1], [1], [0, 0, 0, 1, 1, 1], [0], [0]>} : vector<4x16x8xf32>, vector<4x8x8xf32>, vector<4x16x8xf32> -> vector<4x16x8xf32>
    %cst_32 = arith.constant dense<0.000000e+00> : vector<4x16x8xf32>
    %62 = tpu.matmul %56, %58, %cst_32 {dimension_numbers = #tpu.dot_dimension_numbers<[2], [2], [1], [1], [0, 0, 0, 1, 1, 1], [0], [0]>} : vector<4x16x8xf32>, vector<4x8x8xf32>, vector<4x16x8xf32> -> vector<4x16x8xf32>
    "tpu.trace_stop"() : () -> ()
    %63 = vector.shape_cast %12 : vector<16x8xi1> to vector<1x16x8xi1>
    %cst_33 = arith.constant -3.40282347E+38 : f32
    %64 = vector.shape_cast %63 : vector<1x16x8xi1> to vector<1x16x8xi1>
    %65 = vector.broadcast %64 : vector<1x16x8xi1> to vector<4x16x8xi1>
    %66 = vector.broadcast %cst_33 : f32 to vector<4x16x8xf32>
    %67 = arith.select %65, %61, %66 : vector<4x16x8xi1>, vector<4x16x8xf32>
    %cst_34 = arith.constant dense<0xFF800000> : vector<4x16xf32>
    %68 = vector.multi_reduction <maximumf>, %67, %cst_34 [2] : vector<4x16x8xf32> to vector<4x16xf32>
    %69 = vector.shape_cast %68 : vector<4x16xf32> to vector<4x16x1xf32>
    %70 = vector.broadcast %69 : vector<4x16x1xf32> to vector<4x16x8xf32>
    %71 = arith.subf %67, %70 : vector<4x16x8xf32>
    %72 = math.exp %71 : vector<4x16x8xf32>
    %cst_35 = arith.constant dense<0.000000e+00> : vector<4x16xf32>
    %73 = vector.multi_reduction <add>, %72, %cst_35 [2] : vector<4x16x8xf32> to vector<4x16xf32>
    %74 = vector.shape_cast %73 : vector<4x16xf32> to vector<4x16x1xf32>
    %cst_36 = arith.constant 1.000000e+00 : f32
    %75 = vector.broadcast %cst_36 : f32 to vector<4x16x1xf32>
    %76 = arith.divf %75, %74 : vector<4x16x1xf32>
    %77 = vector.broadcast %76 : vector<4x16x1xf32> to vector<4x16x8xf32>
    %78 = arith.mulf %72, %77 : vector<4x16x8xf32>
    %79 = vector.shape_cast %15 : vector<16x8xi1> to vector<1x16x8xi1>
    %cst_37 = arith.constant -3.40282347E+38 : f32
    %80 = vector.shape_cast %79 : vector<1x16x8xi1> to vector<1x16x8xi1>
    %81 = vector.broadcast %80 : vector<1x16x8xi1> to vector<4x16x8xi1>
    %82 = vector.broadcast %cst_37 : f32 to vector<4x16x8xf32>
    %83 = arith.select %81, %62, %82 : vector<4x16x8xi1>, vector<4x16x8xf32>
    %cst_38 = arith.constant dense<0xFF800000> : vector<4x16xf32>
    %84 = vector.multi_reduction <maximumf>, %83, %cst_38 [2] : vector<4x16x8xf32> to vector<4x16xf32>
    %85 = vector.shape_cast %84 : vector<4x16xf32> to vector<4x16x1xf32>
    %86 = vector.broadcast %85 : vector<4x16x1xf32> to vector<4x16x8xf32>
    %87 = arith.subf %83, %86 : vector<4x16x8xf32>
    %88 = math.exp %87 : vector<4x16x8xf32>
    %cst_39 = arith.constant dense<0.000000e+00> : vector<4x16xf32>
    %89 = vector.multi_reduction <add>, %88, %cst_39 [2] : vector<4x16x8xf32> to vector<4x16xf32>
    %90 = vector.shape_cast %89 : vector<4x16xf32> to vector<4x16x1xf32>
    %cst_40 = arith.constant 1.000000e+00 : f32
    %91 = vector.broadcast %cst_40 : f32 to vector<4x16x1xf32>
    %92 = arith.divf %91, %90 : vector<4x16x1xf32>
    %93 = vector.broadcast %92 : vector<4x16x1xf32> to vector<4x16x8xf32>
    %94 = arith.mulf %88, %93 : vector<4x16x8xf32>
    %95 = vector.extract_strided_slice %78 {offsets = [0, 0, 0], sizes = [4, 8, 8], strides = [1, 1, 1]} : vector<4x16x8xf32> to vector<4x8x8xf32>
    %c0_41 = arith.constant 0 : index
    %c0_42 = arith.constant 0 : index
    %c0_43 = arith.constant 0 : index
    %c0_44 = arith.constant 0 : index
    %96 = vector.load %arg28[%c0_41, %c0_42, %c0_43, %c0_44] : memref<1x4x8x8xf32, #tpu.memory_space<vmem>>, vector<1x4x8x8xf32>
    %97 = vector.shape_cast %96 : vector<1x4x8x8xf32> to vector<4x8x8xf32>
    %98 = vector.shape_cast %95 : vector<4x8x8xf32> to vector<1x4x8x8xf32>
    tpu.vector_store %arg28[%c0_41, %c0_42, %c0_43, %c0_44], %98 {strides = array<i32>} : memref<1x4x8x8xf32, #tpu.memory_space<vmem>>, vector<1x4x8x8xf32>,
    %99 = vector.extract_strided_slice %78 {offsets = [0, 8, 0], sizes = [4, 8, 8], strides = [1, 1, 1]} : vector<4x16x8xf32> to vector<4x8x8xf32>
    %c0_45 = arith.constant 0 : index
    %c0_46 = arith.constant 0 : index
    %c0_47 = arith.constant 0 : index
    %c0_48 = arith.constant 0 : index
    %100 = vector.load %arg31[%c0_45, %c0_46, %c0_47, %c0_48] : memref<1x4x8x8xf32, #tpu.memory_space<vmem>>, vector<1x4x8x8xf32>
    %101 = vector.shape_cast %100 : vector<1x4x8x8xf32> to vector<4x8x8xf32>
    %102 = vector.shape_cast %99 : vector<4x8x8xf32> to vector<1x4x8x8xf32>
    tpu.vector_store %arg31[%c0_45, %c0_46, %c0_47, %c0_48], %102 {strides = array<i32>} : memref<1x4x8x8xf32, #tpu.memory_space<vmem>>, vector<1x4x8x8xf32>,
    %103 = vector.extract_strided_slice %94 {offsets = [0, 0, 0], sizes = [4, 8, 8], strides = [1, 1, 1]} : vector<4x16x8xf32> to vector<4x8x8xf32>
    %c0_49 = arith.constant 0 : index
    %c0_50 = arith.constant 0 : index
    %c0_51 = arith.constant 0 : index
    %c0_52 = arith.constant 0 : index
    %104 = vector.load %arg29[%c0_49, %c0_50, %c0_51, %c0_52] : memref<1x4x8x8xf32, #tpu.memory_space<vmem>>, vector<1x4x8x8xf32>
    %105 = vector.shape_cast %104 : vector<1x4x8x8xf32> to vector<4x8x8xf32>
    %106 = vector.shape_cast %103 : vector<4x8x8xf32> to vector<1x4x8x8xf32>
    tpu.vector_store %arg29[%c0_49, %c0_50, %c0_51, %c0_52], %106 {strides = array<i32>} : memref<1x4x8x8xf32, #tpu.memory_space<vmem>>, vector<1x4x8x8xf32>,
    %107 = vector.extract_strided_slice %94 {offsets = [0, 8, 0], sizes = [4, 8, 8], strides = [1, 1, 1]} : vector<4x16x8xf32> to vector<4x8x8xf32>
    %c0_53 = arith.constant 0 : index
    %c0_54 = arith.constant 0 : index
    %c0_55 = arith.constant 0 : index
    %c0_56 = arith.constant 0 : index
    %108 = vector.load %arg30[%c0_53, %c0_54, %c0_55, %c0_56] : memref<1x4x8x8xf32, #tpu.memory_space<vmem>>, vector<1x4x8x8xf32>
    %109 = vector.shape_cast %108 : vector<1x4x8x8xf32> to vector<4x8x8xf32>
    %110 = vector.shape_cast %107 : vector<4x8x8xf32> to vector<1x4x8x8xf32>
    tpu.vector_store %arg30[%c0_53, %c0_54, %c0_55, %c0_56], %110 {strides = array<i32>} : memref<1x4x8x8xf32, #tpu.memory_space<vmem>>, vector<1x4x8x8xf32>,
    "tpu.trace_start"() <{level = 10 : i32, message = "hqk,hkd->hqd"}> : () -> ()
    %cst_57 = arith.constant dense<0.000000e+00> : vector<4x16x8xf32>
    %111 = tpu.matmul %78, %59, %cst_57 {dimension_numbers = #tpu.dot_dimension_numbers<[2], [1], [1], [2], [0, 0, 0, 1, 1, 2], [0], [0]>} : vector<4x16x8xf32>, vector<4x8x8xf32>, vector<4x16x8xf32> -> vector<4x16x8xf32>
    %cst_58 = arith.constant dense<0.000000e+00> : vector<4x16x8xf32>
    %112 = tpu.matmul %94, %60, %cst_58 {dimension_numbers = #tpu.dot_dimension_numbers<[2], [1], [1], [2], [0, 0, 0, 1, 1, 2], [0], [0]>} : vector<4x16x8xf32>, vector<4x8x8xf32>, vector<4x16x8xf32> -> vector<4x16x8xf32>
    "tpu.trace_stop"() : () -> ()
    %113 = arith.addf %111, %112 : vector<4x16x8xf32>
    %114 = tpu.transpose %113, [1, 0, 2] : vector<4x16x8xf32> -> vector<16x4x8xf32>
    %115 = vector.shape_cast %114 : vector<16x4x8xf32> to vector<16x32xf32>
    %c0_59 = arith.constant 0 : index
    %c0_60 = arith.constant 0 : index
    %116 = vector.load %arg14[%c0_59, %c0_60] : memref<32x32xf32, #tpu.memory_space<vmem>>, vector<32x32xf32>
    %cst_61 = arith.constant dense<0.000000e+00> : vector<16x32xf32>
    %117 = tpu.matmul %115, %116, %cst_61 {dimension_numbers = #tpu.dot_dimension_numbers<[1], [0], [0], [1], [0, 0, 1, 1], [], []>} : vector<16x32xf32>, vector<32x32xf32>, vector<16x32xf32> -> vector<16x32xf32>
    %c0_62 = arith.constant 0 : index
    %c0_63 = arith.constant 0 : index
    %118 = vector.load %arg15[%c0_62, %c0_63] : memref<1x32xf32, #tpu.memory_space<vmem>>, vector<1x32xf32>
    %119 = vector.broadcast %118 : vector<1x32xf32> to vector<16x32xf32>
    %120 = arith.addf %117, %119 : vector<16x32xf32>
    %121 = arith.addf %120, %1 : vector<16x32xf32>
    %c0_64 = arith.constant 0 : index
    %c0_65 = arith.constant 0 : index
    %122 = vector.load %arg16[%c0_64, %c0_65] : memref<32x64xf32, #tpu.memory_space<vmem>>, vector<32x64xf32>
    %cst_66 = arith.constant dense<0.000000e+00> : vector<16x64xf32>
    %123 = tpu.matmul %7, %122, %cst_66 {dimension_numbers = #tpu.dot_dimension_numbers<[1], [0], [0], [1], [0, 0, 1, 1], [], []>} : vector<16x32xf32>, vector<32x64xf32>, vector<16x64xf32> -> vector<16x64xf32>
    %c0_67 = arith.constant 0 : index
    %c0_68 = arith.constant 0 : index
    %124 = vector.load %arg17[%c0_67, %c0_68] : memref<1x64xf32, #tpu.memory_space<vmem>>, vector<1x64xf32>
    %125 = vector.broadcast %124 : vector<1x64xf32> to vector<16x64xf32>
    %126 = arith.addf %123, %125 : vector<16x64xf32>
    %127 = vector.extract_strided_slice %126 {offsets = [0, 0], sizes = [16, 32], strides = [1, 1]} : vector<16x64xf32> to vector<16x32xf32>
    %128 = vector.shape_cast %127 : vector<16x32xf32> to vector<16x4x8xf32>
    %129 = tpu.transpose %128, [1, 0, 2] : vector<16x4x8xf32> -> vector<4x16x8xf32>
    %130 = vector.extract_strided_slice %126 {offsets = [0, 32], sizes = [16, 32], strides = [1, 1]} : vector<16x64xf32> to vector<16x32xf32>
    %131 = vector.shape_cast %130 : vector<16x32xf32> to vector<16x4x8xf32>
    %132 = tpu.transpose %131, [1, 0, 2] : vector<16x4x8xf32> -> vector<4x16x8xf32>
    %c0_69 = arith.constant 0 : index
    %c0_70 = arith.constant 0 : index
    %133 = vector.load %arg8[%c0_69, %c0_70] : memref<1x32xf32, #tpu.memory_space<vmem>>, vector<1x32xf32>
    %c0_71 = arith.constant 0 : index
    %c0_72 = arith.constant 0 : index
    %134 = vector.load %arg9[%c0_71, %c0_72] : memref<1x32xf32, #tpu.memory_space<vmem>>, vector<1x32xf32>
    %cst_73 = arith.constant dense<0.000000e+00> : vector<16xf32>
    %135 = vector.multi_reduction <add>, %121, %cst_73 [1] : vector<16x32xf32> to vector<16xf32>
    %136 = vector.shape_cast %135 : vector<16xf32> to vector<16x1xf32>
    %cst_74 = arith.constant 3.200000e+01 : f32
    %137 = vector.broadcast %cst_74 : f32 to vector<16x1xf32>
    %138 = arith.divf %136, %137 : vector<16x1xf32>
    %139 = vector.broadcast %138 : vector<16x1xf32> to vector<16x32xf32>
    %140 = arith.subf %121, %139 : vector<16x32xf32>
    %141 = arith.mulf %140, %140 : vector<16x32xf32>
    %cst_75 = arith.constant dense<0.000000e+00> : vector<16xf32>
    %142 = vector.multi_reduction <add>, %141, %cst_75 [1] : vector<16x32xf32> to vector<16xf32>
    %143 = vector.shape_cast %142 : vector<16xf32> to vector<16x1xf32>
    %cst_76 = arith.constant 3.200000e+01 : f32
    %144 = vector.broadcast %cst_76 : f32 to vector<16x1xf32>
    %145 = arith.divf %143, %144 : vector<16x1xf32>
    %cst_77 = arith.constant 9.99999996E-13 : f32
    %146 = vector.broadcast %cst_77 : f32 to vector<16x1xf32>
    %147 = arith.addf %145, %146 : vector<16x1xf32>
    %148 = math.rsqrt %147 : vector<16x1xf32>
    %149 = vector.broadcast %148 : vector<16x1xf32> to vector<16x32xf32>
    %150 = arith.mulf %140, %149 : vector<16x32xf32>
    %151 = vector.broadcast %133 : vector<1x32xf32> to vector<16x32xf32>
    %152 = arith.mulf %150, %151 : vector<16x32xf32>
    %153 = vector.broadcast %134 : vector<1x32xf32> to vector<16x32xf32>
    %154 = arith.addf %152, %153 : vector<16x32xf32>
    %c0_78 = arith.constant 0 : index
    %c0_79 = arith.constant 0 : index
    %155 = vector.load %arg18[%c0_78, %c0_79] : memref<32x32xf32, #tpu.memory_space<vmem>>, vector<32x32xf32>
    %cst_80 = arith.constant dense<0.000000e+00> : vector<16x32xf32>
    %156 = tpu.matmul %154, %155, %cst_80 {dimension_numbers = #tpu.dot_dimension_numbers<[1], [0], [0], [1], [0, 0, 1, 1], [], []>} : vector<16x32xf32>, vector<32x32xf32>, vector<16x32xf32> -> vector<16x32xf32>
    %c0_81 = arith.constant 0 : index
    %c0_82 = arith.constant 0 : index
    %157 = vector.load %arg19[%c0_81, %c0_82] : memref<1x32xf32, #tpu.memory_space<vmem>>, vector<1x32xf32>
    %158 = vector.broadcast %157 : vector<1x32xf32> to vector<16x32xf32>
    %159 = arith.addf %156, %158 : vector<16x32xf32>
    %160 = vector.shape_cast %159 : vector<16x32xf32> to vector<16x4x8xf32>
    %161 = tpu.transpose %160, [1, 0, 2] : vector<16x4x8xf32> -> vector<4x16x8xf32>
    %cst_83 = arith.constant 0.353553385 : f32
    %162 = vector.broadcast %cst_83 : f32 to vector<4x16x8xf32>
    %163 = arith.mulf %161, %162 : vector<4x16x8xf32>
    "tpu.trace_start"() <{level = 10 : i32, message = "hqd,hkd->hqk"}> : () -> ()
    %cst_84 = arith.constant dense<0.000000e+00> : vector<4x16x16xf32>
    %164 = tpu.matmul %163, %129, %cst_84 {dimension_numbers = #tpu.dot_dimension_numbers<[2], [2], [1], [1], [0, 0, 0, 1, 1, 1], [0], [0]>} : vector<4x16x8xf32>, vector<4x16x8xf32>, vector<4x16x16xf32> -> vector<4x16x16xf32>
    "tpu.trace_stop"() : () -> ()
    %165 = vector.shape_cast %18 : vector<16x16xi1> to vector<1x16x16xi1>
    %cst_85 = arith.constant -3.40282347E+38 : f32
    %166 = vector.shape_cast %165 : vector<1x16x16xi1> to vector<1x16x16xi1>
    %167 = vector.broadcast %166 : vector<1x16x16xi1> to vector<4x16x16xi1>
    %168 = vector.broadcast %cst_85 : f32 to vector<4x16x16xf32>
    %169 = arith.select %167, %164, %168 : vector<4x16x16xi1>, vector<4x16x16xf32>
    %cst_86 = arith.constant dense<0xFF800000> : vector<4x16xf32>
    %170 = vector.multi_reduction <maximumf>, %169, %cst_86 [2] : vector<4x16x16xf32> to vector<4x16xf32>
    %171 = vector.shape_cast %170 : vector<4x16xf32> to vector<4x16x1xf32>
    %172 = vector.broadcast %171 : vector<4x16x1xf32> to vector<4x16x16xf32>
    %173 = arith.subf %169, %172 : vector<4x16x16xf32>
    %174 = math.exp %173 : vector<4x16x16xf32>
    %cst_87 = arith.constant dense<0.000000e+00> : vector<4x16xf32>
    %175 = vector.multi_reduction <add>, %174, %cst_87 [2] : vector<4x16x16xf32> to vector<4x16xf32>
    %176 = vector.shape_cast %175 : vector<4x16xf32> to vector<4x16x1xf32>
    %cst_88 = arith.constant 1.000000e+00 : f32
    %177 = vector.broadcast %cst_88 : f32 to vector<4x16x1xf32>
    %178 = arith.divf %177, %176 : vector<4x16x1xf32>
    %179 = vector.broadcast %178 : vector<4x16x1xf32> to vector<4x16x16xf32>
    %180 = arith.mulf %174, %179 : vector<4x16x16xf32>
    %181 = vector.extract_strided_slice %180 {offsets = [0, 0, 0], sizes = [4, 8, 16], strides = [1, 1, 1]} : vector<4x16x16xf32> to vector<4x8x16xf32>
    %c0_89 = arith.constant 0 : index
    %c0_90 = arith.constant 0 : index
    %c0_91 = arith.constant 0 : index
    %c0_92 = arith.constant 0 : index
    %182 = vector.load %arg32[%c0_89, %c0_90, %c0_91, %c0_92] : memref<1x4x8x16xf32, #tpu.memory_space<vmem>>, vector<1x4x8x16xf32>
    %183 = vector.shape_cast %182 : vector<1x4x8x16xf32> to vector<4x8x16xf32>
    %184 = vector.shape_cast %181 : vector<4x8x16xf32> to vector<1x4x8x16xf32>
    tpu.vector_store %arg32[%c0_89, %c0_90, %c0_91, %c0_92], %184 {strides = array<i32>} : memref<1x4x8x16xf32, #tpu.memory_space<vmem>>, vector<1x4x8x16xf32>,
    %185 = vector.extract_strided_slice %180 {offsets = [0, 8, 0], sizes = [4, 8, 16], strides = [1, 1, 1]} : vector<4x16x16xf32> to vector<4x8x16xf32>
    %c0_93 = arith.constant 0 : index
    %c0_94 = arith.constant 0 : index
    %c0_95 = arith.constant 0 : index
    %c0_96 = arith.constant 0 : index
    %186 = vector.load %arg33[%c0_93, %c0_94, %c0_95, %c0_96] : memref<1x4x8x16xf32, #tpu.memory_space<vmem>>, vector<1x4x8x16xf32>
    %187 = vector.shape_cast %186 : vector<1x4x8x16xf32> to vector<4x8x16xf32>
    %188 = vector.shape_cast %185 : vector<4x8x16xf32> to vector<1x4x8x16xf32>
    tpu.vector_store %arg33[%c0_93, %c0_94, %c0_95, %c0_96], %188 {strides = array<i32>} : memref<1x4x8x16xf32, #tpu.memory_space<vmem>>, vector<1x4x8x16xf32>,
    "tpu.trace_start"() <{level = 10 : i32, message = "hqk,hkd->hqd"}> : () -> ()
    %cst_97 = arith.constant dense<0.000000e+00> : vector<4x16x8xf32>
    %189 = tpu.matmul %180, %132, %cst_97 {dimension_numbers = #tpu.dot_dimension_numbers<[2], [1], [1], [2], [0, 0, 0, 1, 1, 2], [0], [0]>} : vector<4x16x16xf32>, vector<4x16x8xf32>, vector<4x16x8xf32> -> vector<4x16x8xf32>
    "tpu.trace_stop"() : () -> ()
    %190 = tpu.transpose %189, [1, 0, 2] : vector<4x16x8xf32> -> vector<16x4x8xf32>
    %191 = vector.shape_cast %190 : vector<16x4x8xf32> to vector<16x32xf32>
    %c0_98 = arith.constant 0 : index
    %c0_99 = arith.constant 0 : index
    %192 = vector.load %arg20[%c0_98, %c0_99] : memref<32x32xf32, #tpu.memory_space<vmem>>, vector<32x32xf32>
    %cst_100 = arith.constant dense<0.000000e+00> : vector<16x32xf32>
    %193 = tpu.matmul %191, %192, %cst_100 {dimension_numbers = #tpu.dot_dimension_numbers<[1], [0], [0], [1], [0, 0, 1, 1], [], []>} : vector<16x32xf32>, vector<32x32xf32>, vector<16x32xf32> -> vector<16x32xf32>
    %c0_101 = arith.constant 0 : index
    %c0_102 = arith.constant 0 : index
    %194 = vector.load %arg21[%c0_101, %c0_102] : memref<1x32xf32, #tpu.memory_space<vmem>>, vector<1x32xf32>
    %195 = vector.broadcast %194 : vector<1x32xf32> to vector<16x32xf32>
    %196 = arith.addf %193, %195 : vector<16x32xf32>
    %197 = arith.addf %196, %121 : vector<16x32xf32>
    %c0_103 = arith.constant 0 : index
    %c0_104 = arith.constant 0 : index
    %198 = vector.load %arg10[%c0_103, %c0_104] : memref<1x32xf32, #tpu.memory_space<vmem>>, vector<1x32xf32>
    %c0_105 = arith.constant 0 : index
    %c0_106 = arith.constant 0 : index
    %199 = vector.load %arg11[%c0_105, %c0_106] : memref<1x32xf32, #tpu.memory_space<vmem>>, vector<1x32xf32>
    %cst_107 = arith.constant dense<0.000000e+00> : vector<16xf32>
    %200 = vector.multi_reduction <add>, %197, %cst_107 [1] : vector<16x32xf32> to vector<16xf32>
    %201 = vector.shape_cast %200 : vector<16xf32> to vector<16x1xf32>
    %cst_108 = arith.constant 3.200000e+01 : f32
    %202 = vector.broadcast %cst_108 : f32 to vector<16x1xf32>
    %203 = arith.divf %201, %202 : vector<16x1xf32>
    %204 = vector.broadcast %203 : vector<16x1xf32> to vector<16x32xf32>
    %205 = arith.subf %197, %204 : vector<16x32xf32>
    %206 = arith.mulf %205, %205 : vector<16x32xf32>
    %cst_109 = arith.constant dense<0.000000e+00> : vector<16xf32>
    %207 = vector.multi_reduction <add>, %206, %cst_109 [1] : vector<16x32xf32> to vector<16xf32>
    %208 = vector.shape_cast %207 : vector<16xf32> to vector<16x1xf32>
    %cst_110 = arith.constant 3.200000e+01 : f32
    %209 = vector.broadcast %cst_110 : f32 to vector<16x1xf32>
    %210 = arith.divf %208, %209 : vector<16x1xf32>
    %cst_111 = arith.constant 9.99999996E-13 : f32
    %211 = vector.broadcast %cst_111 : f32 to vector<16x1xf32>
    %212 = arith.addf %210, %211 : vector<16x1xf32>
    %213 = math.rsqrt %212 : vector<16x1xf32>
    %214 = vector.broadcast %213 : vector<16x1xf32> to vector<16x32xf32>
    %215 = arith.mulf %205, %214 : vector<16x32xf32>
    %216 = vector.broadcast %198 : vector<1x32xf32> to vector<16x32xf32>
    %217 = arith.mulf %215, %216 : vector<16x32xf32>
    %218 = vector.broadcast %199 : vector<1x32xf32> to vector<16x32xf32>
    %219 = arith.addf %217, %218 : vector<16x32xf32>
    %c0_112 = arith.constant 0 : index
    %c0_113 = arith.constant 0 : index
    %220 = vector.load %arg22[%c0_112, %c0_113] : memref<32x64xf32, #tpu.memory_space<vmem>>, vector<32x64xf32>
    %cst_114 = arith.constant dense<0.000000e+00> : vector<16x64xf32>
    %221 = tpu.matmul %219, %220, %cst_114 {dimension_numbers = #tpu.dot_dimension_numbers<[1], [0], [0], [1], [0, 0, 1, 1], [], []>} : vector<16x32xf32>, vector<32x64xf32>, vector<16x64xf32> -> vector<16x64xf32>
    %c0_115 = arith.constant 0 : index
    %c0_116 = arith.constant 0 : index
    %222 = vector.load %arg23[%c0_115, %c0_116] : memref<1x64xf32, #tpu.memory_space<vmem>>, vector<1x64xf32>
    %223 = vector.broadcast %222 : vector<1x64xf32> to vector<16x64xf32>
    %224 = arith.addf %221, %223 : vector<16x64xf32>
    %cst_117 = arith.constant 0.000000e+00 : f32
    %225 = vector.broadcast %cst_117 : f32 to vector<16x64xf32>
    %226 = arith.maximumf %224, %225 : vector<16x64xf32>
    %c0_118 = arith.constant 0 : index
    %c0_119 = arith.constant 0 : index
    %227 = vector.load %arg24[%c0_118, %c0_119] : memref<64x32xf32, #tpu.memory_space<vmem>>, vector<64x32xf32>
    %cst_120 = arith.constant dense<0.000000e+00> : vector<16x32xf32>
    %228 = tpu.matmul %226, %227, %cst_120 {dimension_numbers = #tpu.dot_dimension_numbers<[1], [0], [0], [1], [0, 0, 1, 1], [], []>} : vector<16x64xf32>, vector<64x32xf32>, vector<16x32xf32> -> vector<16x32xf32>
    %c0_121 = arith.constant 0 : index
    %c0_122 = arith.constant 0 : index
    %229 = vector.load %arg25[%c0_121, %c0_122] : memref<1x32xf32, #tpu.memory_space<vmem>>, vector<1x32xf32>
    %230 = vector.broadcast %229 : vector<1x32xf32> to vector<16x32xf32>
    %231 = arith.addf %228, %230 : vector<16x32xf32>
    %232 = arith.addf %231, %197 : vector<16x32xf32>
    %233 = vector.extract_strided_slice %232 {offsets = [0, 0], sizes = [8, 32], strides = [1, 1]} : vector<16x32xf32> to vector<8x32xf32>
    %c0_123 = arith.constant 0 : index
    %c0_124 = arith.constant 0 : index
    %c0_125 = arith.constant 0 : index
    %234 = vector.load %arg26[%c0_123, %c0_124, %c0_125] : memref<1x8x32xf32, #tpu.memory_space<vmem>>, vector<1x8x32xf32>
    %235 = vector.shape_cast %234 : vector<1x8x32xf32> to vector<8x32xf32>
    %236 = vector.shape_cast %233 : vector<8x32xf32> to vector<1x8x32xf32>
    tpu.vector_store %arg26[%c0_123, %c0_124, %c0_125], %236 {strides = array<i32>} : memref<1x8x32xf32, #tpu.memory_space<vmem>>, vector<1x8x32xf32>,
    %237 = vector.extract_strided_slice %232 {offsets = [8, 0], sizes = [8, 32], strides = [1, 1]} : vector<16x32xf32> to vector<8x32xf32>
    %c0_126 = arith.constant 0 : index
    %c0_127 = arith.constant 0 : index
    %c0_128 = arith.constant 0 : index
    %238 = vector.load %arg27[%c0_126, %c0_127, %c0_128] : memref<1x8x32xf32, #tpu.memory_space<vmem>>, vector<1x8x32xf32>
    %239 = vector.shape_cast %238 : vector<1x8x32xf32> to vector<8x32xf32>
    %240 = vector.shape_cast %237 : vector<8x32xf32> to vector<1x8x32xf32>
    tpu.vector_store %arg27[%c0_126, %c0_127, %c0_128], %240 {strides = array<i32>} : memref<1x8x32xf32, #tpu.memory_space<vmem>>, vector<1x8x32xf32>,
    return
  }
  func.func @transform_0(%arg0: i32) -> (i32, i32, i32) {
    %c0_i32 = arith.constant 0 : i32
    %c0_i32_0 = arith.constant 0 : i32
    %c0_i32_1 = arith.constant 0 : i32
    return %arg0, %c0_i32, %c0_i32_0 : i32, i32, i32
  }
  func.func @transform_1(%arg0: i32) -> (i32, i32, i32) {
    %c0_i32 = arith.constant 0 : i32
    %c0_i32_0 = arith.constant 0 : i32
    %c0_i32_1 = arith.constant 0 : i32
    return %arg0, %c0_i32, %c0_i32_0 : i32, i32, i32
  }
  func.func @transform_2(%arg0: i32) -> (i32, i32, i32) {
    %c0_i32 = arith.constant 0 : i32
    %c0_i32_0 = arith.constant 0 : i32
    %c0_i32_1 = arith.constant 0 : i32
    return %arg0, %c0_i32, %c0_i32_0 : i32, i32, i32
  }
  func.func @transform_3(%arg0: i32) -> (i32, i32, i32) {
    %c0_i32 = arith.constant 0 : i32
    %c0_i32_0 = arith.constant 0 : i32
    %c0_i32_1 = arith.constant 0 : i32
    return %arg0, %c0_i32, %c0_i32_0 : i32, i32, i32
  }
  func.func @transform_4(%arg0: i32) -> (i32, i32, i32) {
    %c0_i32 = arith.constant 0 : i32
    %c0_i32_0 = arith.constant 0 : i32
    %c0_i32_1 = arith.constant 0 : i32
    return %arg0, %c0_i32, %c0_i32_0 : i32, i32, i32
  }
  func.func @transform_5(%arg0: i32) -> (i32, i32) {
    %c0_i32 = arith.constant 0 : i32
    %c0_i32_0 = arith.constant 0 : i32
    %c0_i32_1 = arith.constant 0 : i32
    return %c0_i32, %c0_i32_0 : i32, i32
  }
  func.func @transform_6(%arg0: i32) -> (i32, i32) {
    %c0_i32 = arith.constant 0 : i32
    %c0_i32_0 = arith.constant 0 : i32
    %c0_i32_1 = arith.constant 0 : i32
    return %c0_i32, %c0_i32_0 : i32, i32
  }
  func.func @transform_7(%arg0: i32) -> (i32, i32) {
    %c0_i32 = arith.constant 0 : i32
    %c0_i32_0 = arith.constant 0 : i32
    %c0_i32_1 = arith.constant 0 : i32
    return %c0_i32, %c0_i32_0 : i32, i32
  }
  func.func @transform_8(%arg0: i32) -> (i32, i32) {
    %c0_i32 = arith.constant 0 : i32
    %c0_i32_0 = arith.constant 0 : i32
    %c0_i32_1 = arith.constant 0 : i32
    return %c0_i32, %c0_i32_0 : i32, i32
  }
  func.func @transform_9(%arg0: i32) -> (i32, i32) {
    %c0_i32 = arith.constant 0 : i32
    %c0_i32_0 = arith.constant 0 : i32
    %c0_i32_1 = arith.constant 0 : i32
    return %c0_i32, %c0_i32_0 : i32, i32
  }
  func.func @transform_10(%arg0: i32) -> (i32, i32) {
    %c0_i32 = arith.constant 0 : i32
    %c0_i32_0 = arith.constant 0 : i32
    %c0_i32_1 = arith.constant 0 : i32
    return %c0_i32, %c0_i32_0 : i32, i32
  }
  func.func @transform_11(%arg0: i32) -> (i32, i32) {
    %c0_i32 = arith.constant 0 : i32
    %c0_i32_0 = arith.constant 0 : i32
    %c0_i32_1 = arith.constant 0 : i32
    return %c0_i32, %c0_i32_0 : i32, i32
  }
  func.func @transform_12(%arg0: i32) -> (i32, i32) {
    %c0_i32 = arith.constant 0 : i32
    %c0_i32_0 = arith.constant 0 : i32
    %c0_i32_1 = arith.constant 0 : i32
    return %c0_i32, %c0_i32_0 : i32, i32
  }
  func.func @transform_13(%arg0: i32) -> (i32, i32) {
    %c0_i32 = arith.constant 0 : i32
    %c0_i32_0 = arith.constant 0 : i32
    %c0_i32_1 = arith.constant 0 : i32
    return %c0_i32, %c0_i32_0 : i32, i32
  }
  func.func @transform_14(%arg0: i32) -> (i32, i32) {
    %c0_i32 = arith.constant 0 : i32
    %c0_i32_0 = arith.constant 0 : i32
    %c0_i32_1 = arith.constant 0 : i32
    return %c0_i32, %c0_i32_0 : i32, i32
  }
  func.func @transform_15(%arg0: i32) -> (i32, i32) {
    %c0_i32 = arith.constant 0 : i32
    %c0_i32_0 = arith.constant 0 : i32
    %c0_i32_1 = arith.constant 0 : i32
    return %c0_i32, %c0_i32_0 : i32, i32
  }
  func.func @transform_16(%arg0: i32) -> (i32, i32) {
    %c0_i32 = arith.constant 0 : i32
    %c0_i32_0 = arith.constant 0 : i32
    %c0_i32_1 = arith.constant 0 : i32
    return %c0_i32, %c0_i32_0 : i32, i32
  }
  func.func @transform_17(%arg0: i32) -> (i32, i32) {
    %c0_i32 = arith.constant 0 : i32
    %c0_i32_0 = arith.constant 0 : i32
    %c0_i32_1 = arith.constant 0 : i32
    return %c0_i32, %c0_i32_0 : i32, i32
  }
  func.func @transform_18(%arg0: i32) -> (i32, i32) {
    %c0_i32 = arith.constant 0 : i32
    %c0_i32_0 = arith.constant 0 : i32
    %c0_i32_1 = arith.constant 0 : i32
    return %c0_i32, %c0_i32_0 : i32, i32
  }
  func.func @transform_19(%arg0: i32) -> (i32, i32) {
    %c0_i32 = arith.constant 0 : i32
    %c0_i32_0 = arith.constant 0 : i32
    %c0_i32_1 = arith.constant 0 : i32
    return %c0_i32, %c0_i32_0 : i32, i32
  }
  func.func @transform_20(%arg0: i32) -> (i32, i32) {
    %c0_i32 = arith.constant 0 : i32
    %c0_i32_0 = arith.constant 0 : i32
    %c0_i32_1 = arith.constant 0 : i32
    return %c0_i32, %c0_i32_0 : i32, i32
  }
  func.func @transform_21(%arg0: i32) -> (i32, i32) {
    %c0_i32 = arith.constant 0 : i32
    %c0_i32_0 = arith.constant 0 : i32
    %c0_i32_1 = arith.constant 0 : i32
    return %c0_i32, %c0_i32_0 : i32, i32
  }
  func.func @transform_22(%arg0: i32) -> (i32, i32) {
    %c0_i32 = arith.constant 0 : i32
    %c0_i32_0 = arith.constant 0 : i32
    %c0_i32_1 = arith.constant 0 : i32
    return %c0_i32, %c0_i32_0 : i32, i32
  }
  func.func @transform_23(%arg0: i32) -> (i32, i32) {
    %c0_i32 = arith.constant 0 : i32
    %c0_i32_0 = arith.constant 0 : i32
    %c0_i32_1 = arith.constant 0 : i32
    return %c0_i32, %c0_i32_0 : i32, i32
  }
  func.func @transform_24(%arg0: i32) -> (i32, i32) {
    %c0_i32 = arith.constant 0 : i32
    %c0_i32_0 = arith.constant 0 : i32
    %c0_i32_1 = arith.constant 0 : i32
    return %c0_i32, %c0_i32_0 : i32, i32
  }
  func.func @transform_25(%arg0: i32) -> (i32, i32, i32) {
    %c0_i32 = arith.constant 0 : i32
    %c0_i32_0 = arith.constant 0 : i32
    %c0_i32_1 = arith.constant 0 : i32
    return %arg0, %c0_i32, %c0_i32_0 : i32, i32, i32
  }
  func.func @transform_26(%arg0: i32) -> (i32, i32, i32) {
    %c0_i32 = arith.constant 0 : i32
    %c0_i32_0 = arith.constant 0 : i32
    %c0_i32_1 = arith.constant 0 : i32
    return %arg0, %c0_i32, %c0_i32_0 : i32, i32, i32
  }
  func.func @transform_27(%arg0: i32) -> (i32, i32, i32, i32) {
    %c0_i32 = arith.constant 0 : i32
    %c0_i32_0 = arith.constant 0 : i32
    %c0_i32_1 = arith.constant 0 : i32
    %c0_i32_2 = arith.constant 0 : i32
    return %arg0, %c0_i32, %c0_i32_0, %c0_i32_1 : i32, i32, i32, i32
  }
  func.func @transform_28(%arg0: i32) -> (i32, i32, i32, i32) {
    %c0_i32 = arith.constant 0 : i32
    %c0_i32_0 = arith.constant 0 : i32
    %c0_i32_1 = arith.constant 0 : i32
    %c0_i32_2 = arith.constant 0 : i32
    return %arg0, %c0_i32, %c0_i32_0, %c0_i32_1 : i32, i32, i32, i32
  }
  func.func @transform_29(%arg0: i32) -> (i32, i32, i32, i32) {
    %c0_i32 = arith.constant 0 : i32
    %c0_i32_0 = arith.constant 0 : i32
    %c0_i32_1 = arith.constant 0 : i32
    %c0_i32_2 = arith.constant 0 : i32
    return %arg0, %c0_i32, %c0_i32_0, %c0_i32_1 : i32, i32, i32, i32
  }
  func.func @transform_30(%arg0: i32) -> (i32, i32, i32, i32) {
    %c0_i32 = arith.constant 0 : i32
    %c0_i32_0 = arith.constant 0 : i32
    %c0_i32_1 = arith.constant 0 : i32
    %c0_i32_2 = arith.constant 0 : i32
    return %arg0, %c0_i32, %c0_i32_0, %c0_i32_1 : i32, i32, i32, i32
  }
  func.func @transform_31(%arg0: i32) -> (i32, i32, i32, i32) {
    %c0_i32 = arith.constant 0 : i32
    %c0_i32_0 = arith.constant 0 : i32
    %c0_i32_1 = arith.constant 0 : i32
    %c0_i32_2 = arith.constant 0 : i32
    return %arg0, %c0_i32, %c0_i32_0, %c0_i32_1 : i32, i32, i32, i32
  }
  func.func @transform_32(%arg0: i32) -> (i32, i32, i32, i32) {
    %c0_i32 = arith.constant 0 : i32
    %c0_i32_0 = arith.constant 0 : i32
    %c0_i32_1 = arith.constant 0 : i32
    %c0_i32_2 = arith.constant 0 : i32
    return %arg0, %c0_i32, %c0_i32_0, %c0_i32_1 : i32, i32, i32, i32
  }
}

</mosaic_0001>

<bundles_post_ra>
// kernel: tpu_custom_call.1
= control target key start
LH: loop header
LB: loop body
LE: loop exit
PB: predicated region body
PF: predicated region fallthrough
CT: control target
= control target key end

     0   :  { %s9905_s6 = smov 1   ;;  %s9906_s10 = smov 2   ;;  %s11955_s0 = inlined_call_operand.smem [shape: u32[33], index: -1, kind: input, shape index: {}] }
   0x1   :  { %s9991_s5 = sld [smem:[%s11955_s0]]   ;;  %s9907_s14 = smov 3  }
   0x2   :  { %s9996_s9 = sld [smem:[%s11955_s0 + %s9905_s6]]   ;;  %s9908_s18 = smov 4  }
   0x3   :  { %s10001_s13 = sld [smem:[%s11955_s0 + %s9906_s10]]   ;;  %s9909_s22 = smov 5  }
   0x4   :  { %s10006_s17 = sld [smem:[%s11955_s0 + %s9907_s14]]   ;;  %s9910_s26 = smov 6  }
   0x5   :  { %s10011_s21 = sld [smem:[%s11955_s0 + %s9908_s18]]   ;;  %s9911_s30 = smov 7  }
   0x6   :  { %s10016_s25 = sld [smem:[%s11955_s0 + %s9909_s22]]   ;;  %s9912_s4 = smov 8  }
   0x7   :  { %12023 = sst [smem:[#allocation71_spill]] %s9991_s5  ;;  %s9913_s10 = smov 9  }
   0x8   :  { %12024 = sst [smem:[#allocation72_spill]] %s9996_s9  ;;  %s9914_s15 = smov 10  }
   0x9   :  { %12025 = sst [smem:[#allocation73_spill]] %s10001_s13  ;;  %s9915_s20 = smov 11  }
   0xa   :  { %12026 = sst [smem:[#allocation74_spill]] %s10006_s17  ;;  %s9917_s1 = smov 13  }
   0xb   :  { %12027 = sst [smem:[#allocation75_spill]] %s10011_s21  ;;  %s9918_s7 = smov 14  }
   0xc   :  { %12028 = sst [smem:[#allocation76_spill]] %s10016_s25  ;;  %s9920_s22 = smov 16  }
   0xd   :  { %s10021_s29 = sld [smem:[%s11955_s0 + %s9910_s26]]   ;;  %s9916_s26 = smov 12  }
   0xe   :  { %s10026_s3 = sld [smem:[%s11955_s0 + %s9911_s30]]   ;;  %s9921_s28 = smov 17  }
   0xf   :  { %s10031_s8 = sld [smem:[%s11955_s0 + %s9912_s4]]  }
  0x10   :  { %s10036_s14 = sld [smem:[%s11955_s0 + %s9913_s10]]  }
  0x11   :  { %s10041_s19 = sld [smem:[%s11955_s0 + %s9914_s15]]   ;;  %s9919_s15 = smov 15  }
  0x12   :  { %s10046_s24 = sld [smem:[%s11955_s0 + %s9915_s20]]  }
  0x13   :  { %12029 = sst [smem:[#allocation77_spill]] %s10021_s29 }
  0x14   :  { %12030 = sst [smem:[#allocation78_spill]] %s10026_s3 }
  0x15   :  { %12031 = sst [smem:[#allocation79_spill]] %s10031_s8 }
  0x16   :  { %12032 = sst [smem:[#allocation80_spill]] %s10036_s14 }
  0x17   :  { %12033 = sst [smem:[#allocation81_spill]] %s10041_s19 }
  0x18   :  { %12034 = sst [smem:[#allocation82_spill]] %s10046_s24 }
  0x19   :  { %s10051_s30 = sld [smem:[%s11955_s0 + %s9916_s26]]  }
  0x1a   :  { %s10056_s6 = sld [smem:[%s11955_s0 + %s9917_s1]]  }
  0x1b   :  { %s10061_s12 = sld [smem:[%s11955_s0 + %s9918_s7]]   ;;  %s9922_s7 = smov 18  }
  0x1c   :  { %s10066_s20 = sld [smem:[%s11955_s0 + %s9919_s15]]   ;;  %s9923_s15 = smov 19  }
  0x1d   :  { %s10071_s27 = sld [smem:[%s11955_s0 + %s9920_s22]]   ;;  %s9924_s22 = smov 20  }
  0x1e   :  { %s10076_s4 = sld [smem:[%s11955_s0 + %s9921_s28]]   ;;  %s9925_s28 = smov 21  }
  0x1f   :  { %12035 = sst [smem:[#allocation83_spill]] %s10051_s30 }
  0x20   :  { %12036 = sst [smem:[#allocation84_spill]] %s10056_s6 }
  0x21   :  { %12037 = sst [smem:[#allocation85_spill]] %s10061_s12 }
  0x22   :  { %12038 = sst [smem:[#allocation86_spill]] %s10066_s20 }
  0x23   :  { %12039 = sst [smem:[#allocation87_spill]] %s10071_s27 }
  0x24   :  { %12040 = sst [smem:[#allocation88_spill]] %s10076_s4 }
  0x25   :  { %s10081_s21 = sld [smem:[%s11955_s0 + %s9922_s7]]   ;;  %s9926_s7 = smov 22  }
  0x26   :  { %s10086_s13 = sld [smem:[%s11955_s0 + %s9923_s15]]   ;;  %s9927_s15 = smov 23  }
  0x27   :  { %s10091_s5 = sld [smem:[%s11955_s0 + %s9924_s22]]   ;;  %s9928_s22 = smov 24  }
  0x28   :  { %s10096_s27 = sld [smem:[%s11955_s0 + %s9925_s28]]   ;;  %s9929_s28 = smov 25  }
  0x29   :  { %s10106_s12 = sld [smem:[%s11955_s0 + %s9927_s15]]   ;;  %s9931_s15 = smov 27  }
  0x2a   :  { %s10116_s30 = sld [smem:[%s11955_s0 + %s9929_s28]]   ;;  %s9933_s28 = smov 29  }
  0x2b   :  { %12041 = sst [smem:[#allocation89_spill]] %s10081_s21 }
  0x2c   :  { %12042 = sst [smem:[#allocation90_spill]] %s10086_s13 }
  0x2d   :  { %12043 = sst [smem:[#allocation91_spill]] %s10091_s5 }
  0x2e   :  { %12044 = sst [smem:[#allocation92_spill]] %s10096_s27 }
  0x2f   :  { %s10101_s21 = sld [smem:[%s11955_s0 + %s9926_s7]]   ;;  %s9930_s7 = smov 26  }
  0x30   :  { %12046 = sst [smem:[#allocation94_spill]] %s10106_s12 }
  0x31   :  { %s10111_s5 = sld [smem:[%s11955_s0 + %s9928_s22]]   ;;  %s9932_s22 = smov 28  }
  0x32   :  { %12048 = sst [smem:[#allocation96_spill]] %s10116_s30 }
  0x33   :  { %s10126_s19 = sld [smem:[%s11955_s0 + %s9931_s15]]   ;;  %s9935_s15 = smov 31  }
  0x34   :  { %s10136_s30 = sld [smem:[%s11955_s0 + %s9933_s28]]  }
  0x35   :  { %12045 = sst [smem:[#allocation93_spill]] %s10101_s21 }
  0x36   :  { %s10121_s21 = sld [smem:[%s11955_s0 + %s9930_s7]]   ;;  %s9934_s7 = smov 30  }
  0x37   :  { %12047 = sst [smem:[#allocation95_spill]] %s10111_s5 }
  0x38   :  { %s10131_s5 = sld [smem:[%s11955_s0 + %s9932_s22]]   ;;  %s9936_s22 = smov 32  }
  0x39   :  { %12050 = sst [smem:[#allocation98_spill]] %s10126_s19 }
  0x3a   :  { %s10146_s19 = sld [smem:[%s11955_s0 + %s9935_s15]]  }
  0x3c   :  { %12049 = sst [smem:[#allocation97_spill]] %s10121_s21 }
  0x3d   :  { %s10141_s21 = sld [smem:[%s11955_s0 + %s9934_s7]]  }
  0x3e   :  { %12051 = sst [smem:[#allocation99_spill]] %s10131_s5 }
  0x3f   :  { %s10151_s5 = sld [smem:[%s11955_s0 + %s9936_s22]]  }
  0x40   :  { %12052 = sst [smem:[#allocation100_spill]] %s10146_s19 }
  0x45   :  { %12053 = sst [smem:[#allocation101_spill]] %s10151_s5 }
  0x46   :  { %71 = vsyncpa [#allocation3], 0 }
  0x47   :  { %73 = vsyncpa [#allocation3 + $0x1], 0 }
  0x48   :  { %74 = vsyncpa [#allocation6], 0 }
  0x49   :  { %76 = vsyncpa [#allocation6 + $0x1], 0 }
  0x4a   :  { %77 = vsyncpa [#allocation9], 0 }
  0x4b   :  { %79 = vsyncpa [#allocation9 + $0x1], 0 }
  0x4c   :  { %80 = vsyncpa [#allocation12], 0 }
  0x4d   :  { %81 = vsyncpa [#allocation15], 0 }
  0x4e   :  { %82 = vsyncpa [#allocation18], 0 }
  0x4f   :  { %83 = vsyncpa [#allocation21], 0 }
  0x50   :  { %84 = vsyncpa [#allocation24], 0 }
  0x51   :  { %85 = vsyncpa [#allocation27], 0 }
  0x52   :  { %86 = vsyncpa [#allocation30], 0 }
  0x53   :  { %87 = vsyncpa [#allocation33], 0 }
  0x54   :  { %88 = vsyncpa [#allocation36], 0 }
  0x55   :  { %89 = vsyncpa [#allocation39], 0 }
  0x56   :  { %90 = vsyncpa [#allocation4], 0 }
  0x57   :  { %92 = vsyncpa [#allocation4 + $0x1], 0 }
  0x58   :  { %93 = vsyncpa [#allocation43], 0 }
  0x59   :  { %95 = vsyncpa [#allocation43 + $0x1], 0 }
  0x5a   :  { %96 = vsyncpa [#allocation46], 0 }
  0x5b   :  { %98 = vsyncpa [#allocation46 + $0x1], 0 }
  0x5c   :  { %99 = vsyncpa [#allocation49], 0 }
  0x5d   :  { %101 = vsyncpa [#allocation49 + $0x1], 0 }
  0x5e   :  { %102 = vsyncpa [#allocation52], 0 }
  0x5f   :  { %104 = vsyncpa [#allocation52 + $0x1], 0  ;;  %s10153_s0 = smov 0   ;;  %s10155_s28 = smov 0  }
  0x60   :  { %s10157_s1 = smov 0   ;;  %s10159_s2 = smov 0  }
  0x61 LB: > { %s12054_s8 = sld [smem:[#allocation79_spill]]  ;;  %s12055_s29 = sld [smem:[#allocation77_spill]]  ;;  %s9895_s28 = sphi %s10155_s28, %s12148_s28   ;;  %s9891_s0 = sphi %s10153_s0, %s12147_s0   ;;  %s9903_s2 = sphi %s10159_s2, %s12144_s2   ;;  %s9899_s1 = sphi %s10157_s1, %s12146_s1  }
  0x62   : > { %s12056_s17 = sld [smem:[#allocation74_spill]]  ;;  %s12057_s9 = sld [smem:[#allocation72_spill]] }
  0x63   : > { %s12058_s27 = sld [smem:[#allocation92_spill]]  ;;  %s12060_s24 = sld [smem:[#allocation82_spill]] }
  0x64   : > { %s12059_s25 = sld [smem:[#allocation76_spill]]  ;;  %s12061_s20 = sld [smem:[#allocation86_spill]] }
  0x65   : > { %s12062_s13 = sld [smem:[#allocation90_spill]]  ;;  %s12063_s12 = sld [smem:[#allocation94_spill]] }
  0x66   : > { %s12064_s6 = sld [smem:[#allocation84_spill]]  ;;  %s12065_s4 = sld [smem:[#allocation88_spill]] }
  0x67   : > { %s12066_s14 = sld [smem:[#allocation80_spill]]  ;;  %s12067_s3 = sld [smem:[#allocation78_spill]] }
  0x68   : > { %12068 = sst [smem:[#allocation102_spill]] %s9899_s1  ;;  %s9937_s7 = smov [#allocation11]  }
  0x69   : > { %s886_s10 = sshll.u32 %s9937_s7, 4  ;;  %s10174_s11 = sadd.s32 4294967295, %s9903_s2   ;;  %s10179_s10 = int_to_ptr.vmem [resolvable:$true] %s886_s10 }
  0x6a   : > { %p7728_p0 = scmp.ge.s32.totalorder %s9903_s2, 1  ;;  %p11973_p1 = scmp.eq.s32.totalorder %s10174_s11, 0 }
  0x6b   : > { %p873_p2 = scmp.lt.s32.totalorder %s9903_s2, 3  ;;  %s9938_s16 = smov [#allocation14]  }
  0x6c   : > { %s908_s18 = sshll.u32 %s9938_s16, 4  ;;  %s9939_s22 = smov [#allocation17]   ;;  %s10188_s18 = int_to_ptr.vmem [resolvable:$true] %s908_s18 }
  0x6d   : > { %p10181_p3 = pnand %p7728_p0, %p873_p2  ;;  %s930_s23 = sshll.u32 %s9939_s22, 4  ;;  %s10196_s23 = int_to_ptr.vmem [resolvable:$true] %s930_s23 }
  0x6e   : > { %s9940_s7 = smov [#allocation20]   ;;  %s8867_s19 = scalar_lea.hbm %s12059_s25, 16 }
  0x6f   : > { %s12069_s15 = scalar_select %p10181_p3, 1, 0 }
  0x70   : > { %p8516_p5 = pneg %p10181_p3  ;;  %s10198_s5 = sshll.u32 %s9940_s7, 4  ;;  %s952_s5 = int_to_ptr.vmem [resolvable:$true] %s10198_s5 }
  0x71   : > { %p8868_p7 = scmp.ne.s32.totalorder %s12059_s25, %s8867_s19  ;;  %p8874_p11 = scmp.lt.u32.totalorder %s8867_s19, %s12059_s25 }
  0x72   : > { %p10192_p6 = pnand %p8516_p5, %p11973_p1 }
  0x74   : > { %s12070_s26 = scalar_select %p10192_p6, 1, 0 }
  0x75   : > { %p10204_p8 = pneg %p10192_p6 }
  0x77   : > { %s12071_s16 = scalar_select %p10204_p8, 1, 0 }
  0x78   : > { %p8870_p9 = pnand %p10204_p8, %p8868_p7 }
  0x7a   : > { %p8871_p10 = pneg %p8870_p9 }
  0x7c   : > { %p8876_p12 = pnand %p8874_p11, %p8871_p10 }
  0x7e   : > { %8879 = shalt.err (!%p8876_p12)
}
  0x7f   : > { %s8880_s22 = scalar_lea.vmem %s10179_s10, 16  ;;  %s8887_s7 = scalar_lea.vmem %s10179_s10, 32 }
  0x80   : > { %p8881_p13 = scmp.ne.s32.totalorder %s10179_s10, %s8880_s22  ;;  %p8888_p5 = scmp.lt.s32.totalorder %s10179_s10, %s10179_s10 }
  0x81   : > { %p8889_p4 = scmp.lt.s32.totalorder %s8887_s7, %s8880_s22 }
  0x82   : > { %p8883_p0 = pnand %p8881_p13, %p10204_p8 }
  0x83   : > { %p8890_p1 = por %p8889_p4, %p8888_p5 }
  0x84   : > { %p8884_p2 = pneg %p8883_p0 }
  0x86   : > { %p8891_p7 = pnand %p8890_p1, %p8884_p2 }
  0x88   : > { %8894 = shalt.err (!%p8891_p7)
}
  0x89   : > { %8519 = dma.hbm_to_vmem [thread:$0]  (!%p10192_p6), %s12059_s25, 16, %s10179_s10, [#allocation12]  }
  0x8a   : > { %s8895_s19 = scalar_lea.hbm %s12067_s3, 16 }
  0x8b   : > { %p8896_p9 = scmp.ne.s32.totalorder %s12067_s3, %s8895_s19  ;;  %p8902_p12 = scmp.lt.u32.totalorder %s8895_s19, %s12067_s3 }
  0x8d   : > { %p8898_p10 = pnand %p8896_p9, %p10204_p8 }
  0x8f   : > { %p8899_p11 = pneg %p8898_p10 }
  0x91   : > { %p8904_p13 = pnand %p8902_p12, %p8899_p11 }
  0x93   : > { %8907 = shalt.err (!%p8904_p13)
}
  0x94   : > { %s8908_s22 = scalar_lea.vmem %s10188_s18, 16  ;;  %s8915_s7 = scalar_lea.vmem %s10188_s18, 32 }
  0x95   : > { %p8909_p1 = scmp.ne.s32.totalorder %s10188_s18, %s8908_s22  ;;  %p8916_p2 = scmp.lt.s32.totalorder %s10188_s18, %s10188_s18 }
  0x96   : > { %p8917_p5 = scmp.lt.s32.totalorder %s8915_s7, %s8908_s22 }
  0x97   : > { %p8911_p4 = pnand %p8909_p1, %p10204_p8 }
  0x98   : > { %p8918_p7 = por %p8917_p5, %p8916_p2 }
  0x99   : > { %p8912_p0 = pneg %p8911_p4 }
  0x9b   : > { %p8919_p9 = pnand %p8918_p7, %p8912_p0 }
  0x9d   : > { %8922 = shalt.err (!%p8919_p9)
}
  0x9e   : > { %8525 = dma.hbm_to_vmem [thread:$0]  (!%p10192_p6), %s12067_s3, 16, %s10188_s18, [#allocation15]  }
  0x9f   : > { %s8923_s10 = scalar_lea.hbm %s12066_s14, 16 }
  0xa0   : > { %p8924_p10 = scmp.ne.s32.totalorder %s12066_s14, %s8923_s10  ;;  %p8930_p13 = scmp.lt.u32.totalorder %s8923_s10, %s12066_s14 }
  0xa2   : > { %p8926_p11 = pnand %p8924_p10, %p10204_p8 }
  0xa4   : > { %p8927_p12 = pneg %p8926_p11 }
  0xa6   : > { %p8932_p1 = pnand %p8930_p13, %p8927_p12 }
  0xa8   : > { %8935 = shalt.err (!%p8932_p1)
}
  0xa9   : > { %s8936_s19 = scalar_lea.vmem %s10196_s23, 16  ;;  %s8943_s22 = scalar_lea.vmem %s10196_s23, 32 }
  0xaa   : > { %p8937_p4 = scmp.ne.s32.totalorder %s10196_s23, %s8936_s19  ;;  %p8944_p5 = scmp.lt.s32.totalorder %s10196_s23, %s10196_s23 }
  0xab   : > { %p8945_p7 = scmp.lt.s32.totalorder %s8943_s22, %s8936_s19 }
  0xac   : > { %p8939_p0 = pnand %p8937_p4, %p10204_p8 }
  0xad   : > { %p8946_p9 = por %p8945_p7, %p8944_p5 }
  0xae   : > { %p8940_p2 = pneg %p8939_p0 }
  0xb0   : > { %p8947_p10 = pnand %p8946_p9, %p8940_p2 }
  0xb2   : > { %8950 = shalt.err (!%p8947_p10)
}
  0xb3   : > { %8531 = dma.hbm_to_vmem [thread:$0]  (!%p10192_p6), %s12066_s14, 16, %s10196_s23, [#allocation18]  }
  0xb4   : > { %s8951_s18 = scalar_lea.hbm %s12060_s24, 512 }
  0xb5   : > { %p8952_p11 = scmp.ne.s32.totalorder %s12060_s24, %s8951_s18  ;;  %p8958_p1 = scmp.lt.u32.totalorder %s8951_s18, %s12060_s24 }
  0xb7   : > { %p8954_p12 = pnand %p8952_p11, %p10204_p8 }
  0xb9   : > { %p8955_p13 = pneg %p8954_p12 }
  0xbb   : > { %p8960_p4 = pnand %p8958_p1, %p8955_p13 }
  0xbd   : > { %8963 = shalt.err (!%p8960_p4)
}
  0xbe   : > { %s8964_s7 = scalar_lea.vmem %s952_s5, 512  ;;  %p8972_p7 = scmp.lt.s32.totalorder %s952_s5, %s952_s5 }
  0xbf   : > { %p8965_p0 = scmp.ne.s32.totalorder %s952_s5, %s8964_s7  ;;  %p8973_p9 = scmp.lt.s32.totalorder %s8964_s7, %s8964_s7 }
  0xc1   : > { %p8967_p2 = pnand %p8965_p0, %p10204_p8  ;;  %p8974_p10 = por %p8973_p9, %p8972_p7 }
  0xc3   : > { %p8968_p5 = pneg %p8967_p2 }
  0xc5   : > { %p8975_p3 = pnand %p8974_p10, %p8968_p5 }
  0xc7   : > { %8978 = shalt.err (!%p8975_p3)
}
  0xc8   : > { %s11977_s23 = smov 128   ;;  %s11980_s10 = smov 8  }
  0xc9   : > { %8537 = dma.hbm_to_vmem [thread:$0]  (!%p10192_p6), %s12060_s24, 512, %s952_s5, [#allocation21], %s11977_s23, %s11977_s23, %s11980_s10  }
  0xca   : > { %s9943_s19 = smov [#allocation23]   ;;  %s9944_s18 = smov [#allocation26]  }
  0xcb   : > { %s975_s22 = sshll.u32 %s9943_s19, 4  ;;  %s999_s7 = sshll.u32 %s9944_s18, 4  ;;  %s976_s22 = int_to_ptr.vmem [resolvable:$true] %s975_s22  ;;  %s10268_s7 = int_to_ptr.vmem [resolvable:$true] %s999_s7 }
  0xcc   : > { %s8979_s3 = scalar_lea.hbm %s12064_s6, 512 }
  0xcd   : > { %p8980_p3 = scmp.ne.s32.totalorder %s12064_s6, %s8979_s3  ;;  %p8986_p13 = scmp.lt.u32.totalorder %s8979_s3, %s12064_s6 }
  0xcf   : > { %p8982_p11 = pnand %p8980_p3, %p10204_p8 }
  0xd1   : > { %p8983_p12 = pneg %p8982_p11 }
  0xd3   : > { %p8988_p1 = pnand %p8986_p13, %p8983_p12 }
  0xd5   : > { %8991 = shalt.err (!%p8988_p1)
}
  0xd6   : > { %s8992_s14 = scalar_lea.vmem %s976_s22, 512  ;;  %p9000_p5 = scmp.lt.s32.totalorder %s976_s22, %s976_s22 }
  0xd7   : > { %p8993_p4 = scmp.ne.s32.totalorder %s976_s22, %s8992_s14  ;;  %p9001_p7 = scmp.lt.s32.totalorder %s8992_s14, %s8992_s14 }
  0xd9   : > { %p8995_p0 = pnand %p8993_p4, %p10204_p8  ;;  %p9002_p9 = por %p9001_p7, %p9000_p5 }
  0xdb   : > { %p8996_p2 = pneg %p8995_p0 }
  0xdd   : > { %p9003_p10 = pnand %p9002_p9, %p8996_p2 }
  0xdf   : > { %9006 = shalt.err (!%p9003_p10)
}
  0xe0   : > { %8543 = dma.hbm_to_vmem [thread:$0]  (!%p10192_p6), %s12064_s6, 512, %s976_s22, [#allocation24], %s11977_s23, %s11977_s23, %s11980_s10  }
  0xe1   : > { %s9007_s5 = scalar_lea.hbm %s12061_s20, 512 }
  0xe2   : > { %p9008_p3 = scmp.ne.s32.totalorder %s12061_s20, %s9007_s5  ;;  %p9014_p13 = scmp.lt.u32.totalorder %s9007_s5, %s12061_s20 }
  0xe4   : > { %p9010_p11 = pnand %p9008_p3, %p10204_p8 }
  0xe6   : > { %p9011_p12 = pneg %p9010_p11 }
  0xe8   : > { %p9016_p1 = pnand %p9014_p13, %p9011_p12 }
  0xea   : > { %9019 = shalt.err (!%p9016_p1)
}
  0xeb   : > { %s9020_s3 = scalar_lea.vmem %s10268_s7, 512  ;;  %p9028_p5 = scmp.lt.s32.totalorder %s10268_s7, %s10268_s7 }
  0xec   : > { %p9021_p4 = scmp.ne.s32.totalorder %s10268_s7, %s9020_s3  ;;  %p9029_p7 = scmp.lt.s32.totalorder %s9020_s3, %s9020_s3 }
  0xee   : > { %p9023_p0 = pnand %p9021_p4, %p10204_p8  ;;  %p9030_p9 = por %p9029_p7, %p9028_p5 }
  0xf0   : > { %p9024_p2 = pneg %p9023_p0 }
  0xf2   : > { %p9031_p10 = pnand %p9030_p9, %p9024_p2 }
  0xf4   : > { %9034 = shalt.err (!%p9031_p10)
}
  0xf5   : > { %8549 = dma.hbm_to_vmem [thread:$0]  (!%p10192_p6), %s12061_s20, 512, %s10268_s7, [#allocation27], %s11977_s23, %s11977_s23, %s11980_s10  }
  0xf6   : > { %s9945_s14 = smov [#allocation29]   ;;  %s9946_s22 = smov [#allocation32]  }
  0xf7   : > { %s1023_s19 = sshll.u32 %s9945_s14, 4  ;;  %s1047_s18 = sshll.u32 %s9946_s22, 4  ;;  %s1024_s19 = int_to_ptr.vmem [resolvable:$true] %s1023_s19  ;;  %s10301_s18 = int_to_ptr.vmem [resolvable:$true] %s1047_s18 }
  0xf8   : > { %s9035_s5 = scalar_lea.hbm %s12065_s4, 512 }
  0xf9   : > { %p9036_p3 = scmp.ne.s32.totalorder %s12065_s4, %s9035_s5  ;;  %p9042_p13 = scmp.lt.u32.totalorder %s9035_s5, %s12065_s4 }
  0xfb   : > { %p9038_p11 = pnand %p9036_p3, %p10204_p8 }
  0xfd   : > { %p9039_p12 = pneg %p9038_p11 }
  0xff   : > { %p9044_p1 = pnand %p9042_p13, %p9039_p12 }
 0x101   : > { %9047 = shalt.err (!%p9044_p1)
}
 0x102   : > { %s9048_s3 = scalar_lea.vmem %s1024_s19, 512  ;;  %p9056_p5 = scmp.lt.s32.totalorder %s1024_s19, %s1024_s19 }
 0x103   : > { %p9049_p4 = scmp.ne.s32.totalorder %s1024_s19, %s9048_s3  ;;  %p9057_p7 = scmp.lt.s32.totalorder %s9048_s3, %s9048_s3 }
 0x105   : > { %p9051_p0 = pnand %p9049_p4, %p10204_p8  ;;  %p9058_p9 = por %p9057_p7, %p9056_p5 }
 0x107   : > { %p9052_p2 = pneg %p9051_p0 }
 0x109   : > { %p9059_p10 = pnand %p9058_p9, %p9052_p2 }
 0x10b   : > { %9062 = shalt.err (!%p9059_p10)
}
 0x10c   : > { %8555 = dma.hbm_to_vmem [thread:$0]  (!%p10192_p6), %s12065_s4, 512, %s1024_s19, [#allocation30], %s11977_s23, %s11977_s23, %s11980_s10  }
 0x10d   : > { %s9063_s7 = scalar_lea.hbm %s12062_s13, 512 }
 0x10e   : > { %p9064_p3 = scmp.ne.s32.totalorder %s12062_s13, %s9063_s7  ;;  %p9070_p13 = scmp.lt.u32.totalorder %s9063_s7, %s12062_s13 }
 0x110   : > { %p9066_p11 = pnand %p9064_p3, %p10204_p8 }
 0x112   : > { %p9067_p12 = pneg %p9066_p11 }
 0x114   : > { %p9072_p1 = pnand %p9070_p13, %p9067_p12 }
 0x116   : > { %9075 = shalt.err (!%p9072_p1)
}
 0x117   : > { %s9076_s14 = scalar_lea.vmem %s10301_s18, 512  ;;  %p9084_p5 = scmp.lt.s32.totalorder %s10301_s18, %s10301_s18 }
 0x118   : > { %p9077_p4 = scmp.ne.s32.totalorder %s10301_s18, %s9076_s14  ;;  %p9085_p7 = scmp.lt.s32.totalorder %s9076_s14, %s9076_s14 }
 0x11a   : > { %p9079_p0 = pnand %p9077_p4, %p10204_p8  ;;  %p9086_p9 = por %p9085_p7, %p9084_p5 }
 0x11c   : > { %p9080_p2 = pneg %p9079_p0 }
 0x11e   : > { %p9087_p10 = pnand %p9086_p9, %p9080_p2 }
 0x120   : > { %9090 = shalt.err (!%p9087_p10)
}
 0x121   : > { %8561 = dma.hbm_to_vmem [thread:$0]  (!%p10192_p6), %s12062_s13, 512, %s10301_s18, [#allocation33], %s11977_s23, %s11977_s23, %s11980_s10  }
 0x122   : > { %s9947_s19 = smov [#allocation35]   ;;  %s9948_s5 = smov [#allocation38]  }
 0x123   : > { %s1071_s22 = sshll.u32 %s9947_s19, 4  ;;  %s1095_s3 = sshll.u32 %s9948_s5, 4  ;;  %s1072_s22 = int_to_ptr.vmem [resolvable:$true] %s1071_s22  ;;  %s10334_s3 = int_to_ptr.vmem [resolvable:$true] %s1095_s3 }
 0x124   : > { %s9091_s7 = scalar_lea.hbm %s12058_s27, 512 }
 0x125   : > { %p9092_p3 = scmp.ne.s32.totalorder %s12058_s27, %s9091_s7  ;;  %p9098_p13 = scmp.lt.u32.totalorder %s9091_s7, %s12058_s27 }
 0x127   : > { %p9094_p11 = pnand %p9092_p3, %p10204_p8 }
 0x129   : > { %p9095_p12 = pneg %p9094_p11 }
 0x12b   : > { %p9100_p1 = pnand %p9098_p13, %p9095_p12 }
 0x12d   : > { %9103 = shalt.err (!%p9100_p1)
}
 0x12e   : > { %s9104_s14 = scalar_lea.vmem %s1072_s22, 512  ;;  %p9112_p5 = scmp.lt.s32.totalorder %s1072_s22, %s1072_s22 }
 0x12f   : > { %p9105_p4 = scmp.ne.s32.totalorder %s1072_s22, %s9104_s14  ;;  %p9113_p7 = scmp.lt.s32.totalorder %s9104_s14, %s9104_s14 }
 0x131   : > { %p9107_p0 = pnand %p9105_p4, %p10204_p8  ;;  %p9114_p9 = por %p9113_p7, %p9112_p5 }
 0x133   : > { %p9108_p2 = pneg %p9107_p0 }
 0x135   : > { %p9115_p10 = pnand %p9114_p9, %p9108_p2 }
 0x137   : > { %9118 = shalt.err (!%p9115_p10)
}
 0x138   : > { %8567 = dma.hbm_to_vmem [thread:$0]  (!%p10192_p6), %s12058_s27, 512, %s1072_s22, [#allocation36], %s11977_s23, %s11977_s23, %s11980_s10  }
 0x139   : > { %s9119_s18 = scalar_lea.hbm %s12063_s12, 1024 }
 0x13a   : > { %p9120_p3 = scmp.ne.s32.totalorder %s12063_s12, %s9119_s18  ;;  %p9126_p13 = scmp.lt.u32.totalorder %s9119_s18, %s12063_s12 }
 0x13c   : > { %p9122_p11 = pnand %p9120_p3, %p10204_p8 }
 0x13e   : > { %p9123_p12 = pneg %p9122_p11 }
 0x140   : > { %p9128_p1 = pnand %p9126_p13, %p9123_p12 }
 0x142   : > { %9131 = shalt.err (!%p9128_p1)
}
 0x143   : > { %s9132_s19 = scalar_lea.vmem %s10334_s3, 1024  ;;  %p9140_p5 = scmp.lt.s32.totalorder %s10334_s3, %s10334_s3 }
 0x144   : > { %p9133_p4 = scmp.ne.s32.totalorder %s10334_s3, %s9132_s19  ;;  %p9141_p7 = scmp.lt.s32.totalorder %s9132_s19, %s9132_s19 }
 0x146   : > { %p9135_p0 = pnand %p9133_p4, %p10204_p8  ;;  %p9142_p9 = por %p9141_p7, %p9140_p5 }
 0x148   : > { %p9136_p2 = pneg %p9135_p0 }
 0x14a   : > { %p9143_p10 = pnand %p9142_p9, %p9136_p2 }
 0x14c   : > { %9146 = shalt.err (!%p9143_p10)
}
 0x14d   : > { %8573 = dma.hbm_to_vmem [thread:$0]  (!%p10192_p6), %s12063_s12, 1024, %s10334_s3, [#allocation39], %s11977_s23, %s11977_s23, %s11980_s10  }
 0x14e   : > { %s11979_s22 = sadd.s32 4294967294, %s9903_s2   ;;  %s10369_s5 = sadd.s32 1, %s9903_s2  }
 0x14f   : > { %12072 = sst [smem:[#allocation103_spill]] %s10369_s5  ;;  %s114_s7 = ssub.s32 %s9903_s2, %s10369_s5 }
 0x150   : > { %s117_s14 = sadd.s32 1, %s9899_s1  ;;  %p115_p3 = scmp.eq.s32.totalorder %s114_s7, 0 }
 0x151   : > { %p124_p11 = scmp.ne.s32.totalorder %s9899_s1, %s9895_s28  ;;  %p125_p12 = scmp.eq.s32.totalorder %s9903_s2, 0 }
 0x152   : > { %p130_p13 = scmp.ne.s32.totalorder %s9895_s28, %s9891_s0  ;;  %p12074_p4 = scmp.eq.s32.totalorder %s10174_s11, 0 }
 0x153   : > { %s10380_s18 = scalar_select %p115_p3, %s9899_s1, %s117_s14  }
 0x154   : > { %p126_p1 = por %p125_p12, %p124_p11  ;;  %p10384_p0 = por %p12074_p4, %p130_p13 }
 0x155   : > { %12073 = sst [smem:[#allocation104_spill]] %s10380_s18  ;;  %p678_p2 = scmp.eq.s32.totalorder %s10174_s11, 1 }
 0x156   : > { %s12075_s3 = scalar_select %p10384_p0, 1, 0 }
 0x157   : > { %p684_p5 = scmp.eq.s32.totalorder %s11979_s22, 1  ;;  %p8638_p7 = scmp.lt.s32.totalorder %s9903_s2, 2 }
 0x158   : > { %s10393_s19 = sand.u32 1, %s9899_s1   ;;  %p10395_p9 = por %p678_p2, %p124_p11 }
 0x159   : > { %p10399_p10 = por %p684_p5, %p130_p13  ;;  %p10403_p3 = pnand %p8638_p7, %p126_p1 }
 0x15a   : > { %s12076_s7 = scalar_select %p10395_p9, 1, 0 }
 0x15b   : > { %s12077_s14 = scalar_select %p10399_p10, 1, 0 }
 0x15c   : > { %s12079_s23 = scalar_select %p10403_p3, 1, 0 }
 0x15d   : > { %12078 = sst [smem:[#allocation105_spill]] %s12077_s14  ;;  %s11990_s22 = sand.u32 1, %s9903_s2  }
 0x15e   : > { %s10409_s10 = sshll.u32 %s10393_s19, 3  ;;  %s10412_s4 = sshll.u32 %s9903_s2, 7 }
 0x15f   : > { %s1145_s6 = scalar_lea.vmem [#allocation5], %s10409_s10  ;;  %s10417_s13 = scalar_lea.hbm %s12057_s9, %s10412_s4 }
 0x160   : > { %s1152_s12 = sshll.u32 %s1145_s6, 4  ;;  %s10423_s20 = scalar_lea.sflag [#allocation6], %s11990_s22  ;;  %s10419_s12 = int_to_ptr.vmem [resolvable:$true] %s1152_s12 }
 0x161   : > { %s9147_s24 = scalar_lea.hbm %s10417_s13, 128  ;;  %p10429_p12 = pneg %p10403_p3 }
 0x162   : > { %p9148_p11 = scmp.ne.s32.totalorder %s10417_s13, %s9147_s24  ;;  %s9152_s6 = scalar_lea.hbm %s12057_s9, 256 }
 0x163   : > { %s12080_s25 = scalar_select %p10429_p12, 1, 0 }
 0x164   : > { %p9150_p13 = pnand %p10429_p12, %p9148_p11  ;;  %p9153_p4 = scmp.lt.u32.totalorder %s10417_s13, %s12057_s9 }
 0x165   : > { %p9154_p2 = scmp.lt.u32.totalorder %s9152_s6, %s9147_s24  ;;  %p9156_p7 = scmp.lt.u32.totalorder %s9147_s24, %s10417_s13 }
 0x166   : > { %p9151_p1 = pneg %p9150_p13 }
 0x167   : > { %p9155_p5 = por %p9154_p2, %p9153_p4 }
 0x169   : > { %p9157_p10 = por %p9156_p7, %p9155_p5 }
 0x16b   : > { %p9158_p9 = pnand %p9157_p10, %p9151_p1 }
 0x16d   : > { %9161 = shalt.err (!%p9158_p9)
}
 0x16e   : > { %s9162_s22 = scalar_lea.vmem %s10419_s12, 128  ;;  %s9949_s27 = smov [#allocation5]  }
 0x16f   : > { %p9163_p0 = scmp.ne.s32.totalorder %s10419_s12, %s9162_s22  ;;  %s9167_s18 = sshll.u32 %s9949_s27, 4  ;;  %s9168_s18 = int_to_ptr.vmem [resolvable:$false] %s9167_s18 }
 0x170   : > { %s9169_s1 = scalar_lea.vmem %s9168_s18, 256  ;;  %p9170_p11 = scmp.lt.s32.totalorder %s10419_s12, %s9168_s18 }
 0x171   : > { %p9165_p6 = pnand %p9163_p0, %p10429_p12  ;;  %p9171_p13 = scmp.lt.s32.totalorder %s9169_s1, %s9162_s22 }
 0x173   : > { %p9166_p8 = pneg %p9165_p6  ;;  %p9172_p4 = por %p9171_p13, %p9170_p11 }
 0x175   : > { %p9173_p2 = pnand %p9172_p4, %p9166_p8 }
 0x177   : > { %9176 = shalt.err (!%p9173_p2)
}
 0x178   : > { %8583 = dma.hbm_to_vmem [thread:$0]  (!%p10403_p3), %s10417_s13, 128, %s10419_s12, %s10423_s20  }
 0x179   : > { %s12001_s24 = sshll.u32 %s10393_s19, 4  ;;  %s12002_s27 = sshll.u32 %s9903_s2, 8 }
 0x17a   : > { %s10454_s1 = scalar_lea.hbm %s12056_s17, %s12002_s27  ;;  %s1181_s22 = scalar_lea.vmem [#allocation8], %s12001_s24 }
 0x17b   : > { %s1188_s18 = sshll.u32 %s1181_s22, 4  ;;  %s12081_s6 = sand.u32 1, %s9903_s2   ;;  %s10458_s18 = int_to_ptr.vmem [resolvable:$true] %s1188_s18 }
 0x17c   : > { %s10462_s9 = scalar_lea.sflag [#allocation9], %s12081_s6  ;;  %s9177_s5 = scalar_lea.hbm %s10454_s1, 256 }
 0x17d   : > { %p9178_p6 = scmp.ne.s32.totalorder %s10454_s1, %s9177_s5  ;;  %s9182_s13 = scalar_lea.hbm %s12056_s17, 512 }
 0x17e   : > { %p9183_p9 = scmp.lt.u32.totalorder %s10454_s1, %s12056_s17  ;;  %p9184_p10 = scmp.lt.u32.totalorder %s9182_s13, %s9177_s5 }
 0x17f   : > { %p9180_p8 = pnand %p9178_p6, %p10429_p12  ;;  %p9186_p5 = scmp.lt.u32.totalorder %s9177_s5, %s10454_s1 }
 0x180   : > { %p9185_p1 = por %p9184_p10, %p9183_p9 }
 0x181   : > { %p9181_p0 = pneg %p9180_p8 }
 0x182   : > { %p9187_p7 = por %p9186_p5, %p9185_p1 }
 0x184   : > { %p9188_p11 = pnand %p9187_p7, %p9181_p0 }
 0x186   : > { %9191 = shalt.err (!%p9188_p11)
}
 0x187   : > { %s9192_s12 = scalar_lea.vmem %s10458_s18, 256  ;;  %s9950_s22 = smov [#allocation8]  }
 0x188   : > { %p9193_p13 = scmp.ne.s32.totalorder %s10458_s18, %s9192_s12  ;;  %s9197_s6 = sshll.u32 %s9950_s22, 4  ;;  %s9198_s6 = int_to_ptr.vmem [resolvable:$false] %s9197_s6 }
 0x189   : > { %s9199_s24 = scalar_lea.vmem %s9198_s6, 512  ;;  %p9200_p6 = scmp.lt.s32.totalorder %s10458_s18, %s9198_s6 }
 0x18a   : > { %p9195_p4 = pnand %p9193_p13, %p10429_p12  ;;  %p9201_p8 = scmp.lt.s32.totalorder %s9199_s24, %s9192_s12 }
 0x18c   : > { %p9196_p2 = pneg %p9195_p4  ;;  %p9202_p9 = por %p9201_p8, %p9200_p6 }
 0x18e   : > { %p9203_p10 = pnand %p9202_p9, %p9196_p2 }
 0x190   : > { %9206 = shalt.err (!%p9203_p10)
}
 0x191   : > { %s12082_s5 = smov 8   ;;  %s12083_s13 = smov 128  }
 0x192   : > { %8589 = dma.hbm_to_vmem [thread:$0]  (!%p10403_p3), %s10454_s1, 256, %s10458_s18, %s10462_s9, %s12083_s13, %s12083_s13, %s12082_s5  }
 0x193   : > { %s9951_s22 = smov [#allocation13]   ;;  %s9952_s24 = smov [#allocation16]  }
 0x194   : > { %s897_s27 = sshll.u32 %s9951_s22, 4  ;;  %s919_s12 = sshll.u32 %s9952_s24, 4  ;;  %s898_s27 = int_to_ptr.vmem [resolvable:$true] %s897_s27  ;;  %s920_s12 = int_to_ptr.vmem [resolvable:$true] %s919_s12 }
 0x195   : > { %s9207_s6 = scalar_lea.hbm %s12055_s29, 16  ;;  %p12084_p1 = scmp.ne.s32.totalorder %s12071_s16, 0 }
 0x196   : > { %p9208_p0 = scmp.ne.s32.totalorder %s12055_s29, %s9207_s6  ;;  %p9214_p11 = scmp.lt.u32.totalorder %s9207_s6, %s12055_s29 }
 0x198   : > { %p9210_p5 = pnand %p9208_p0, %p12084_p1 }
 0x19a   : > { %p9211_p7 = pneg %p9210_p5 }
 0x19c   : > { %p9216_p13 = pnand %p9214_p11, %p9211_p7 }
 0x19e   : > { %9219 = shalt.err (!%p9216_p13)
}
 0x19f   : > { %s9220_s17 = scalar_lea.vmem %s898_s27, 16  ;;  %s9227_s1 = scalar_lea.vmem %s898_s27, 32 }
 0x1a0   : > { %p9221_p4 = scmp.ne.s32.totalorder %s898_s27, %s9220_s17  ;;  %p9228_p8 = scmp.lt.s32.totalorder %s898_s27, %s898_s27 }
 0x1a1   : > { %p9229_p9 = scmp.lt.s32.totalorder %s9227_s1, %s9220_s17 }
 0x1a2   : > { %p9223_p2 = pnand %p9221_p4, %p12084_p1 }
 0x1a3   : > { %p9230_p10 = por %p9229_p9, %p9228_p8 }
 0x1a4   : > { %p9224_p6 = pneg %p9223_p2 }
 0x1a6   : > { %p9231_p3 = pnand %p9230_p10, %p9224_p6 }
 0x1a8   : > { %9234 = shalt.err (!%p9231_p3)
}
 0x1a9   : > { %p12085_p12 = scmp.ne.s32.totalorder %s12070_s26, 0  ;;  %s9235_s18 = scalar_lea.hbm %s12054_s8, 16 }
 0x1aa   : > { %p9236_p0 = scmp.ne.s32.totalorder %s12054_s8, %s9235_s18  ;;  %p9242_p11 = scmp.lt.u32.totalorder %s9235_s18, %s12054_s8 }
 0x1ab   : > { %8522 = dma.hbm_to_vmem [thread:$0]  (!%p12085_p12), %s12055_s29, 16, %s898_s27, [#allocation12]  }
 0x1ac   : > { %p9238_p5 = pnand %p9236_p0, %p12084_p1 }
 0x1ae   : > { %p9239_p7 = pneg %p9238_p5 }
 0x1b0   : > { %p9244_p13 = pnand %p9242_p11, %p9239_p7 }
 0x1b2   : > { %9247 = shalt.err (!%p9244_p13)
}
 0x1b3   : > { %s9248_s17 = scalar_lea.vmem %s920_s12, 16  ;;  %s9255_s22 = scalar_lea.vmem %s920_s12, 32 }
 0x1b4   : > { %p9249_p3 = scmp.ne.s32.totalorder %s920_s12, %s9248_s17  ;;  %p9256_p6 = scmp.lt.s32.totalorder %s920_s12, %s920_s12 }
 0x1b5   : > { %p9257_p8 = scmp.lt.s32.totalorder %s9255_s22, %s9248_s17 }
 0x1b6   : > { %p9251_p4 = pnand %p9249_p3, %p12084_p1 }
 0x1b7   : > { %p9258_p9 = por %p9257_p8, %p9256_p6 }
 0x1b8   : > { %p9252_p2 = pneg %p9251_p4 }
 0x1ba   : > { %p9259_p10 = pnand %p9258_p9, %p9252_p2 }
 0x1bc   : > { %9262 = shalt.err (!%p9259_p10)
}
 0x1bd   : > { %s12086_s27 = sld [smem:[#allocation81_spill]]  ;;  %s9953_s24 = smov [#allocation19]  }
 0x1be   : > { %8528 = dma.hbm_to_vmem [thread:$0]  (!%p12085_p12), %s12054_s8, 16, %s920_s12, [#allocation15]  }
 0x1bf   : > { %s941_s6 = sshll.u32 %s9953_s24, 4  ;;  %s9954_s1 = smov [#allocation22]   ;;  %s942_s6 = int_to_ptr.vmem [resolvable:$true] %s941_s6 }
 0x1c0   : > { %s965_s18 = sshll.u32 %s9954_s1, 4  ;;  %s966_s18 = int_to_ptr.vmem [resolvable:$true] %s965_s18 }
 0x1c3   : > { %s9263_s29 = scalar_lea.hbm %s12086_s27, 16 }
 0x1c4   : > { %p9264_p0 = scmp.ne.s32.totalorder %s12086_s27, %s9263_s29  ;;  %p9270_p11 = scmp.lt.u32.totalorder %s9263_s29, %s12086_s27 }
 0x1c6   : > { %p9266_p5 = pnand %p9264_p0, %p12084_p1 }
 0x1c8   : > { %p9267_p7 = pneg %p9266_p5 }
 0x1ca   : > { %p9272_p13 = pnand %p9270_p11, %p9267_p7 }
 0x1cc   : > { %9275 = shalt.err (!%p9272_p13)
}
 0x1cd   : > { %s9276_s17 = scalar_lea.vmem %s942_s6, 16  ;;  %s9283_s12 = scalar_lea.vmem %s942_s6, 32 }
 0x1ce   : > { %p9277_p3 = scmp.ne.s32.totalorder %s942_s6, %s9276_s17  ;;  %p9284_p6 = scmp.lt.s32.totalorder %s942_s6, %s942_s6 }
 0x1cf   : > { %p9285_p8 = scmp.lt.s32.totalorder %s9283_s12, %s9276_s17 }
 0x1d0   : > { %p9279_p4 = pnand %p9277_p3, %p12084_p1 }
 0x1d1   : > { %p9286_p9 = por %p9285_p8, %p9284_p6 }
 0x1d2   : > { %p9280_p2 = pneg %p9279_p4 }
 0x1d4   : > { %p9287_p10 = pnand %p9286_p9, %p9280_p2 }
 0x1d6   : > { %9290 = shalt.err (!%p9287_p10)
}
 0x1d7   : > { %s12087_s22 = sld [smem:[#allocation83_spill]] }
 0x1d8   : > { %8534 = dma.hbm_to_vmem [thread:$0]  (!%p12085_p12), %s12086_s27, 16, %s942_s6, [#allocation18]  }
 0x1dd   : > { %s9291_s29 = scalar_lea.hbm %s12087_s22, 16 }
 0x1de   : > { %p9292_p0 = scmp.ne.s32.totalorder %s12087_s22, %s9291_s29  ;;  %p9298_p11 = scmp.lt.u32.totalorder %s9291_s29, %s12087_s22 }
 0x1e0   : > { %p9294_p5 = pnand %p9292_p0, %p12084_p1 }
 0x1e2   : > { %p9295_p7 = pneg %p9294_p5 }
 0x1e4   : > { %p9300_p13 = pnand %p9298_p11, %p9295_p7 }
 0x1e6   : > { %9303 = shalt.err (!%p9300_p13)
}
 0x1e7   : > { %s9304_s24 = scalar_lea.vmem %s966_s18, 16  ;;  %s9311_s1 = scalar_lea.vmem %s966_s18, 32 }
 0x1e8   : > { %p9305_p3 = scmp.ne.s32.totalorder %s966_s18, %s9304_s24  ;;  %p9312_p6 = scmp.lt.s32.totalorder %s966_s18, %s966_s18 }
 0x1e9   : > { %p9313_p8 = scmp.lt.s32.totalorder %s9311_s1, %s9304_s24 }
 0x1ea   : > { %p9307_p4 = pnand %p9305_p3, %p12084_p1 }
 0x1eb   : > { %p9314_p9 = por %p9313_p8, %p9312_p6 }
 0x1ec   : > { %p9308_p2 = pneg %p9307_p4 }
 0x1ee   : > { %p9315_p10 = pnand %p9314_p9, %p9308_p2 }
 0x1f0   : > { %9318 = shalt.err (!%p9315_p10)
}
 0x1f1   : > { %s12088_s6 = sld [smem:[#allocation85_spill]]  ;;  %s9955_s17 = smov [#allocation25]  }
 0x1f2   : > { %8540 = dma.hbm_to_vmem [thread:$0]  (!%p12085_p12), %s12087_s22, 16, %s966_s18, [#allocation21]  }
 0x1f3   : > { %s989_s12 = sshll.u32 %s9955_s17, 4  ;;  %s9956_s29 = smov [#allocation28]   ;;  %s990_s12 = int_to_ptr.vmem [resolvable:$true] %s989_s12 }
 0x1f4   : > { %s1013_s8 = sshll.u32 %s9956_s29, 4  ;;  %s1014_s8 = int_to_ptr.vmem [resolvable:$true] %s1013_s8 }
 0x1f7   : > { %s9319_s27 = scalar_lea.hbm %s12088_s6, 16 }
 0x1f8   : > { %p9320_p0 = scmp.ne.s32.totalorder %s12088_s6, %s9319_s27  ;;  %p9326_p11 = scmp.lt.u32.totalorder %s9319_s27, %s12088_s6 }
 0x1fa   : > { %p9322_p5 = pnand %p9320_p0, %p12084_p1 }
 0x1fc   : > { %p9323_p7 = pneg %p9322_p5 }
 0x1fe   : > { %p9328_p13 = pnand %p9326_p11, %p9323_p7 }
 0x200   : > { %9331 = shalt.err (!%p9328_p13)
}
 0x201   : > { %s9332_s24 = scalar_lea.vmem %s990_s12, 16  ;;  %s9339_s18 = scalar_lea.vmem %s990_s12, 32 }
 0x202   : > { %p9333_p3 = scmp.ne.s32.totalorder %s990_s12, %s9332_s24  ;;  %p9340_p6 = scmp.lt.s32.totalorder %s990_s12, %s990_s12 }
 0x203   : > { %p9341_p8 = scmp.lt.s32.totalorder %s9339_s18, %s9332_s24 }
 0x204   : > { %p9335_p4 = pnand %p9333_p3, %p12084_p1 }
 0x205   : > { %p9342_p9 = por %p9341_p8, %p9340_p6 }
 0x206   : > { %p9336_p2 = pneg %p9335_p4 }
 0x208   : > { %p9343_p10 = pnand %p9342_p9, %p9336_p2 }
 0x20a   : > { %9346 = shalt.err (!%p9343_p10)
}
 0x20b   : > { %s12089_s1 = sld [smem:[#allocation87_spill]] }
 0x20c   : > { %8546 = dma.hbm_to_vmem [thread:$0]  (!%p12085_p12), %s12088_s6, 16, %s990_s12, [#allocation24]  }
 0x211   : > { %s12090_s17 = smov %s12089_s1  ;;  %s9347_s27 = scalar_lea.hbm %s12089_s1, 16 }
 0x212   : > { %p9348_p0 = scmp.ne.s32.totalorder %s12090_s17, %s9347_s27  ;;  %p9354_p11 = scmp.lt.u32.totalorder %s9347_s27, %s12090_s17 }
 0x214   : > { %p9350_p5 = pnand %p9348_p0, %p12084_p1 }
 0x216   : > { %p9351_p7 = pneg %p9350_p5 }
 0x218   : > { %p9356_p13 = pnand %p9354_p11, %p9351_p7 }
 0x21a   : > { %9359 = shalt.err (!%p9356_p13)
}
 0x21b   : > { %s9360_s29 = scalar_lea.vmem %s1014_s8, 16  ;;  %s9367_s24 = scalar_lea.vmem %s1014_s8, 32 }
 0x21c   : > { %p9361_p3 = scmp.ne.s32.totalorder %s1014_s8, %s9360_s29  ;;  %p9368_p6 = scmp.lt.s32.totalorder %s1014_s8, %s1014_s8 }
 0x21d   : > { %p9369_p8 = scmp.lt.s32.totalorder %s9367_s24, %s9360_s29 }
 0x21e   : > { %p9363_p4 = pnand %p9361_p3, %p12084_p1 }
 0x21f   : > { %p9370_p9 = por %p9369_p8, %p9368_p6 }
 0x220   : > { %p9364_p2 = pneg %p9363_p4 }
 0x222   : > { %p9371_p10 = pnand %p9370_p9, %p9364_p2 }
 0x224   : > { %9374 = shalt.err (!%p9371_p10)
}
 0x225   : > { %s12091_s12 = sld [smem:[#allocation89_spill]]  ;;  %s9957_s18 = smov [#allocation31]  }
 0x226   : > { %8552 = dma.hbm_to_vmem [thread:$0]  (!%p12085_p12), %s12090_s17, 16, %s1014_s8, [#allocation27]  }
 0x227   : > { %s1037_s1 = sshll.u32 %s9957_s18, 4  ;;  %s9958_s27 = smov [#allocation34]   ;;  %s1038_s1 = int_to_ptr.vmem [resolvable:$true] %s1037_s1 }
 0x228   : > { %s1061_s6 = sshll.u32 %s9958_s27, 4  ;;  %s1062_s6 = int_to_ptr.vmem [resolvable:$true] %s1061_s6 }
 0x22b   : > { %s9375_s22 = scalar_lea.hbm %s12091_s12, 16 }
 0x22c   : > { %p9376_p0 = scmp.ne.s32.totalorder %s12091_s12, %s9375_s22  ;;  %p9382_p11 = scmp.lt.u32.totalorder %s9375_s22, %s12091_s12 }
 0x22e   : > { %p9378_p5 = pnand %p9376_p0, %p12084_p1 }
 0x230   : > { %p9379_p7 = pneg %p9378_p5 }
 0x232   : > { %p9384_p13 = pnand %p9382_p11, %p9379_p7 }
 0x234   : > { %9387 = shalt.err (!%p9384_p13)
}
 0x235   : > { %s9388_s29 = scalar_lea.vmem %s1038_s1, 16  ;;  %s9395_s8 = scalar_lea.vmem %s1038_s1, 32 }
 0x236   : > { %p9389_p3 = scmp.ne.s32.totalorder %s1038_s1, %s9388_s29  ;;  %p9396_p6 = scmp.lt.s32.totalorder %s1038_s1, %s1038_s1 }
 0x237   : > { %p9397_p8 = scmp.lt.s32.totalorder %s9395_s8, %s9388_s29 }
 0x238   : > { %p9391_p4 = pnand %p9389_p3, %p12084_p1 }
 0x239   : > { %p9398_p9 = por %p9397_p8, %p9396_p6 }
 0x23a   : > { %p9392_p2 = pneg %p9391_p4 }
 0x23c   : > { %p9399_p10 = pnand %p9398_p9, %p9392_p2 }
 0x23e   : > { %9402 = shalt.err (!%p9399_p10)
}
 0x23f   : > { %s12092_s24 = sld [smem:[#allocation91_spill]] }
 0x240   : > { %8558 = dma.hbm_to_vmem [thread:$0]  (!%p12085_p12), %s12091_s12, 16, %s1038_s1, [#allocation30]  }
 0x245   : > { %s9403_s22 = scalar_lea.hbm %s12092_s24, 16 }
 0x246   : > { %p9404_p0 = scmp.ne.s32.totalorder %s12092_s24, %s9403_s22  ;;  %p9410_p11 = scmp.lt.u32.totalorder %s9403_s22, %s12092_s24 }
 0x248   : > { %p9406_p5 = pnand %p9404_p0, %p12084_p1 }
 0x24a   : > { %p9407_p7 = pneg %p9406_p5 }
 0x24c   : > { %p9412_p13 = pnand %p9410_p11, %p9407_p7 }
 0x24e   : > { %9415 = shalt.err (!%p9412_p13)
}
 0x24f   : > { %s9416_s18 = scalar_lea.vmem %s1062_s6, 16  ;;  %s9423_s27 = scalar_lea.vmem %s1062_s6, 32 }
 0x250   : > { %p9417_p3 = scmp.ne.s32.totalorder %s1062_s6, %s9416_s18  ;;  %p9424_p6 = scmp.lt.s32.totalorder %s1062_s6, %s1062_s6 }
 0x251   : > { %p9425_p8 = scmp.lt.s32.totalorder %s9423_s27, %s9416_s18 }
 0x252   : > { %p9419_p4 = pnand %p9417_p3, %p12084_p1 }
 0x253   : > { %p9426_p9 = por %p9425_p8, %p9424_p6 }
 0x254   : > { %p9420_p2 = pneg %p9419_p4 }
 0x256   : > { %p9427_p10 = pnand %p9426_p9, %p9420_p2 }
 0x258   : > { %9430 = shalt.err (!%p9427_p10)
}
 0x259   : > { %s12093_s1 = sld [smem:[#allocation93_spill]]  ;;  %s9959_s8 = smov [#allocation37]  }
 0x25a   : > { %8564 = dma.hbm_to_vmem [thread:$0]  (!%p12085_p12), %s12092_s24, 16, %s1062_s6, [#allocation33]  }
 0x25b   : > { %s1085_s22 = sshll.u32 %s9959_s8, 4  ;;  %s9960_s12 = smov [#allocation40]   ;;  %s1086_s22 = int_to_ptr.vmem [resolvable:$true] %s1085_s22 }
 0x25c   : > { %s1109_s17 = sshll.u32 %s9960_s12, 4  ;;  %s1110_s17 = int_to_ptr.vmem [resolvable:$true] %s1109_s17 }
 0x25f   : > { %s12094_s29 = smov %s12093_s1  ;;  %s9431_s14 = scalar_lea.hbm %s12093_s1, 16 }
 0x260   : > { %p9432_p0 = scmp.ne.s32.totalorder %s12094_s29, %s9431_s14  ;;  %p9438_p11 = scmp.lt.u32.totalorder %s9431_s14, %s12094_s29 }
 0x262   : > { %p9434_p5 = pnand %p9432_p0, %p12084_p1 }
 0x264   : > { %p9435_p7 = pneg %p9434_p5 }
 0x266   : > { %p9440_p13 = pnand %p9438_p11, %p9435_p7 }
 0x268   : > { %9443 = shalt.err (!%p9440_p13)
}
 0x269   : > { %s9444_s18 = scalar_lea.vmem %s1086_s22, 16  ;;  %s9451_s6 = scalar_lea.vmem %s1086_s22, 32 }
 0x26a   : > { %p9445_p3 = scmp.ne.s32.totalorder %s1086_s22, %s9444_s18  ;;  %p9452_p6 = scmp.lt.s32.totalorder %s1086_s22, %s1086_s22 }
 0x26b   : > { %p9453_p8 = scmp.lt.s32.totalorder %s9451_s6, %s9444_s18 }
 0x26c   : > { %p9447_p4 = pnand %p9445_p3, %p12084_p1 }
 0x26d   : > { %p9454_p9 = por %p9453_p8, %p9452_p6 }
 0x26e   : > { %p9448_p2 = pneg %p9447_p4 }
 0x270   : > { %p9455_p10 = pnand %p9454_p9, %p9448_p2 }
 0x272   : > { %9458 = shalt.err (!%p9455_p10)
}
 0x273   : > { %s12095_s12 = sld [smem:[#allocation95_spill]] }
 0x274   : > { %8570 = dma.hbm_to_vmem [thread:$0]  (!%p12085_p12), %s12094_s29, 16, %s1086_s22, [#allocation36]  }
 0x279   : > { %s9459_s14 = scalar_lea.hbm %s12095_s12, 16 }
 0x27a   : > { %p9460_p0 = scmp.ne.s32.totalorder %s12095_s12, %s9459_s14  ;;  %p9466_p11 = scmp.lt.u32.totalorder %s9459_s14, %s12095_s12 }
 0x27c   : > { %p9462_p5 = pnand %p9460_p0, %p12084_p1 }
 0x27e   : > { %p9463_p7 = pneg %p9462_p5 }
 0x280   : > { %p9468_p13 = pnand %p9466_p11, %p9463_p7 }
 0x282   : > { %9471 = shalt.err (!%p9468_p13)
}
 0x283   : > { %s9472_s27 = scalar_lea.vmem %s1110_s17, 16  ;;  %s9479_s1 = scalar_lea.vmem %s1110_s17, 32 }
 0x284   : > { %p9473_p3 = scmp.ne.s32.totalorder %s1110_s17, %s9472_s27  ;;  %p9480_p6 = scmp.lt.s32.totalorder %s1110_s17, %s1110_s17 }
 0x285   : > { %p9481_p8 = scmp.lt.s32.totalorder %s9479_s1, %s9472_s27 }
 0x286   : > { %p9475_p4 = pnand %p9473_p3, %p12084_p1 }
 0x287   : > { %p9482_p9 = por %p9481_p8, %p9480_p6 }
 0x288   : > { %p9476_p2 = pneg %p9475_p4 }
 0x28a   : > { %p9483_p10 = pnand %p9482_p9, %p9476_p2 }
 0x28c   : > { %9486 = shalt.err (!%p9483_p10)
}
 0x28d   : > { %s12096_s8 = sld [smem:[#allocation71_spill]]  ;;  %s12097_s22 = sld [smem:[#allocation73_spill]] }
 0x28e   : > { %8576 = dma.hbm_to_vmem [thread:$0]  (!%p12085_p12), %s12095_s12, 16, %s1110_s17, [#allocation39]  }
 0x28f   : > { %s12098_s16 = sshll.u32 %s9903_s2, 8  ;;  %s12099_s6 = sshll.u32 %s10393_s19, 4 }
 0x290   : > { %s1124_s26 = scalar_lea.vmem [#allocation2], %s12099_s6  ;;  %p12100_p0 = scmp.ne.s32.totalorder %s12080_s25, 0 }
 0x291   : > { %s1131_s14 = sshll.u32 %s1124_s26, 4  ;;  %s10592_s14 = int_to_ptr.vmem [resolvable:$true] %s1131_s14 }
 0x293   : > { %s10588_s18 = scalar_lea.hbm %s12096_s8, %s12098_s16  ;;  %s10596_s27 = scalar_lea.hbm %s12097_s22, %s10412_s4 }
 0x294   : > { %s9487_s24 = scalar_lea.hbm %s10588_s18, 256  ;;  %s9492_s17 = scalar_lea.hbm %s12096_s8, 512 }
 0x295   : > { %p9488_p1 = scmp.ne.s32.totalorder %s10588_s18, %s9487_s24  ;;  %p9493_p7 = scmp.lt.u32.totalorder %s10588_s18, %s12096_s8 }
 0x296   : > { %p9494_p11 = scmp.lt.u32.totalorder %s9492_s17, %s9487_s24  ;;  %p9496_p3 = scmp.lt.u32.totalorder %s9487_s24, %s10588_s18 }
 0x297   : > { %p9490_p5 = pnand %p9488_p1, %p12100_p0 }
 0x298   : > { %p9495_p13 = por %p9494_p11, %p9493_p7 }
 0x299   : > { %p9491_p12 = pneg %p9490_p5 }
 0x29a   : > { %p9497_p4 = por %p9496_p3, %p9495_p13 }
 0x29c   : > { %p9498_p2 = pnand %p9497_p4, %p9491_p12 }
 0x29e   : > { %9501 = shalt.err (!%p9498_p2)
}
 0x29f   : > { %s9502_s16 = scalar_lea.vmem %s10592_s14, 256  ;;  %s9961_s6 = smov [#allocation2]  }
 0x2a0   : > { %p9503_p6 = scmp.ne.s32.totalorder %s10592_s14, %s9502_s16  ;;  %s9507_s26 = sshll.u32 %s9961_s6, 4  ;;  %s9508_s26 = int_to_ptr.vmem [resolvable:$false] %s9507_s26 }
 0x2a1   : > { %s9509_s1 = scalar_lea.vmem %s9508_s26, 512  ;;  %p9510_p10 = scmp.lt.s32.totalorder %s10592_s14, %s9508_s26 }
 0x2a2   : > { %p9505_p8 = pnand %p9503_p6, %p12100_p0  ;;  %p9511_p1 = scmp.lt.s32.totalorder %s9509_s1, %s9502_s16 }
 0x2a4   : > { %p9506_p9 = pneg %p9505_p8  ;;  %p9512_p5 = por %p9511_p1, %p9510_p10 }
 0x2a6   : > { %p9513_p7 = pnand %p9512_p5, %p9506_p9 }
 0x2a8   : > { %9516 = shalt.err (!%p9513_p7)
}
 0x2a9   : > { %p12101_p12 = scmp.ne.s32.totalorder %s12079_s23, 0  ;;  %s12102_s24 = scalar_lea.sflag [#allocation3], %s10393_s19 }
 0x2aa   : > { %s12103_s17 = sld [smem:[#allocation75_spill]]  ;;  %s1163_s1 = scalar_lea.vmem [#allocation7], %s10409_s10 }
 0x2ab   : > { %8580 = dma.hbm_to_vmem [thread:$0]  (!%p12101_p12), %s10588_s18, 256, %s10592_s14, %s12102_s24, %s12083_s13, %s12083_s13, %s12082_s5  }
 0x2ac   : > { %s1170_s16 = sshll.u32 %s1163_s1, 4  ;;  %s9517_s26 = scalar_lea.hbm %s10596_s27, 128  ;;  %s1171_s16 = int_to_ptr.vmem [resolvable:$true] %s1170_s16 }
 0x2ad   : > { %p9518_p11 = scmp.ne.s32.totalorder %s10596_s27, %s9517_s26  ;;  %s9522_s19 = scalar_lea.hbm %s12097_s22, 256 }
 0x2ae   : > { %p9523_p4 = scmp.lt.u32.totalorder %s10596_s27, %s12097_s22  ;;  %p9524_p2 = scmp.lt.u32.totalorder %s9522_s19, %s9517_s26 }
 0x2af   : > { %p9520_p13 = pnand %p9518_p11, %p12100_p0  ;;  %p9526_p8 = scmp.lt.u32.totalorder %s9517_s26, %s10596_s27 }
 0x2b0   : > { %s10624_s6 = scalar_lea.hbm %s12103_s17, %s10412_s4  ;;  %p9525_p6 = por %p9524_p2, %p9523_p4 }
 0x2b1   : > { %p9521_p3 = pneg %p9520_p13 }
 0x2b2   : > { %p9527_p9 = por %p9526_p8, %p9525_p6 }
 0x2b4   : > { %p9528_p10 = pnand %p9527_p9, %p9521_p3 }
 0x2b6   : > { %9531 = shalt.err (!%p9528_p10)
}
 0x2b7   : > { %s9532_s8 = scalar_lea.vmem %s1171_s16, 128  ;;  %s9962_s4 = smov [#allocation7]  }
 0x2b8   : > { %p9533_p1 = scmp.ne.s32.totalorder %s1171_s16, %s9532_s8  ;;  %s9537_s5 = sshll.u32 %s9962_s4, 4  ;;  %s9538_s5 = int_to_ptr.vmem [resolvable:$false] %s9537_s5 }
 0x2b9   : > { %s9539_s13 = scalar_lea.vmem %s9538_s5, 256  ;;  %p9540_p11 = scmp.lt.s32.totalorder %s1171_s16, %s9538_s5 }
 0x2ba   : > { %p9535_p5 = pnand %p9533_p1, %p12100_p0  ;;  %p9541_p13 = scmp.lt.s32.totalorder %s9539_s13, %s9532_s8 }
 0x2bc   : > { %p9536_p7 = pneg %p9535_p5  ;;  %p9542_p12 = por %p9541_p13, %p9540_p11 }
 0x2be   : > { %p9543_p2 = pnand %p9542_p12, %p9536_p7 }
 0x2c0   : > { %9546 = shalt.err (!%p9543_p2)
}
 0x2c1   : > { %p12104_p4 = scmp.ne.s32.totalorder %s12079_s23, 0  ;;  %s1202_s18 = scalar_lea.vmem [#allocation10], %s10409_s10 }
 0x2c2   : > { %s1209_s14 = sshll.u32 %s1202_s18, 4  ;;  %s9547_s8 = scalar_lea.hbm %s10624_s6, 128  ;;  %s1210_s14 = int_to_ptr.vmem [resolvable:$true] %s1209_s14 }
 0x2c3   : > { %8586 = dma.hbm_to_vmem [thread:$0]  (!%p12104_p4), %s10596_s27, 128, %s1171_s16, %s10423_s20  }
 0x2c4   : > { %p9548_p3 = scmp.ne.s32.totalorder %s10624_s6, %s9547_s8  ;;  %s9552_s24 = scalar_lea.hbm %s12103_s17, 256 }
 0x2c5   : > { %p9553_p8 = scmp.lt.u32.totalorder %s10624_s6, %s12103_s17  ;;  %p9554_p9 = scmp.lt.u32.totalorder %s9552_s24, %s9547_s8 }
 0x2c6   : > { %p9550_p12 = pnand %p9548_p3, %p12100_p0  ;;  %p9556_p1 = scmp.lt.u32.totalorder %s9547_s8, %s10624_s6 }
 0x2c7   : > { %p9555_p10 = por %p9554_p9, %p9553_p8 }
 0x2c8   : > { %p9551_p6 = pneg %p9550_p12 }
 0x2c9   : > { %p9557_p5 = por %p9556_p1, %p9555_p10 }
 0x2cb   : > { %p9558_p7 = pnand %p9557_p5, %p9551_p6 }
 0x2cd   : > { %9561 = shalt.err (!%p9558_p7)
}
 0x2ce   : > { %s9562_s1 = scalar_lea.vmem %s1210_s14, 128  ;;  %s9963_s20 = smov [#allocation10]  }
 0x2cf   : > { %p9563_p11 = scmp.ne.s32.totalorder %s1210_s14, %s9562_s1  ;;  %s9567_s10 = sshll.u32 %s9963_s20, 4  ;;  %s9568_s10 = int_to_ptr.vmem [resolvable:$false] %s9567_s10 }
 0x2d0   : > { %s9569_s27 = scalar_lea.vmem %s9568_s10, 256  ;;  %p9570_p3 = scmp.lt.s32.totalorder %s1210_s14, %s9568_s10 }
 0x2d1   : > { %p9565_p13 = pnand %p9563_p11, %p12100_p0  ;;  %p9571_p12 = scmp.lt.s32.totalorder %s9569_s27, %s9562_s1 }
 0x2d3   : > { %p9566_p2 = pneg %p9565_p13  ;;  %p9572_p4 = por %p9571_p12, %p9570_p3 }
 0x2d5   : > { %p9573_p8 = pnand %p9572_p4, %p9566_p2 }
 0x2d7   : > { %9576 = shalt.err (!%p9573_p8)
}
 0x2d8   : > { %p12105_p9 = scmp.ne.s32.totalorder %s12079_s23, 0  ;;  %p12106_p6 = scmp.ne.s32.totalorder %s12069_s15, 0 }
 0x2d9   : > { %s10658_s25 = sand.u32 (!%p12106_p6), 1, %s9895_s28   ;;  %p12107_p0 = scmp.ne.s32.totalorder (!%p12106_p6), %s12075_s3, 0 }
 0x2da   : > { %8592 = dma.hbm_to_vmem [thread:$0]  (!%p12105_p9), %s10624_s6, 128, %s1210_s14, %s10462_s9  }
 0x2db   : > { %1218 = sbr.rel (%p12106_p6) target bundleno = 5381 (0x1505), region = 120  ;;  %s7763_s16 = sshll.u32 (!%p12106_p6), %s10658_s25, 4 }
 0x2dc   : > { %s1221_s26 = scalar_lea.sflag (!%p12106_p6), [#allocation3], %s10658_s25  ;;  %s10662_s19 = scalar_lea.vmem (!%p12106_p6), [#allocation2], %s7763_s16 }
 0x2e2   : > { %9818 = dma.done.wait (%p12107_p0), %s1221_s26, 256  }
 0x2e3   : > { %9820 = vsyncadd (%p12107_p0), %s1221_s26, 4294967040  ;;  %s10669_s9 = sand.u32 1, %s10174_s11   ;;  %s10672_s15 = sshll.u32 %s10658_s25, 3 }
 0x2e4   : > { %s1230_s23 = scalar_lea.sflag [#allocation6], %s10669_s9  ;;  %s1233_s6 = scalar_lea.vmem [#allocation5], %s10672_s15 }
 0x2e5   : > { %9822 = dma.done.wait (%p12107_p0), %s1230_s23, 256  }
 0x2e6   : > { %9824 = vsyncadd (%p12107_p0), %s1230_s23, 4294967040  ;;  %s1242_s4 = scalar_lea.vmem [#allocation7], %s10672_s15  ;;  %s1248_s5 = scalar_lea.sflag [#allocation9], %s10669_s9 }
 0x2e7   : > { %s10682_s13 = scalar_lea.vmem [#allocation8], %s7763_s16 }
 0x2e8   : > { %9826 = dma.done.wait (%p12107_p0), %s1248_s5, 384  }
 0x2e9   : > { %9828 = vsyncadd (%p12107_p0), %s1248_s5, 4294966912  ;;  %s1260_s18 = scalar_lea.vmem [#allocation10], %s10672_s15  ;;  %p12108_p4 = scmp.eq.s32.totalorder %s10174_s11, 0 }
 0x2eb   : > { %9830 = dma.done.wait (%p12108_p4), [#allocation12], 32   ;;  %p12109_p10 = pmov %p12108_p4 }
 0x2ec   : > { %p12110_p1 = pmov %p12108_p4 }
 0x2ed   : > { %9832 = vsyncadd (%p12109_p10), [#allocation12], 4294967264 }
 0x2ee   : > { %9834 = dma.done.wait (%p12110_p1), [#allocation15], 32   ;;  %p12111_p5 = pmov %p12110_p1 }
 0x2ef   : > { %p12112_p7 = pmov %p12110_p1 }
 0x2f0   : > { %9836 = vsyncadd (%p12111_p5), [#allocation15], 4294967264 }
 0x2f1   : > { %9838 = dma.done.wait (%p12112_p7), [#allocation18], 32   ;;  %p12113_p11 = pmov %p12110_p1 }
 0x2f2   : > { %p12114_p13 = pmov %p12110_p1 }
 0x2f3   : > { %9840 = vsyncadd (%p12113_p11), [#allocation18], 4294967264 }
 0x2f4   : > { %9842 = dma.done.wait (%p12114_p13), [#allocation21], 528   ;;  %p12115_p2 = pmov %p12110_p1 }
 0x2f5   : > { %p12116_p3 = pmov %p12110_p1 }
 0x2f6   : > { %9844 = vsyncadd (%p12115_p2), [#allocation21], 4294966768 }
 0x2f7   : > { %9846 = dma.done.wait (%p12116_p3), [#allocation24], 528   ;;  %p12117_p12 = pmov %p12110_p1 }
 0x2f8   : > { %p12118_p8 = pmov %p12110_p1 }
 0x2f9   : > { %9848 = vsyncadd (%p12117_p12), [#allocation24], 4294966768 }
 0x2fa   : > { %9850 = dma.done.wait (%p12118_p8), [#allocation27], 528   ;;  %p12119_p9 = pmov %p12110_p1 }
 0x2fb   : > { %p12120_p6 = pmov %p12110_p1 }
 0x2fc   : > { %9852 = vsyncadd (%p12119_p9), [#allocation27], 4294966768 }
 0x2fd   : > { %9854 = dma.done.wait (%p12120_p6), [#allocation30], 528   ;;  %p12121_p0 = pmov %p12110_p1 }
 0x2ff   : > { %9856 = vsyncadd (%p12121_p0), [#allocation30], 4294966768  ;;  %p12122_p4 = pmov %p12121_p0 }
 0x300   : > { %p12123_p10 = pmov %p12121_p0 }
 0x301   : > { %9858 = dma.done.wait (%p12122_p4), [#allocation33], 528  }
 0x302   : > { %9860 = vsyncadd (%p12123_p10), [#allocation33], 4294966768  ;;  %p12124_p1 = pmov %p12121_p0 }
 0x303   : > { %p12125_p5 = pmov %p12121_p0 }
 0x304   : > { %9862 = dma.done.wait (%p12124_p1), [#allocation36], 528  }
 0x305   : > { %9864 = vsyncadd (%p12125_p5), [#allocation36], 4294966768  ;;  %p12126_p7 = pmov %p12121_p0 }
 0x306   : > { %p12127_p11 = pmov %p12121_p0 }
 0x307   : > { %9866 = dma.done.wait (%p12126_p7), [#allocation39], 1040  }
 0x308   : > { %9868 = vsyncadd (%p12127_p11), [#allocation39], 4294966256  ;;  %vm1488_vm0 = vcmask 261120   ;;  %v1476_v0 = vld [vmem:[%s10662_s19] sm:$0xff]  ;;  %v1477_v1 = vld [vmem:[%s10662_s19 + $0x8] sm:$0xff]  ;;  %s9964_s3 = smov 120   ;;  %v1649_v43 = vlaneseq }
 0x309   : > { %v1489_v2 = vsel %vm1488_vm0, %v1476_v0, 0.0  ;;  %v1492_v3 = vsel %vm1488_vm0, %v1477_v1, 0.0  ;;  %v1532_v14 = vld [vmem:[#allocation20] sm:$0xff]  ;;  %v1533_v15 = vld [vmem:[#allocation20 + $0x8] sm:$0xff]  ;;  %v1534_v16 = vld [vmem:[#allocation20 + $0x10] sm:$0xff]  ;;  %s9965_s14 = smov 112  }
 0x30a   : > { %1490 = vadd.xlane.f32.xlu0 %v1489_v2  ;;  %v8298_v17 = vpack.c.bf16 %v1533_v15, %v1532_v14  ;;  %v1535_v18 = vld [vmem:[#allocation20 + $0x18] sm:$0xff]  ;;  %v7796_v27 = vld [vmem:[#allocation11] ss:$0 sm:$0xff]  ;;  %v7797_v29 = vld [vmem:[#allocation13] ss:$0 sm:$0xff]  ;;  %s9966_s8 = smov 104  }
 0x30b   : > { %v8302_v19 = vpack.c.bf16 %v1535_v18, %v1534_v16  ;;  %v7798_v36 = vld [vmem:[#allocation22] ss:$0 sm:$0xff]  ;;  %s9967_s24 = smov 64   ;;  %v9968_v41 = vmov 1983009808   ;;  %v1650_v49 = vshrl.u32 %v1649_v43, 7 }
 0x30c   : > { %8299 = vmatprep.subr.bf16.mxu1 %v8298_v17  ;;  %v1647_v42 = vunpack.c.l.s4 %v9968_v41  ;;  %v9969_v46 = vmov 1934713408   ;;  %vm2516_vm1 = vcmask 64512   ;;  %s9970_s1 = smov 96   ;;  %s11130_s20 = sshll.u32 %s10658_s25, 5  ;;  %vm4339_vm4 = vcmask 130048  }
 0x30d   : > { %8301 = vmatpush3.bf16.msra.mxu1 %v8298_v17  ;;  %v1679_v47 = vunpack.c.l.s4 %v9969_v46  ;;  %s11136_s10 = scalar_lea.vmem [#allocation48], %s11130_s20  ;;  %s11152_s27 = scalar_lea.vmem [#allocation44], %s11130_s20  ;;  %vm4342_vm5 = vcmask 195584   ;;  %vm11398_vm6 = vmpackc.low %vm2516_vm1, %vm2516_vm1  ;;  %vm6890_vm8 = vcmask 523264  }
 0x30e   : > { %1493 = vadd.xlane.f32.xlu0 %v1492_v3  ;;  %8303 = vmatprep.subr.bf16.mxu1 %v8302_v19  ;;  %v1648_v48 = vunpack.c.0.s8 %v1647_v42  ;;  %s11173_s16 = scalar_lea.vmem [#allocation47], %s11130_s20  ;;  %s11185_s26 = scalar_lea.vmem [#allocation45], %s11130_s20 }
 0x30f   : > { %v1680_v51 = vunpack.c.0.s8 %v1679_v47  ;;  %s12022_s23 = smov 8   ;;  %s11579_s5 = scalar_lea.vmem [#allocation50], %s11130_s20 }
 0x310   : > { %v10769_v52 = vsub.s32 %v1648_v48, %v1650_v49  ;;  %p12131_p2 = scmp.ne.s32.totalorder %s12076_s7, 0 }
 0x311   : > { %8305 = vmatpush3.bf16.msra.mxu1 %v8302_v19  ;;  %v10787_v59 = vsub.s32 %v1680_v51, %v1650_v49 }
 0x397   : > { %v1491_v4 = vpop.xlane.xlu0 %1490 }
 0x398   : > { %v1496_v5 = vmul.f32 0.03125, %v1491_v4 }
 0x39a   : > { %v1498_v6 = vsub.f32 %v1476_v0, %v1496_v5 }
 0x39b   : > { %v1494_v7 = vpop.xlane.xlu0 %1493 }
 0x39c   : > { %v1497_v8 = vmul.f32 0.03125, %v1494_v7  ;;  %v1500_v9 = vmul.f32 %v1498_v6, %v1498_v6 }
 0x39e   : > { %v1499_v10 = vsub.f32 %v1477_v1, %v1497_v8  ;;  %v1502_v11 = vsel %vm1488_vm0, %v1500_v9, 0.0 }
 0x39f   : > { %1503 = vadd.xlane.f32.xlu1 %v1502_v11 }
 0x3a0   : > { %v1501_v12 = vmul.f32 %v1499_v10, %v1499_v10 }
 0x3a2   : > { %v1505_v13 = vsel %vm1488_vm0, %v1501_v12, 0.0 }
 0x3a3   : > { %1506 = vadd.xlane.f32.xlu1 %v1505_v13 }
 0x42c   : > { %v1504_v20 = vpop.xlane.xlu1 %1503 }
 0x42d   : > { %v1508_v21 = vmul.f32 0.03125, %v1504_v20 }
 0x42f   : > { %v1510_v22 = vadd.f32 1e-12, %v1508_v21 }
 0x430   : > { %v1507_v23 = vpop.xlane.xlu1 %1506 }
 0x431   : > { %8757 = vrsqrt.f32 %v1510_v22  ;;  %v1509_v24 = vmul.f32 0.03125, %v1507_v23 }
 0x433   : > { %v1511_v25 = vadd.f32 1e-12, %v1509_v24 }
 0x435   : > { %8759 = vrsqrt.f32 %v1511_v25 }
 0x43b   : > { %v8758_v26 = vpop.eup %8757 }
 0x43c   : > { %v1514_v28 = vmul.f32 %v8758_v26, %v1498_v6 }
 0x43e   : > { %v1522_v30 = vmul.f32 %v7796_v27, %v1514_v28 }
 0x43f   : > { %v8760_v31 = vpop.eup %8759 }
 0x440   : > { %v1515_v32 = vmul.f32 %v8760_v31, %v1499_v10  ;;  %v1530_v33 = vadd.f32 %v7797_v29, %v1522_v30 }
 0x442   : > { %v1523_v34 = vmul.f32 %v7796_v27, %v1515_v32  ;;  %8085 = vmatprep.mubr.msk.f32.mxu1 %vm1488_vm0, %v1530_v33 }
 0x444   : > { %v1531_v35 = vadd.f32 %v7797_v29, %v1523_v34 }
 0x446   : > { %8086 = vmatmul.mubr.msk.f32.vlgmr.msra.gmra.mrb[0].mxu1 %vm1488_vm0, %v1531_v35 }
 0x519   : > { %v8087_v37 = vpop.f32.mrb[0].mxu1 }
 0x51a   : > { %v10737_v38 = vadd.f32 %v8087_v37, %v7798_v36  ;;  %v1615_v39 = vpop.f32.mrb[1].mxu1 }
 0x51b   : > { %v10739_v40 = vadd.f32 %v7798_v36, %v1615_v39 }
 0x51c   : > { %1628 = vrot.lane.b32.xlu1 %v10737_v38, %s9964_s3 }
 0x51d   : > { %1626 = vrot.lane.b32.xlu0 %v10739_v40, %s9964_s3 }
 0x520   : > { %1632 = vrot.lane.b32.xlu1 %v10739_v40, %s9965_s14 }
 0x521   : > { %1634 = vrot.lane.b32.xlu0 %v10737_v38, %s9965_s14 }
 0x524   : > { %1638 = vrot.lane.b32.xlu1 %v10739_v40, %s9966_s8 }
 0x525   : > { %2214 = vrot.lane.b32.xlu0 %v10737_v38, %s9967_s24 }
 0x528   : > { %1640 = vrot.lane.b32.xlu1 %v10737_v38, %s9966_s8 }
 0x529   : > { %2212 = vrot.lane.b32.xlu0 %v10739_v40, %s9967_s24 }
 0x58e   : > { %v10757_v44 = vpop.permute.xlu1 %1628 }
 0x58f   : > { %2218 = vrot.lane.b32.xlu1 %v10757_v44, %s9967_s24  ;;  %v10761_v45 = vpop.permute.xlu0 %1626 }
 0x592   : > { %v10763_v50 = vpop.permute.xlu1 %1632 }
 0x593   : > { %2220 = vrot.lane.b32.xlu0 %v10763_v50, %s9967_s24  ;;  %2216 = vrot.lane.b32.xlu1 %v10761_v45, %s9967_s24  ;;  %v1644_v53 = vcombine.low %v10739_v40, %v10763_v50  ;;  %v1645_v54 = vcombine.high %v10739_v40, %v10763_v50  ;;  %v10775_v55 = vpop.permute.xlu0 %1634 }
 0x594   : > { %v1712_v0 = vcombine.low %v10737_v38, %v10775_v55  ;;  %v1713_v1 = vcombine.high %v10737_v38, %v10775_v55 }
 0x595   : > { %v1652_v60 = vrot.slane %v1644_v53, %v10769_v52  ;;  %v1659_v61 = vrot.slane %v1645_v54, %v10769_v52 }
 0x596   : > { %v10777_v56 = vpop.permute.xlu1 %1638  ;;  %v1720_v13 = vrot.slane %v1712_v0, %v10769_v52  ;;  %v1727_v14 = vrot.slane %v1713_v1, %v10769_v52 }
 0x597   : > { %v1660_v57 = vcombine.low %v10761_v45, %v10777_v56  ;;  %v1661_v58 = vcombine.high %v10761_v45, %v10777_v56  ;;  %2224 = vrot.lane.b32.xlu1 %v10777_v56, %s9967_s24  ;;  %2222 = vrot.lane.b32.xlu0 %v10775_v55, %s9967_s24 }
 0x599   : > { %v1668_v62 = vrot.slane %v1660_v57, %v10769_v52  ;;  %v1675_v63 = vrot.slane %v1661_v58, %v10769_v52 }
 0x59a   : > { %v10797_v2 = vpop.permute.xlu1 %1640 }
 0x59b   : > { %v1676_v3 = vcombine.low %v1652_v60, %v1668_v62  ;;  %v1677_v4 = vcombine.high %v1652_v60, %v1668_v62  ;;  %v1692_v5 = vcombine.low %v1659_v61, %v1675_v63  ;;  %v1693_v6 = vcombine.high %v1659_v61, %v1675_v63  ;;  %2226 = vrot.lane.b32.xlu1 %v10797_v2, %s9967_s24 }
 0x59c   : > { %v1728_v7 = vcombine.low %v10757_v44, %v10797_v2  ;;  %v1729_v8 = vcombine.high %v10757_v44, %v10797_v2 }
 0x59d   : > { %v1684_v9 = vrot.slane %v1676_v3, %v10787_v59  ;;  %v1691_v10 = vrot.slane %v1677_v4, %v10787_v59  ;;  %v1700_v11 = vrot.slane %v1692_v5, %v10787_v59  ;;  %v1707_v12 = vrot.slane %v1693_v6, %v10787_v59 }
 0x59e   : > { %v1736_v15 = vrot.slane %v1728_v7, %v10769_v52  ;;  %v1743_v16 = vrot.slane %v1729_v8, %v10769_v52 }
 0x59f   : > { %v1780_v17 = vcombine.low %v1684_v9, %v1691_v10  ;;  %v7801_v18 = vcombine.high %v1684_v9, %v1691_v10  ;;  %v1796_v19 = vcombine.low %v1700_v11, %v1707_v12  ;;  %v7802_v20 = vcombine.high %v1700_v11, %v1707_v12  ;;  %v2215_v11 = vpop.permute.xlu0 %2214 }
 0x5a0   : > { %v1744_v21 = vcombine.low %v1720_v13, %v1736_v15  ;;  %v1745_v22 = vcombine.high %v1720_v13, %v1736_v15  ;;  %v1760_v23 = vcombine.low %v1727_v14, %v1743_v16  ;;  %v1761_v24 = vcombine.high %v1727_v14, %v1743_v16 }
 0x5a1   : > { %v1787_v25 = vrot.slane %v1780_v17, %v10769_v52  ;;  %v1795_v26 = vrot.slane %v7801_v18, %v10769_v52  ;;  %v1803_v27 = vrot.slane %v1796_v19, %v10769_v52  ;;  %v1811_v28 = vrot.slane %v7802_v20, %v10769_v52 }
 0x5a2   : > { %v1752_v29 = vrot.slane %v1744_v21, %v10787_v59  ;;  %v1759_v30 = vrot.slane %v1745_v22, %v10787_v59  ;;  %v1768_v31 = vrot.slane %v1760_v23, %v10787_v59  ;;  %v1775_v32 = vrot.slane %v1761_v24, %v10787_v59 }
 0x5a3   : > { %v1812_v33 = vcombine.low %v1787_v25, %v1795_v26  ;;  %v1828_v34 = vcombine.low %v1803_v27, %v1811_v28  ;;  %v1813_v35 = vcombine.high %v1787_v25, %v1795_v26  ;;  %v1829_v36 = vcombine.high %v1803_v27, %v1811_v28  ;;  %v2213_v12 = vpop.permute.xlu0 %2212 }
 0x5a4   : > { %v1848_v37 = vcombine.low %v1752_v29, %v1759_v30  ;;  %v7803_v39 = vcombine.high %v1752_v29, %v1759_v30  ;;  %v1864_v41 = vcombine.low %v1768_v31, %v1775_v32  ;;  %v7804_v42 = vcombine.high %v1768_v31, %v1775_v32 }
 0x5a5   : > { %v1820_v43 = vrot.slane %v1812_v33, %v10787_v59  ;;  %v1836_v46 = vrot.slane %v1828_v34, %v10787_v59  ;;  %v1827_v47 = vrot.slane %v1813_v35, %v10787_v59  ;;  %v1843_v48 = vrot.slane %v1829_v36, %v10787_v59 }
 0x5a6   : > { %v1855_v49 = vrot.slane %v1848_v37, %v10769_v52  ;;  %v1863_v51 = vrot.slane %v7803_v39, %v10769_v52  ;;  %v1871_v53 = vrot.slane %v1864_v41, %v10769_v52  ;;  %v1879_v54 = vrot.slane %v7804_v42, %v10769_v52 }
 0x5a7   : > { %v1844_v57 = vcombine.low %v1820_v43, %v1836_v46  ;;  %v1846_v58 = vcombine.low %v1827_v47, %v1843_v48  ;;  %v10829_v60 = vcombine.high %v1827_v47, %v1843_v48  ;;  %v10833_v1 = vcombine.high %v1820_v43, %v1836_v46 }
 0x5a8   : > { %v1880_v61 = vcombine.low %v1855_v49, %v1863_v51  ;;  %v1896_v62 = vcombine.low %v1871_v53, %v1879_v54  ;;  %v1881_v63 = vcombine.high %v1855_v49, %v1863_v51  ;;  %v1897_v0 = vcombine.high %v1871_v53, %v1879_v54 }
 0x5a9   : > { %8088 = vmatprep.subr.msk.mxu1 %vm2516_vm1, %v1844_v57  ;;  %8098 = vmatprep.subr.msk.mxu0 %vm2516_vm1, %v1846_v58 }
 0x5aa   : > { %8089 = vmatpush3.xpose.msk.msra.mxu1 %vm2516_vm1, %v1844_v57  ;;  %8099 = vmatpush3.xpose.msk.msra.mxu0 %vm2516_vm1, %v1846_v58  ;;  %v1888_v3 = vrot.slane %v1880_v61, %v10787_v59  ;;  %v1904_v4 = vrot.slane %v1896_v62, %v10787_v59  ;;  %v1895_v5 = vrot.slane %v1881_v63, %v10787_v59 }
 0x5ab   : > { %8093 = vmatprep.subr.msk.mxu1 %vm2516_vm1, %v10833_v1  ;;  %v1911_v6 = vrot.slane %v1897_v0, %v10787_v59 }
 0x5ac   : > { %v10843_v7 = vcombine.low %v1888_v3, %v1904_v4  ;;  %v10845_v8 = vcombine.high %v1888_v3, %v1904_v4 }
 0x5ad   : > { %v10847_v9 = vcombine.low %v1895_v5, %v1911_v6  ;;  %v10849_v10 = vcombine.high %v1895_v5, %v1911_v6 }
 0x5ae   : > { %8108 = vmatprep.subr.msk.mxu0 %vm2516_vm1, %v10843_v7 }
 0x601   : > { %v2219_v13 = vpop.permute.xlu1 %2218 }
 0x605   : > { %v2217_v14 = vpop.permute.xlu1 %2216  ;;  %v2221_v15 = vpop.permute.xlu0 %2220 }
 0x606   : > { %v2236_v16 = vcombine.low %v2213_v12, %v2221_v15  ;;  %v2237_v17 = vcombine.high %v2213_v12, %v2221_v15 }
 0x608   : > { %v2244_v22 = vrot.slane %v2236_v16, %v10769_v52  ;;  %v2251_v23 = vrot.slane %v2237_v17, %v10769_v52 }
 0x609   : > { %v2225_v18 = vpop.permute.xlu1 %2224  ;;  %v2223_v21 = vpop.permute.xlu0 %2222 }
 0x60a   : > { %v2252_v19 = vcombine.low %v2217_v14, %v2225_v18  ;;  %v2253_v20 = vcombine.high %v2217_v14, %v2225_v18  ;;  %v2304_v26 = vcombine.low %v2215_v11, %v2223_v21  ;;  %v2305_v27 = vcombine.high %v2215_v11, %v2223_v21 }
 0x60c   : > { %v2260_v24 = vrot.slane %v2252_v19, %v10769_v52  ;;  %v2267_v25 = vrot.slane %v2253_v20, %v10769_v52  ;;  %v2312_v41 = vrot.slane %v2304_v26, %v10769_v52  ;;  %v2319_v42 = vrot.slane %v2305_v27, %v10769_v52 }
 0x60d   : > { %v2227_v28 = vpop.permute.xlu1 %2226 }
 0x60e   : > { %v2268_v29 = vcombine.low %v2244_v22, %v2260_v24  ;;  %v2269_v30 = vcombine.high %v2244_v22, %v2260_v24  ;;  %v2284_v31 = vcombine.low %v2251_v23, %v2267_v25  ;;  %v2285_v32 = vcombine.high %v2251_v23, %v2267_v25 }
 0x60f   : > { %v2320_v33 = vcombine.low %v2219_v13, %v2227_v28  ;;  %v2321_v34 = vcombine.high %v2219_v13, %v2227_v28 }
 0x610   : > { %v2276_v35 = vrot.slane %v2268_v29, %v10787_v59  ;;  %v2283_v36 = vrot.slane %v2269_v30, %v10787_v59  ;;  %v2292_v37 = vrot.slane %v2284_v31, %v10787_v59  ;;  %v2299_v39 = vrot.slane %v2285_v32, %v10787_v59 }
 0x611   : > { %v2328_v43 = vrot.slane %v2320_v33, %v10769_v52  ;;  %v2335_v46 = vrot.slane %v2321_v34, %v10769_v52 }
 0x612   : > { %v2372_v47 = vcombine.low %v2276_v35, %v2283_v36  ;;  %v7809_v48 = vcombine.high %v2276_v35, %v2283_v36  ;;  %v2388_v49 = vcombine.low %v2292_v37, %v2299_v39  ;;  %v7810_v51 = vcombine.high %v2292_v37, %v2299_v39 }
 0x613   : > { %v2336_v53 = vcombine.low %v2312_v41, %v2328_v43  ;;  %v2337_v54 = vcombine.high %v2312_v41, %v2328_v43  ;;  %v2352_v57 = vcombine.low %v2319_v42, %v2335_v46  ;;  %v2353_v58 = vcombine.high %v2319_v42, %v2335_v46 }
 0x614   : > { %v2379_v61 = vrot.slane %v2372_v47, %v10769_v52  ;;  %v2387_v62 = vrot.slane %v7809_v48, %v10769_v52  ;;  %v2395_v63 = vrot.slane %v2388_v49, %v10769_v52  ;;  %v2403_v0 = vrot.slane %v7810_v51, %v10769_v52 }
 0x615   : > { %v2344_v3 = vrot.slane %v2336_v53, %v10787_v59  ;;  %v2351_v4 = vrot.slane %v2337_v54, %v10787_v59  ;;  %v2360_v5 = vrot.slane %v2352_v57, %v10787_v59  ;;  %v2367_v6 = vrot.slane %v2353_v58, %v10787_v59  ;;  %v1478_v58 = vld [vmem:[%s1233_s6] sm:$0xff]  ;;  %s9972_s6 = smov 16  }
 0x616   : > { %v2404_v11 = vcombine.low %v2379_v61, %v2387_v62  ;;  %v2420_v12 = vcombine.low %v2395_v63, %v2403_v0  ;;  %v2405_v13 = vcombine.high %v2379_v61, %v2387_v62  ;;  %v2421_v14 = vcombine.high %v2395_v63, %v2403_v0 }
 0x617   : > { %v2440_v15 = vcombine.low %v2344_v3, %v2351_v4  ;;  %v7811_v16 = vcombine.high %v2344_v3, %v2351_v4  ;;  %v2456_v17 = vcombine.low %v2360_v5, %v2367_v6  ;;  %v7812_v18 = vcombine.high %v2360_v5, %v2367_v6 }
 0x618   : > { %v2412_v19 = vrot.slane %v2404_v11, %v10787_v59  ;;  %v2428_v20 = vrot.slane %v2420_v12, %v10787_v59  ;;  %v2419_v21 = vrot.slane %v2405_v13, %v10787_v59  ;;  %v2435_v22 = vrot.slane %v2421_v14, %v10787_v59 }
 0x619   : > { %v2447_v23 = vrot.slane %v2440_v15, %v10769_v52  ;;  %v2455_v24 = vrot.slane %v7811_v16, %v10769_v52  ;;  %v2463_v25 = vrot.slane %v2456_v17, %v10769_v52  ;;  %v2471_v26 = vrot.slane %v7812_v18, %v10769_v52 }
 0x61a   : > { %v2436_v27 = vcombine.low %v2412_v19, %v2428_v20  ;;  %v2438_v28 = vcombine.low %v2419_v21, %v2435_v22  ;;  %v2437_v43 = vcombine.high %v2412_v19, %v2428_v20  ;;  %v2439_v49 = vcombine.high %v2419_v21, %v2435_v22 }
 0x61b   : > { %v2472_v29 = vcombine.low %v2447_v23, %v2455_v24  ;;  %v2488_v30 = vcombine.low %v2463_v25, %v2471_v26  ;;  %v2473_v31 = vcombine.high %v2447_v23, %v2455_v24  ;;  %v2489_v32 = vcombine.high %v2463_v25, %v2471_v26 }
 0x61c   : > { %v2508_v33 = vmul.f32 0.35355338, %v2436_v27  ;;  %v2512_v34 = vmul.f32 0.35355338, %v2438_v28  ;;  %v2510_v51 = vmul.f32 0.35355338, %v2437_v43 }
 0x61d   : > { %v2480_v35 = vrot.slane %v2472_v29, %v10787_v59  ;;  %v2496_v36 = vrot.slane %v2488_v30, %v10787_v59  ;;  %v2487_v37 = vrot.slane %v2473_v31, %v10787_v59  ;;  %v2503_v39 = vrot.slane %v2489_v32, %v10787_v59 }
 0x61e   : > { %8090 = vmatprep.mubr.msk.f32.mxu1 %vm2516_vm1, %v2508_v33  ;;  %8100 = vmatprep.mubr.msk.f32.mxu0 %vm2516_vm1, %v2512_v34  ;;  %v2514_v57 = vmul.f32 0.35355338, %v2439_v49  ;;  %vm1483_vm3 = vcmp.gt.f32.partialorder %v1478_v58, 0.0 }
 0x61f   : > { %v2504_v41 = vcombine.low %v2480_v35, %v2496_v36  ;;  %v2506_v42 = vcombine.low %v2487_v37, %v2503_v39  ;;  %v2505_v48 = vcombine.high %v2480_v35, %v2496_v36  ;;  %v2507_v53 = vcombine.high %v2487_v37, %v2503_v39 }
 0x621   : > { %v2509_v46 = vmul.f32 0.35355338, %v2504_v41  ;;  %v2513_v47 = vmul.f32 0.35355338, %v2506_v42  ;;  %v2511_v54 = vmul.f32 0.35355338, %v2505_v48 }
 0x623   : > { %8091 = vmatmul.mubr.msk.f32.vlgmr.msra.gmra.mrb[2].mxu1 %vm2516_vm1, %v2509_v46  ;;  %8101 = vmatmul.mubr.msk.f32.vlgmr.msra.gmra.mrb[0].mxu0 %vm2516_vm1, %v2513_v47 }
 0x624   : > { %8094 = vmatpush3.xpose.msk.msra.mxu1 %vm2516_vm1, %v10833_v1  ;;  %8109 = vmatpush3.xpose.msk.msra.mxu0 %vm2516_vm1, %v10843_v7  ;;  %v2515_v1 = vmul.f32 0.35355338, %v2507_v53 }
 0x625   : > { %8095 = vmatprep.mubr.msk.f32.mxu1 %vm2516_vm1, %v2510_v51  ;;  %8103 = vmatprep.subr.msk.mxu1 %vm2516_vm1, %v10829_v60 }
 0x626   : > { %8110 = vmatprep.mubr.msk.f32.mxu0 %vm2516_vm1, %v2508_v33  ;;  %8118 = vmatprep.subr.msk.mxu0 %vm2516_vm1, %v10847_v9 }
 0x627   : > { %8096 = vmatmul.mubr.msk.f32.vlgmr.msra.gmra.mrb[4].mxu1 %vm2516_vm1, %v2511_v54  ;;  %8111 = vmatmul.mubr.msk.f32.vlgmr.msra.gmra.mrb[2].mxu0 %vm2516_vm1, %v2509_v46 }
 0x628   : > { %8104 = vmatpush3.xpose.msk.msra.mxu1 %vm2516_vm1, %v10829_v60  ;;  %8119 = vmatpush3.xpose.msk.msra.mxu0 %vm2516_vm1, %v10847_v9  ;;  %v1479_v60 = vld [vmem:[%s1242_s4] sm:$0xff]  ;;  %s9973_s4 = smov 24  }
 0x629   : > { %8105 = vmatprep.mubr.msk.f32.mxu1 %vm2516_vm1, %v2514_v57  ;;  %8113 = vmatprep.subr.msk.mxu1 %vm2516_vm1, %v10845_v8  ;;  %vm1484_vm2 = vcmp.gt.f32.partialorder %v1479_v60, 0.0 }
 0x62a   : > { %8120 = vmatprep.mubr.msk.f32.mxu0 %vm2516_vm1, %v2512_v34 }
 0x62b   : > { %8106 = vmatmul.mubr.msk.f32.vlgmr.msra.gmra.mrb[6].mxu1 %vm2516_vm1, %v2515_v1  ;;  %8121 = vmatmul.mubr.msk.f32.vlgmr.msra.gmra.mrb[4].mxu0 %vm2516_vm1, %v2513_v47 }
 0x62c   : > { %8114 = vmatpush3.xpose.msk.msra.mxu1 %vm2516_vm1, %v10845_v8  ;;  %8115 = vmatprep.mubr.msk.f32.mxu1 %vm2516_vm1, %v2510_v51 }
 0x62d   : > { %8123 = vmatprep.subr.msk.mxu1 %vm2516_vm1, %v10849_v10 }
 0x62f   : > { %8116 = vmatmul.mubr.msk.f32.vlgmr.msra.gmra.mrb[8].mxu1 %vm2516_vm1, %v2511_v54 }
 0x630   : > { %8124 = vmatpush3.xpose.msk.msra.mxu1 %vm2516_vm1, %v10849_v10  ;;  %8125 = vmatprep.mubr.msk.f32.mxu1 %vm2516_vm1, %v2514_v57 }
 0x633   : > { %8126 = vmatmul.mubr.msk.f32.vlgmr.msra.gmra.mrb[10].mxu1 %vm2516_vm1, %v2515_v1 }
 0x6f6   : > { %v8092_v7 = vpop.f32.mrb[2].mxu1  ;;  %v8102_v9 = vpop.f32.mrb[0].mxu0 }
 0x6f7   : > { %v10924_v8 = vsel %vm1484_vm2, %v8092_v7, -3.4028235e+38  ;;  %v2592_v61 = vpop.f32.mrb[3].mxu1  ;;  %v2760_v62 = vpop.f32.mrb[1].mxu0  ;;  %v10931_v10 = vsel %vm1484_vm2, %v8102_v9, -3.4028235e+38 }
 0x6f8   : > { %v3180_v63 = vsel %vm2516_vm1, %v10924_v8, -inf  ;;  %v3192_v11 = vsel %vm2516_vm1, %v10931_v10, -inf  ;;  %v10941_v13 = vsel %vm1483_vm3, %v2592_v61, -3.4028235e+38  ;;  %v10951_v21 = vsel %vm1483_vm3, %v2760_v62, -3.4028235e+38 }
 0x6f9   : > { %3181 = vmax.xlane.f32.xlu0 %v3180_v63  ;;  %v3177_v19 = vsel %vm2516_vm1, %v10941_v13, -inf  ;;  %v3189_v26 = vsel %vm2516_vm1, %v10951_v21, -inf }
 0x6fa   : > { %v8097_v0 = vpop.f32.mrb[4].mxu1  ;;  %v8112_v3 = vpop.f32.mrb[2].mxu0 }
 0x6fb   : > { %v10934_v4 = vsel %vm1484_vm2, %v8097_v0, -3.4028235e+38  ;;  %v2676_v5 = vpop.f32.mrb[5].mxu1  ;;  %v2922_v6 = vpop.f32.mrb[3].mxu0  ;;  %v10964_v28 = vsel %vm1483_vm3, %v8112_v3, -3.4028235e+38 }
 0x6fc   : > { %v3186_v12 = vsel %vm2516_vm1, %v10934_v4, -inf  ;;  %v10944_v14 = vsel %vm1483_vm3, %v2676_v5, -3.4028235e+38  ;;  %v3284_v34 = vsel %vm2516_vm1, %v10964_v28, -inf  ;;  %v10980_v36 = vsel %vm1484_vm2, %v2922_v6, -3.4028235e+38 }
 0x6fd   : > { %3193 = vmax.xlane.f32.xlu0 %v3192_v11  ;;  %3187 = vmax.xlane.f32.xlu1 %v3186_v12  ;;  %v3183_v20 = vsel %vm2516_vm1, %v10944_v14, -inf  ;;  %v3281_v37 = vsel %vm2516_vm1, %v10980_v36, -inf }
 0x6fe   : > { %v8107_v15 = vpop.f32.mrb[6].mxu1  ;;  %v8122_v16 = vpop.f32.mrb[4].mxu0 }
 0x6ff   : > { %v2844_v17 = vpop.f32.mrb[7].mxu1  ;;  %v3078_v18 = vpop.f32.mrb[5].mxu0  ;;  %v10954_v22 = vsel %vm1484_vm2, %v8107_v15, -3.4028235e+38  ;;  %v10985_v39 = vsel %vm1483_vm3, %v8122_v16, -3.4028235e+38 }
 0x700   : > { %v3198_v27 = vsel %vm2516_vm1, %v10954_v22, -inf  ;;  %v10967_v29 = vsel %vm1483_vm3, %v2844_v17, -3.4028235e+38  ;;  %v3296_v41 = vsel %vm2516_vm1, %v10985_v39, -inf  ;;  %v10990_v42 = vsel %vm1484_vm2, %v3078_v18, -3.4028235e+38 }
 0x701   : > { %3178 = vmax.xlane.f32.xlu0 %v3177_v19  ;;  %3184 = vmax.xlane.f32.xlu1 %v3183_v20  ;;  %v3195_v35 = vsel %vm2516_vm1, %v10967_v29, -inf  ;;  %v3293_v43 = vsel %vm2516_vm1, %v10990_v42, -inf }
 0x702   : > { %v8117_v23 = vpop.f32.mrb[8].mxu1 }
 0x703   : > { %v3000_v24 = vpop.f32.mrb[9].mxu1  ;;  %v10995_v46 = vsel %vm1483_vm3, %v8117_v23, -3.4028235e+38 }
 0x704   : > { %v10957_v25 = vsel %vm1484_vm2, %v3000_v24, -3.4028235e+38  ;;  %v3290_v47 = vsel %vm2516_vm1, %v10995_v46, -inf }
 0x705   : > { %3190 = vmax.xlane.f32.xlu0 %v3189_v26  ;;  %3199 = vmax.xlane.f32.xlu1 %v3198_v27  ;;  %v3287_v48 = vsel %vm2516_vm1, %v10957_v25, -inf }
 0x706   : > { %v8127_v30 = vpop.f32.mrb[10].mxu1 }
 0x707   : > { %v10970_v31 = vsel %vm1483_vm3, %v8127_v30, -3.4028235e+38  ;;  %v3156_v32 = vpop.f32.mrb[11].mxu1 }
 0x708   : > { %v10973_v33 = vsel %vm1484_vm2, %v3156_v32, -3.4028235e+38  ;;  %v3302_v49 = vsel %vm2516_vm1, %v10970_v31, -inf }
 0x709   : > { %3285 = vmax.xlane.f32.xlu0 %v3284_v34  ;;  %3196 = vmax.xlane.f32.xlu1 %v3195_v35 }
 0x70d   : > { %3282 = vmax.xlane.f32.xlu0 %v3281_v37 }
 0x711   : > { %3297 = vmax.xlane.f32.xlu0 %v3296_v41 }
 0x715   : > { %3294 = vmax.xlane.f32.xlu0 %v3293_v43 }
 0x719   : > { %3291 = vmax.xlane.f32.xlu0 %v3290_v47 }
 0x71a   : > { %1922 = vrot.lane.b32.xlu1 %v10757_v44, %s9970_s1  ;;  %v3299_v44 = vsel %vm2516_vm1, %v10973_v33, -inf }
 0x71e   : > { %1926 = vrot.lane.b32.xlu1 %v10775_v55, %s9970_s1 }
 0x722   : > { %1930 = vrot.lane.b32.xlu1 %v10797_v2, %s9970_s1 }
 0x72f   : > { %1918 = vrot.lane.b32.xlu0 %v10737_v38, %s9970_s1 }
 0x746   : > { %3288 = vmax.xlane.f32.xlu1 %v3287_v48 }
 0x74a   : > { %3303 = vmax.xlane.f32.xlu1 %v3302_v49 }
 0x74e   : > { %3300 = vmax.xlane.f32.xlu1 %v3299_v44 }
 0x786   : > { %v3182_v51 = vpop.xlane.xlu0 %3181 }
 0x787   : > { %v3202_v55 = vsub.f32 %v10924_v8, %v3182_v51 }
 0x789   : > { %v3211_v53 = vmul.f32 1.442695, %v3202_v55 }
 0x78a   : > { %v3194_v2 = vpop.xlane.xlu0 %3193  ;;  %v3188_v54 = vpop.xlane.xlu1 %3187 }
 0x78b   : > { %8761 = vpow2.f32 %v3211_v53  ;;  %v3206_v38 = vsub.f32 %v10931_v10, %v3194_v2  ;;  %v3204_v10 = vsub.f32 %v10934_v4, %v3188_v54 }
 0x78d   : > { %v3219_v57 = vmul.f32 1.442695, %v3206_v38  ;;  %v3215_v16 = vmul.f32 1.442695, %v3204_v10 }
 0x78e   : > { %v3179_v1 = vpop.xlane.xlu0 %3178  ;;  %v3185_v60 = vpop.xlane.xlu1 %3184 }
 0x78f   : > { %8763 = vpow2.f32 %v3219_v57  ;;  %v3201_v7 = vsub.f32 %v10941_v13, %v3179_v1  ;;  %v3203_v9 = vsub.f32 %v10944_v14, %v3185_v60 }
 0x791   : > { %v3209_v58 = vmul.f32 1.442695, %v3201_v7  ;;  %v3213_v61 = vmul.f32 1.442695, %v3203_v9 }
 0x792   : > { %v3191_v62 = vpop.xlane.xlu0 %3190  ;;  %v3200_v63 = vpop.xlane.xlu1 %3199 }
 0x793   : > { %8765 = vpow2.f32 %v3209_v58  ;;  %v3205_v8 = vsub.f32 %v10951_v21, %v3191_v62  ;;  %v3208_v0 = vsub.f32 %v10954_v22, %v3200_v63 }
 0x794   : > { %8767 = vpow2.f32 %v3213_v61 }
 0x795   : > { %v11019_v3 = vpop.eup %8761  ;;  %v3217_v5 = vmul.f32 1.442695, %v3205_v8  ;;  %v3223_v6 = vmul.f32 1.442695, %v3208_v0 }
 0x796   : > { %v3286_v11 = vpop.xlane.xlu0 %3285  ;;  %v11022_v12 = vpop.xlane.xlu1 %3196  ;;  %v3228_v13 = vsel %vm2516_vm1, %v11019_v3, 0.0 }
 0x797   : > { %8769 = vpow2.f32 %v3217_v5  ;;  %v3306_v14 = vsub.f32 %v10964_v28, %v3286_v11  ;;  %3229 = vadd.xlane.f32.xlu0 %v3228_v13 }
 0x798   : > { %8771 = vpow2.f32 %v3223_v6 }
 0x799   : > { %v11027_v15 = vpop.eup %8763  ;;  %v3315_v17 = vmul.f32 1.442695, %v3306_v14 }
 0x79a   : > { %v3283_v18 = vpop.xlane.xlu0 %3282  ;;  %v1923_v19 = vpop.permute.xlu1 %1922  ;;  %v3240_v4 = vsel %vm2516_vm1, %v11027_v15, 0.0 }
 0x79b   : > { %8773 = vpow2.f32 %v3315_v17  ;;  %v3305_v20 = vsub.f32 %v10980_v36, %v3283_v18  ;;  %3241 = vadd.xlane.f32.xlu0 %v3240_v4 }
 0x79c   : > { %8775 = vpow2.f32 %v3215_v16 }
 0x79d   : > { %v11032_v21 = vpop.eup %8765  ;;  %v3313_v22 = vmul.f32 1.442695, %v3305_v20 }
 0x79e   : > { %v11034_v23 = vpop.eup %8767  ;;  %v3298_v24 = vpop.xlane.xlu0 %3297  ;;  %v3225_v26 = vsel %vm2516_vm1, %v11032_v21, 0.0 }
 0x79f   : > { %v3310_v27 = vsub.f32 %v10985_v39, %v3298_v24  ;;  %3226 = vadd.xlane.f32.xlu0 %v3225_v26  ;;  %v3231_v28 = vsel %vm2516_vm1, %v11034_v23, 0.0  ;;  %v1927_v30 = vpop.permute.xlu1 %1926  ;;  %8777 = vpow2.f32 %v3313_v22 }
 0x7a0   : > { %3232 = vadd.xlane.f32.xlu1 %v3231_v28 }
 0x7a1   : > { %v11041_v32 = vpop.eup %8769  ;;  %v3323_v34 = vmul.f32 1.442695, %v3310_v27 }
 0x7a2   : > { %v11043_v35 = vpop.eup %8771  ;;  %v3295_v36 = vpop.xlane.xlu0 %3294  ;;  %v3237_v37 = vsel %vm2516_vm1, %v11041_v32, 0.0 }
 0x7a3   : > { %v3309_v41 = vsub.f32 %v10990_v42, %v3295_v36  ;;  %3238 = vadd.xlane.f32.xlu0 %v3237_v37  ;;  %v3246_v39 = vsel %vm2516_vm1, %v11043_v35, 0.0  ;;  %8779 = vpow2.f32 %v3323_v34  ;;  %v1931_v48 = vpop.permute.xlu1 %1930 }
 0x7a4   : > { %3247 = vadd.xlane.f32.xlu1 %v3246_v39  ;;  %v2024_v42 = vcombine.low %v1923_v19, %v1931_v48  ;;  %v2025_v55 = vcombine.high %v1923_v19, %v1931_v48 }
 0x7a5   : > { %v11050_v43 = vpop.eup %8773  ;;  %v3321_v47 = vmul.f32 1.442695, %v3309_v41 }
 0x7a6   : > { %v11052_v49 = vpop.xlane.xlu0 %3291  ;;  %v3332_v44 = vsel %vm2516_vm1, %v11050_v43, 0.0  ;;  %v11056_v51 = vpop.eup %8775  ;;  %v2032_v1 = vrot.slane %v2024_v42, %v10769_v52  ;;  %v2039_v60 = vrot.slane %v2025_v55, %v10769_v52  ;;  %v3207_v42 = vsub.f32 %v10967_v29, %v11022_v12 }
 0x7a7   : > { %3333 = vadd.xlane.f32.xlu0 %v3332_v44  ;;  %8781 = vpow2.f32 %v3321_v47  ;;  %v3234_v2 = vsel %vm2516_vm1, %v11056_v51, 0.0 }
 0x7a8   : > { %v3221_v55 = vmul.f32 1.442695, %v3207_v42 }
 0x7a9   : > { %v11060_v54 = vpop.eup %8777 }
 0x7aa   : > { %v1919_v53 = vpop.permute.xlu0 %1918  ;;  %v3329_v58 = vsel %vm2516_vm1, %v11060_v54, 0.0  ;;  %8783 = vpow2.f32 %v3221_v55 }
 0x7ab   : > { %v2008_v38 = vcombine.low %v1919_v53, %v1927_v30  ;;  %v2009_v57 = vcombine.high %v1919_v53, %v1927_v30  ;;  %3235 = vadd.xlane.f32.xlu0 %v3234_v2 }
 0x7ad   : > { %v2016_v7 = vrot.slane %v2008_v38, %v10769_v52  ;;  %v2023_v9 = vrot.slane %v2009_v57, %v10769_v52  ;;  %v11068_v61 = vpop.eup %8779 }
 0x7ae   : > { %v3344_v13 = vsel %vm2516_vm1, %v11068_v61, 0.0 }
 0x7af   : > { %v2040_v62 = vcombine.low %v2016_v7, %v2032_v1  ;;  %v2041_v63 = vcombine.high %v2016_v7, %v2032_v1  ;;  %v2056_v8 = vcombine.low %v2023_v9, %v2039_v60  ;;  %v2057_v0 = vcombine.high %v2023_v9, %v2039_v60  ;;  %3330 = vadd.xlane.f32.xlu0 %v3329_v58 }
 0x7b1   : > { %v2048_v10 = vrot.slane %v2040_v62, %v10787_v59  ;;  %v2055_v5 = vrot.slane %v2041_v63, %v10787_v59  ;;  %v2064_v6 = vrot.slane %v2056_v8, %v10787_v59  ;;  %v2071_v11 = vrot.slane %v2057_v0, %v10787_v59  ;;  %v11076_v14 = vpop.eup %8781 }
 0x7b2   : > { %v3341_v26 = vsel %vm2516_vm1, %v11076_v14, 0.0 }
 0x7b3   : > { %v2144_v16 = vcombine.low %v2048_v10, %v2055_v5  ;;  %v7807_v17 = vcombine.high %v2048_v10, %v2055_v5  ;;  %v2160_v18 = vcombine.low %v2064_v6, %v2071_v11  ;;  %v7808_v19 = vcombine.high %v2064_v6, %v2071_v11  ;;  %3345 = vadd.xlane.f32.xlu0 %v3344_v13 }
 0x7b4   : > { %v11106_v7 = vpop.eup %8783 }
 0x7b5   : > { %v2151_v4 = vrot.slane %v2144_v16, %v10769_v52  ;;  %v2159_v20 = vrot.slane %v7807_v17, %v10769_v52  ;;  %v2167_v22 = vrot.slane %v2160_v18, %v10769_v52  ;;  %v2175_v24 = vrot.slane %v7808_v19, %v10769_v52  ;;  %1920 = vrot.lane.b32.xlu1 %v10761_v45, %s9970_s1 }
 0x7b7   : > { %3342 = vadd.xlane.f32.xlu0 %v3341_v26  ;;  %v2176_v27 = vcombine.low %v2151_v4, %v2159_v20  ;;  %v2192_v28 = vcombine.low %v2167_v22, %v2175_v24  ;;  %v2177_v30 = vcombine.high %v2151_v4, %v2159_v20  ;;  %v2193_v34 = vcombine.high %v2167_v22, %v2175_v24 }
 0x7b9   : > { %v2184_v36 = vrot.slane %v2176_v27, %v10787_v59  ;;  %v2200_v37 = vrot.slane %v2192_v28, %v10787_v59  ;;  %v2191_v41 = vrot.slane %v2177_v30, %v10787_v59  ;;  %v2207_v39 = vrot.slane %v2193_v34, %v10787_v59  ;;  %1924 = vrot.lane.b32.xlu1 %v10763_v50, %s9970_s1 }
 0x7ba   : > { %v3308_v50 = vsub.f32 %v10995_v46, %v11052_v49 }
 0x7bb   : > { %v2208_v45 = vcombine.low %v2184_v36, %v2200_v37  ;;  %v2209_v47 = vcombine.high %v2184_v36, %v2200_v37  ;;  %v11092_v48 = vcombine.low %v2191_v41, %v2207_v39  ;;  %v11094_v44 = vcombine.high %v2191_v41, %v2207_v39 }
 0x7bc   : > { %v3319_v53 = vmul.f32 1.442695, %v3308_v50 }
 0x7bd   : > { %8128 = vmatprep.subr.mxu0 %v2208_v45  ;;  %8133 = vmatprep.subr.mxu1 %v2209_v47 }
 0x7be   : > { %8129 = vmatpush3.msra.mxu0 %v2208_v45  ;;  %8134 = vmatpush3.msra.mxu1 %v2209_v47  ;;  %8785 = vpow2.f32 %v3319_v53 }
 0x7bf   : > { %8138 = vmatprep.subr.mxu0 %v11092_v48  ;;  %8143 = vmatprep.subr.mxu1 %v11094_v44 }
 0x7c8   : > { %v11111_v49 = vpop.eup %8785 }
 0x7cd   : > { %1916 = vrot.lane.b32.xlu0 %v10739_v40, %s9970_s1  ;;  %v3243_v40 = vsel %vm2516_vm1, %v11106_v7, 0.0 }
 0x7d3   : > { %v3289_v2 = vpop.xlane.xlu1 %3288 }
 0x7d4   : > { %v3307_v38 = vsub.f32 %v10957_v25, %v3289_v2  ;;  %v3338_v25 = vsel %vm2516_vm1, %v11111_v49, 0.0 }
 0x7d6   : > { %v3317_v57 = vmul.f32 1.442695, %v3307_v38 }
 0x7d7   : > { %v3304_v1 = vpop.xlane.xlu1 %3303 }
 0x7d8   : > { %8787 = vpow2.f32 %v3317_v57  ;;  %v3312_v60 = vsub.f32 %v10970_v31, %v3304_v1 }
 0x7da   : > { %v3327_v29 = vmul.f32 1.442695, %v3312_v60 }
 0x7db   : > { %v3301_v12 = vpop.xlane.xlu1 %3300 }
 0x7dc   : > { %8789 = vpow2.f32 %v3327_v29  ;;  %v3311_v46 = vsub.f32 %v10973_v33, %v3301_v12 }
 0x7dd   : > { %3244 = vadd.xlane.f32.xlu1 %v3243_v40 }
 0x7de   : > { %v3325_v9 = vmul.f32 1.442695, %v3311_v46 }
 0x7e0   : > { %8791 = vpow2.f32 %v3325_v9 }
 0x7e1   : > { %3339 = vadd.xlane.f32.xlu1 %v3338_v25 }
 0x7e2   : > { %v11115_v31 = vpop.eup %8787 }
 0x7e3   : > { %v3335_v58 = vsel %vm2516_vm1, %v11115_v31, 0.0 }
 0x7e5   : > { %3336 = vadd.xlane.f32.xlu1 %v3335_v58 }
 0x7e6   : > { %v11119_v62 = vpop.eup %8789 }
 0x7e7   : > { %v3350_v33 = vsel %vm2516_vm1, %v11119_v62, 0.0 }
 0x7e9   : > { %3351 = vadd.xlane.f32.xlu1 %v3350_v33 }
 0x7ea   : > { %v11123_v63 = vpop.eup %8791 }
 0x7eb   : > { %v3347_v8 = vsel %vm2516_vm1, %v11123_v63, 0.0 }
 0x7ed   : > { %3348 = vadd.xlane.f32.xlu1 %v3347_v8 }
 0x7fe   : > { %1928 = vrot.lane.b32.xlu1 %v10777_v56, %s9970_s1 }
 0x824   : > { %v3230_v0 = vpop.xlane.xlu0 %3229 }
 0x825   : > { %8793 = vrcp.f32 %v3230_v0 }
 0x828   : > { %v3242_v10 = vpop.xlane.xlu0 %3241 }
 0x829   : > { %8795 = vrcp.f32 %v3242_v10 }
 0x82c   : > { %v3227_v5 = vpop.xlane.xlu0 %3226 }
 0x82d   : > { %8797 = vrcp.f32 %v3227_v5  ;;  %v3233_v6 = vpop.xlane.xlu1 %3232 }
 0x82e   : > { %8799 = vrcp.f32 %v3233_v6 }
 0x82f   : > { %v8794_v11 = vpop.eup %8793 }
 0x830   : > { %v11133_v13 = vmul.f32 %v8794_v11, %v11019_v3  ;;  %v3239_v16 = vpop.xlane.xlu0 %3238 }
 0x831   : > { %8801 = vrcp.f32 %v3239_v16  ;;  %v3248_v56 = vpop.xlane.xlu1 %3247 }
 0x832   : > { %3381 = vst.msk [vmem:[%s11136_s10] sm:$0xff] %vm2516_vm1, %v11133_v13  ;;  %8803 = vrcp.f32 %v3248_v56 }
 0x833   : > { %v8796_v17 = vpop.eup %8795 }
 0x834   : > { %v11142_v18 = vmul.f32 %v8796_v17, %v11027_v15  ;;  %v3334_v19 = vpop.xlane.xlu0 %3333 }
 0x835   : > { %8805 = vrcp.f32 %v3334_v19  ;;  %v1921_v45 = vpop.permute.xlu1 %1920 }
 0x836   : > { %3383 = vst.msk [vmem:[%s11136_s10 + $0x10] sm:$0xff] %vm2516_vm1, %v11142_v18 }
 0x837   : > { %v8798_v3 = vpop.eup %8797 }
 0x838   : > { %v8800_v4 = vpop.eup %8799  ;;  %v3236_v20 = vpop.xlane.xlu0 %3235  ;;  %v3265_v22 = vmul.f32 %v8798_v3, %v11032_v21 }
 0x839   : > { %8807 = vrcp.f32 %v3236_v20  ;;  %v11149_v24 = vmul.f32 %v8800_v4, %v11034_v23  ;;  %v1925_v47 = vpop.permute.xlu1 %1924 }
 0x83a   : > { %3377 = vst.msk [vmem:[%s11152_s27] sm:$0xff] %vm2516_vm1, %v3265_v22 }
 0x83b   : > { %v8802_v15 = vpop.eup %8801  ;;  %3378 = vst.msk [vmem:[%s11152_s27 + $0x8] sm:$0xff] %vm2516_vm1, %v11149_v24 }
 0x83c   : > { %v3331_v26 = vpop.xlane.xlu0 %3330  ;;  %v11160_v27 = vmul.f32 %v8802_v15, %v11041_v32  ;;  %v8804_v21 = vpop.eup %8803 }
 0x83d   : > { %8809 = vrcp.f32 %v3331_v26  ;;  %v11163_v23 = vmul.f32 %v8804_v21, %v11043_v35 }
 0x83e   : > { %3379 = vst.msk [vmem:[%s11152_s27 + $0x10] sm:$0xff] %vm2516_vm1, %v11160_v27 }
 0x83f   : > { %v8806_v28 = vpop.eup %8805  ;;  %3384 = vst.msk [vmem:[%s11136_s10 + $0x18] sm:$0xff] %vm2516_vm1, %v11163_v23 }
 0x840   : > { %v3370_v30 = vmul.f32 %v8806_v28, %v11050_v43  ;;  %v3346_v34 = vpop.xlane.xlu0 %3345 }
 0x841   : > { %8811 = vrcp.f32 %v3346_v34 }
 0x842   : > { %3389 = vst.msk [vmem:[%s11173_s16] sm:$0xff] %vm2516_vm1, %v3370_v30 }
 0x843   : > { %v8808_v32 = vpop.eup %8807 }
 0x844   : > { %v11178_v35 = vmul.f32 %v8808_v32, %v11056_v51  ;;  %v3343_v36 = vpop.xlane.xlu0 %3342 }
 0x845   : > { %8813 = vrcp.f32 %v3343_v36 }
 0x846   : > { %3382 = vst.msk [vmem:[%s11136_s10 + $0x8] sm:$0xff] %vm2516_vm1, %v11178_v35 }
 0x847   : > { %v8810_v37 = vpop.eup %8809 }
 0x848   : > { %v3369_v43 = vmul.f32 %v8810_v37, %v11060_v54  ;;  %v1917_v2 = vpop.permute.xlu0 %1916 }
 0x849   : > { %v1940_v60 = vcombine.low %v1917_v2, %v1925_v47  ;;  %v1941_v29 = vcombine.high %v1917_v2, %v1925_v47 }
 0x84a   : > { %3385 = vst.msk [vmem:[%s11185_s26] sm:$0xff] %vm2516_vm1, %v3369_v43  ;;  %8130 = vmatprep.mubr.msk.f32.mxu0 %vm2516_vm1, %v3369_v43 }
 0x84b   : > { %v8812_v41 = vpop.eup %8811  ;;  %8131 = vmatmul.mubr.msk.f32.vlgmr.msra.gmra.mrb[6].mxu0 %vm2516_vm1, %v3370_v30  ;;  %v1955_v25 = vrot.slane %v1941_v29, %v10769_v52 }
 0x84c   : > { %v3374_v51 = vmul.f32 %v8812_v41, %v11068_v61  ;;  %8139 = vmatpush3.msra.mxu0 %v11092_v48 }
 0x84e   : > { %3391 = vst.msk [vmem:[%s11173_s16 + $0x10] sm:$0xff] %vm2516_vm1, %v3374_v51 }
 0x84f   : > { %v8814_v39 = vpop.eup %8813 }
 0x850   : > { %v3373_v54 = vmul.f32 %v8814_v39, %v11076_v14 }
 0x852   : > { %3387 = vst.msk [vmem:[%s11185_s26 + $0x10] sm:$0xff] %vm2516_vm1, %v3373_v54  ;;  %8140 = vmatprep.mubr.msk.f32.mxu0 %vm2516_vm1, %v3373_v54 }
 0x853   : > { %8141 = vmatmul.mubr.msk.f32.vlgmr.msra.gmra.mrb[8].mxu0 %vm2516_vm1, %v3374_v51 }
 0x854   : > { %8150 = vmatprep.mubr.msk.f32.mxu0 %vm2516_vm1, %v3265_v22 }
 0x86a   : > { %v3245_v42 = vpop.xlane.xlu1 %3244 }
 0x86b   : > { %8815 = vrcp.f32 %v3245_v42 }
 0x86e   : > { %v3340_v61 = vpop.xlane.xlu1 %3339 }
 0x86f   : > { %8817 = vrcp.f32 %v3340_v61 }
 0x872   : > { %v3337_v48 = vpop.xlane.xlu1 %3336 }
 0x873   : > { %8819 = vrcp.f32 %v3337_v48 }
 0x875   : > { %v8816_v55 = vpop.eup %8815 }
 0x876   : > { %v3352_v14 = vpop.xlane.xlu1 %3351  ;;  %v11202_v50 = vmul.f32 %v8816_v55, %v11106_v7 }
 0x877   : > { %8821 = vrcp.f32 %v3352_v14 }
 0x878   : > { %3380 = vst.msk [vmem:[%s11152_s27 + $0x18] sm:$0xff] %vm2516_vm1, %v11202_v50 }
 0x879   : > { %v8818_v53 = vpop.eup %8817 }
 0x87a   : > { %v3372_v38 = vmul.f32 %v8818_v53, %v11111_v49  ;;  %v3349_v57 = vpop.xlane.xlu1 %3348  ;;  %v1948_v49 = vrot.slane %v1940_v60, %v10769_v52 }
 0x87b   : > { %8823 = vrcp.f32 %v3349_v57 }
 0x87c   : > { %3390 = vst.msk [vmem:[%s11173_s16 + $0x8] sm:$0xff] %vm2516_vm1, %v3372_v38 }
 0x87d   : > { %v8820_v1 = vpop.eup %8819 }
 0x87e   : > { %v1929_v12 = vpop.permute.xlu1 %1928  ;;  %v3371_v7 = vmul.f32 %v8820_v1, %v11115_v31 }
 0x87f   : > { %v1956_v46 = vcombine.low %v1921_v45, %v1929_v12  ;;  %v1957_v40 = vcombine.high %v1921_v45, %v1929_v12 }
 0x880   : > { %3386 = vst.msk [vmem:[%s11185_s26 + $0x8] sm:$0xff] %vm2516_vm1, %v3371_v7  ;;  %8135 = vmatprep.mubr.msk.f32.mxu1 %vm2516_vm1, %v3371_v7 }
 0x881   : > { %v8822_v9 = vpop.eup %8821  ;;  %v1964_v58 = vrot.slane %v1956_v46, %v10769_v52  ;;  %v1971_v33 = vrot.slane %v1957_v40, %v10769_v52  ;;  %8136 = vmatmul.mubr.msk.f32.vlgmr.msra.gmra.mrb[12].mxu1 %vm2516_vm1, %v3372_v38 }
 0x882   : > { %v3376_v31 = vmul.f32 %v8822_v9, %v11119_v62  ;;  %8144 = vmatpush3.msra.mxu1 %v11094_v44 }
 0x883   : > { %v1972_v8 = vcombine.low %v1948_v49, %v1964_v58  ;;  %v1973_v0 = vcombine.high %v1948_v49, %v1964_v58  ;;  %v1988_v10 = vcombine.low %v1955_v25, %v1971_v33  ;;  %v1989_v5 = vcombine.high %v1955_v25, %v1971_v33 }
 0x884   : > { %3392 = vst.msk [vmem:[%s11173_s16 + $0x18] sm:$0xff] %vm2516_vm1, %v3376_v31 }
 0x885   : > { %v8824_v6 = vpop.eup %8823  ;;  %v1980_v11 = vrot.slane %v1972_v8, %v10787_v59  ;;  %v1987_v16 = vrot.slane %v1973_v0, %v10787_v59  ;;  %v1996_v56 = vrot.slane %v1988_v10, %v10787_v59  ;;  %v2003_v17 = vrot.slane %v1989_v5, %v10787_v59 }
 0x886   : > { %v3375_v62 = vmul.f32 %v8824_v6, %v11123_v63 }
 0x887   : > { %v2076_v19 = vcombine.low %v1980_v11, %v1987_v16  ;;  %v7805_v44 = vcombine.high %v1980_v11, %v1987_v16  ;;  %v2092_v3 = vcombine.low %v1996_v56, %v2003_v17  ;;  %v7806_v4 = vcombine.high %v1996_v56, %v2003_v17 }
 0x888   : > { %3388 = vst.msk [vmem:[%s11185_s26 + $0x18] sm:$0xff] %vm2516_vm1, %v3375_v62  ;;  %8145 = vmatprep.mubr.msk.f32.mxu1 %vm2516_vm1, %v3375_v62 }
 0x889   : > { %8146 = vmatmul.mubr.msk.f32.vlgmr.msra.gmra.mrb[14].mxu1 %vm2516_vm1, %v3376_v31  ;;  %v2083_v20 = vrot.slane %v2076_v19, %v10769_v52  ;;  %v2091_v22 = vrot.slane %v7805_v44, %v10769_v52  ;;  %v2099_v15 = vrot.slane %v2092_v3, %v10769_v52  ;;  %v2107_v26 = vrot.slane %v7806_v4, %v10769_v52 }
 0x88a   : > { %8155 = vmatprep.mubr.msk.f32.mxu1 %vm2516_vm1, %v11149_v24 }
 0x88b   : > { %v2108_v63 = vcombine.low %v2083_v20, %v2091_v22  ;;  %v2124_v21 = vcombine.low %v2099_v15, %v2107_v26  ;;  %v2109_v28 = vcombine.high %v2083_v20, %v2091_v22  ;;  %v2125_v30 = vcombine.high %v2099_v15, %v2107_v26 }
 0x88d   : > { %v2116_v34 = vrot.slane %v2108_v63, %v10787_v59  ;;  %v2132_v32 = vrot.slane %v2124_v21, %v10787_v59  ;;  %v2123_v36 = vrot.slane %v2109_v28, %v10787_v59  ;;  %v2139_v37 = vrot.slane %v2125_v30, %v10787_v59 }
 0x88f   : > { %v2140_v43 = vcombine.low %v2116_v34, %v2132_v32  ;;  %v2141_v41 = vcombine.high %v2116_v34, %v2132_v32  ;;  %v2142_v51 = vcombine.low %v2123_v36, %v2139_v37  ;;  %v2143_v24 = vcombine.high %v2123_v36, %v2139_v37 }
 0x891   : > { %8148 = vmatprep.subr.mxu0 %v2140_v43  ;;  %8153 = vmatprep.subr.mxu1 %v2141_v41 }
 0x892   : > { %8149 = vmatpush3.msra.mxu0 %v2140_v43  ;;  %8154 = vmatpush3.msra.mxu1 %v2141_v41 }
 0x893   : > { %8151 = vmatmul.mubr.msk.f32.vlgmr.msra.gmra.mrb[6].mxu0 %vm2516_vm1, %v11133_v13  ;;  %8156 = vmatmul.mubr.msk.f32.vlgmr.msra.gmra.mrb[12].mxu1 %vm2516_vm1, %v11178_v35 }
 0x894   : > { %8158 = vmatprep.subr.mxu0 %v2142_v51  ;;  %8163 = vmatprep.subr.mxu1 %v2143_v24 }
 0x895   : > { %8159 = vmatpush3.msra.mxu0 %v2142_v51  ;;  %8160 = vmatprep.mubr.msk.f32.mxu0 %vm2516_vm1, %v11160_v27 }
 0x896   : > { %8164 = vmatpush3.msra.mxu1 %v2143_v24  ;;  %8165 = vmatprep.mubr.msk.f32.mxu1 %vm2516_vm1, %v11202_v50 }
 0x897   : > { %8161 = vmatmul.mubr.msk.f32.vlgmr.msra.gmra.mrb[8].mxu0 %vm2516_vm1, %v11142_v18  ;;  %8166 = vmatmul.mubr.msk.f32.vlgmr.msra.gmra.mrb[14].mxu1 %vm2516_vm1, %v11163_v23 }
 0x966   : > { %v8152_v13 = vpop.f32.mrb[6].mxu0  ;;  %v8157_v39 = vpop.f32.mrb[12].mxu1 }
 0x967   : > { %v3789_v54 = vpop.f32.mrb[7].mxu0  ;;  %v3870_v35 = vpop.f32.mrb[13].mxu1 }
 0x96a   : > { %v8162_v45 = vpop.f32.mrb[8].mxu0  ;;  %v8167_v47 = vpop.f32.mrb[14].mxu1 }
 0x96b   : > { %v4109_v42 = vcombine.low %v8152_v13, %v8162_v45  ;;  %v4110_v61 = vcombine.high %v8152_v13, %v8162_v45  ;;  %v4125_v48 = vcombine.low %v8157_v39, %v8167_v47  ;;  %v4126_v27 = vcombine.high %v8157_v39, %v8167_v47  ;;  %v3951_v55 = vpop.f32.mrb[9].mxu0  ;;  %v4032_v14 = vpop.f32.mrb[15].mxu1 }
 0x96c   : > { %v4041_v53 = vcombine.low %v3789_v54, %v3951_v55  ;;  %v4042_v50 = vcombine.high %v3789_v54, %v3951_v55  ;;  %v4057_v2 = vcombine.low %v3870_v35, %v4032_v14  ;;  %v4058_v38 = vcombine.high %v3870_v35, %v4032_v14  ;;  %v4346_v14 = vld [vmem:[#allocation23 + $0x8] sm:$0xff] }
 0x96d   : > { %v4117_v18 = vrot.slane %v4109_v42, %v10769_v52  ;;  %v4124_v23 = vrot.slane %v4110_v61, %v10769_v52  ;;  %v4133_v57 = vrot.slane %v4125_v48, %v10769_v52  ;;  %v4140_v1 = vrot.slane %v4126_v27, %v10769_v52  ;;  %v4345_v42 = vld [vmem:[#allocation23] sm:$0xff] }
 0x96e   : > { %v4049_v60 = vrot.slane %v4041_v53, %v10769_v52  ;;  %v4056_v29 = vrot.slane %v4042_v50, %v10769_v52  ;;  %v4065_v12 = vrot.slane %v4057_v2, %v10769_v52  ;;  %v4072_v7 = vrot.slane %v4058_v38, %v10769_v52  ;;  %v4347_v53 = vld [vmem:[#allocation23 + $0x10] sm:$0xff]  ;;  %v4348_v50 = vld [vmem:[#allocation23 + $0x18] sm:$0xff] }
 0x96f   : > { %v4141_v46 = vcombine.low %v4117_v18, %v4133_v57  ;;  %v4142_v40 = vcombine.high %v4117_v18, %v4133_v57  ;;  %v4157_v9 = vcombine.low %v4124_v23, %v4140_v1  ;;  %v4158_v49 = vcombine.high %v4124_v23, %v4140_v1 }
 0x970   : > { %v4073_v25 = vcombine.low %v4049_v60, %v4065_v12  ;;  %v4074_v58 = vcombine.high %v4049_v60, %v4065_v12  ;;  %v4089_v33 = vcombine.low %v4056_v29, %v4072_v7  ;;  %v4090_v31 = vcombine.high %v4056_v29, %v4072_v7 }
 0x971   : > { %v4149_v8 = vrot.slane %v4141_v46, %v10787_v59  ;;  %v4156_v0 = vrot.slane %v4142_v40, %v10787_v59  ;;  %v4165_v10 = vrot.slane %v4157_v9, %v10787_v59  ;;  %v4172_v5 = vrot.slane %v4158_v49, %v10787_v59 }
 0x972   : > { %v4081_v6 = vrot.slane %v4073_v25, %v10787_v59  ;;  %v4088_v11 = vrot.slane %v4074_v58, %v10787_v59  ;;  %v4097_v16 = vrot.slane %v4089_v33, %v10787_v59  ;;  %v4104_v56 = vrot.slane %v4090_v31, %v10787_v59 }
 0x973   : > { %v4245_v17 = vcombine.low %v4149_v8, %v4156_v0  ;;  %v7855_v62 = vcombine.high %v4149_v8, %v4156_v0  ;;  %v4261_v19 = vcombine.low %v4165_v10, %v4172_v5  ;;  %v7856_v44 = vcombine.high %v4165_v10, %v4172_v5 }
 0x974   : > { %v4177_v3 = vcombine.low %v4081_v6, %v4088_v11  ;;  %v7853_v4 = vcombine.high %v4081_v6, %v4088_v11  ;;  %v4193_v20 = vcombine.low %v4097_v16, %v4104_v56  ;;  %v7854_v22 = vcombine.high %v4097_v16, %v4104_v56  ;;  %v7857_v6 = vld [vmem:[#allocation25] ss:$0 sm:$0xff] }
 0x975   : > { %v4252_v15 = vrot.slane %v4245_v17, %v10769_v52  ;;  %v4260_v26 = vrot.slane %v7855_v62, %v10769_v52  ;;  %v4268_v63 = vrot.slane %v4261_v19, %v10769_v52  ;;  %v4276_v21 = vrot.slane %v7856_v44, %v10769_v52  ;;  %v8865_v62 = vld [vmem:[%s10662_s19 + $0x8] sm:$0xff]  ;;  %v8866_v44 = vld [vmem:[%s10662_s19] sm:$0xff]  ;;  %s11572_s19 = scalar_lea.vmem [#allocation51], %s11130_s20 }
 0x976   : > { %v4184_v28 = vrot.slane %v4177_v3, %v10769_v52  ;;  %v4192_v30 = vrot.slane %v7853_v4, %v10769_v52  ;;  %v4200_v34 = vrot.slane %v4193_v20, %v10769_v52  ;;  %v4208_v32 = vrot.slane %v7854_v22, %v10769_v52  ;;  %v4439_v22 = vld [vmem:[#allocation26] sm:$0xff] }
 0x977   : > { %v4277_v36 = vcombine.low %v4252_v15, %v4260_v26  ;;  %v4293_v37 = vcombine.low %v4268_v63, %v4276_v21  ;;  %v4278_v43 = vcombine.high %v4252_v15, %v4260_v26  ;;  %v4294_v41 = vcombine.high %v4268_v63, %v4276_v21  ;;  %v4440_v15 = vld [vmem:[#allocation26 + $0x8] sm:$0xff]  ;;  %v4441_v26 = vld [vmem:[#allocation26 + $0x10] sm:$0xff]  ;;  %v4442_v21 = vld [vmem:[#allocation26 + $0x18] sm:$0xff] }
 0x978   : > { %v4209_v51 = vcombine.low %v4184_v28, %v4192_v30  ;;  %v4225_v24 = vcombine.low %v4200_v34, %v4208_v32  ;;  %v4210_v13 = vcombine.high %v4184_v28, %v4192_v30  ;;  %v4226_v39 = vcombine.high %v4200_v34, %v4208_v32  ;;  %v1480_v28 = vld [vmem:[%s10682_s13] sm:$0xff]  ;;  %v1481_v34 = vld [vmem:[%s10682_s13 + $0x8] sm:$0xff]  ;;  %s12130_s13 = sld [smem:[#allocation99_spill]] }
 0x979   : > { %v4285_v54 = vrot.slane %v4277_v36, %v10787_v59  ;;  %v4301_v35 = vrot.slane %v4293_v37, %v10787_v59  ;;  %v4292_v45 = vrot.slane %v4278_v43, %v10787_v59  ;;  %v4308_v47 = vrot.slane %v4294_v41, %v10787_v59  ;;  %8187 = vmatprep.mubr.msk.f32.mxu1 %vm1488_vm0, %v1480_v28 }
 0x97a   : > { %v4217_v61 = vrot.slane %v4209_v51, %v10787_v59  ;;  %v4233_v48 = vrot.slane %v4225_v24, %v10787_v59  ;;  %v4224_v27 = vrot.slane %v4210_v13, %v10787_v59  ;;  %v4240_v55 = vrot.slane %v4226_v39, %v10787_v59 }
 0x97b   : > { %v4310_v2 = vcombine.high %v4285_v54, %v4301_v35  ;;  %v4311_v38 = vcombine.low %v4292_v45, %v4308_v47  ;;  %v4312_v18 = vcombine.high %v4292_v45, %v4308_v47  ;;  %v4309_v23 = vcombine.low %v4285_v54, %v4301_v35  ;;  %v5163_v35 = vld [vmem:[#allocation29] sm:$0xff]  ;;  %v5164_v45 = vld [vmem:[#allocation29 + $0x8] sm:$0xff] }
 0x97c   : > { %v4242_v57 = vcombine.high %v4217_v61, %v4233_v48  ;;  %v4243_v1 = vcombine.low %v4224_v27, %v4240_v55  ;;  %v4244_v60 = vcombine.high %v4224_v27, %v4240_v55  ;;  %v4241_v29 = vcombine.low %v4217_v61, %v4233_v48  ;;  %v5166_v61 = vld [vmem:[#allocation29 + $0x18] sm:$0xff] }
 0x97d   : > { %4317 = vrot.lane.b32.xlu1 %v4310_v2, %s12022_s23  ;;  %v8306_v12 = vpack.c.bf16 %v4346_v14, %v4345_v42  ;;  %v8310_v7 = vpack.c.bf16 %v4348_v50, %v4347_v53  ;;  %v8314_v63 = vpack.c.bf16 %v4440_v15, %v4439_v22  ;;  %v8318_v30 = vpack.c.bf16 %v4442_v21, %v4441_v26  ;;  %v5165_v42 = vld [vmem:[#allocation29 + $0x10] sm:$0xff]  ;;  %v7860_v27 = vld [vmem:[#allocation28] ss:$0 sm:$0xff] }
 0x97e   : > { %4315 = vrot.lane.b32.xlu0 %v4242_v57, %s12022_s23  ;;  %v8322_v47 = vpack.c.bf16 %v5164_v45, %v5163_v35  ;;  %v8326_v48 = vpack.c.bf16 %v5166_v61, %v5165_v42 }
 0x97f   : > { %8307 = vmatprep.subr.bf16.mxu0 %v8306_v12  ;;  %8315 = vmatprep.subr.bf16.mxu1 %v8314_v63 }
 0x980   : > { %8309 = vmatpush3.bf16.msra.mxu0 %v8306_v12  ;;  %8317 = vmatpush3.bf16.msra.mxu1 %v8314_v63 }
 0x981   : > { %4325 = vrot.lane.b32.xlu1 %v4311_v38, %s9972_s6  ;;  %8311 = vmatprep.subr.bf16.mxu0 %v8310_v7 }
 0x982   : > { %4323 = vrot.lane.b32.xlu0 %v4243_v1, %s9972_s6  ;;  %8319 = vmatprep.subr.bf16.mxu1 %v8318_v30 }
 0x984   : > { %8313 = vmatpush3.bf16.msra.mxu0 %v8310_v7  ;;  %8321 = vmatpush3.bf16.msra.mxu1 %v8318_v30  ;;  %v7872_v7 = vld [vmem:[#allocation16] ss:$0 sm:$0xff] }
 0x985   : > { %4333 = vrot.lane.b32.xlu1 %v4312_v18, %s9973_s4  ;;  %8323 = vmatprep.subr.bf16.mxu0 %v8322_v47 }
 0x986   : > { %4331 = vrot.lane.b32.xlu0 %v4244_v60, %s9973_s4 }
 0x987   : > { %8188 = vmatmul.mubr.msk.f32.vlgmr.msra.gmra.mrb[16].mxu1 %vm1488_vm0, %v1481_v34 }
 0x9ef   : > { %v4318_v46 = vpop.permute.xlu1 %4317 }
 0x9f0   : > { %v4316_v40 = vpop.permute.xlu0 %4315  ;;  %v4338_v33 = vsel %vm2516_vm1, %v4309_v23, %v4318_v46 }
 0x9f1   : > { %v4337_v25 = vsel %vm2516_vm1, %v4241_v29, %v4316_v40  ;;  %v7871_v29 = vld [vmem:[#allocation14] ss:$0 sm:$0xff] }
 0x9f3   : > { %v4326_v9 = vpop.permute.xlu1 %4325 }
 0x9f4   : > { %v4324_v49 = vpop.permute.xlu0 %4323  ;;  %v4341_v0 = vsel %vm4339_vm4, %v4338_v33, %v4326_v9 }
 0x9f5   : > { %v4340_v31 = vsel %vm4339_vm4, %v4337_v25, %v4324_v49 }
 0x9f7   : > { %v4334_v58 = vpop.permute.xlu1 %4333 }
 0x9f8   : > { %v4332_v8 = vpop.permute.xlu0 %4331  ;;  %v4344_v5 = vsel %vm4342_vm5, %v4341_v0, %v4334_v58 }
 0x9f9   : > { %v4343_v10 = vsel %vm4342_vm5, %v4340_v31, %v4332_v8 }
 0x9fa   : > { %8176 = vmatprep.mubr.msk.f32.mxu0 %vm1488_vm0, %v4343_v10 }
 0x9fb   : > { %8177 = vmatmul.mubr.msk.f32.vlgmr.msra.gmra.mrb[10].mxu0 %vm1488_vm0, %v4344_v5 }
 0x9fc   : > { %8325 = vmatpush3.bf16.msra.mxu0 %v8322_v47 }
 0x9fd   : > { %8327 = vmatprep.subr.bf16.mxu0 %v8326_v48 }
 0xa00   : > { %8329 = vmatpush3.bf16.msra.mxu0 %v8326_v48 }
 0xa5a   : > { %v8189_v55 = vpop.f32.mrb[16].mxu1 }
 0xa5b   : > { %v11318_v14 = vadd.f32 %v8189_v55, %v7860_v27  ;;  %v4522_v53 = vpop.f32.mrb[17].mxu1 }
 0xa5c   : > { %v11320_v50 = vadd.f32 %v7860_v27, %v4522_v53 }
 0xace   : > { %v8178_v11 = vpop.f32.mrb[10].mxu0 }
 0xacf   : > { %v4434_v16 = vadd.f32 %v8178_v11, %v7857_v6  ;;  %v4428_v56 = vpop.f32.mrb[11].mxu0 }
 0xad0   : > { %v4429_v17 = vadd.f32 %v7857_v6, %v4428_v56 }
 0xad1   : > { %v11301_v19 = vadd.f32 %v8865_v62, %v4434_v16 }
 0xad2   : > { %v11304_v3 = vadd.f32 %v8866_v44, %v4429_v17 }
 0xad3   : > { %v5124_v4 = vsel %vm1488_vm0, %v11301_v19, 0.0 }
 0xad4   : > { %5125 = vadd.xlane.f32.xlu1 %v5124_v4  ;;  %v5121_v20 = vsel %vm1488_vm0, %v11304_v3, 0.0 }
 0xad5   : > { %5122 = vadd.xlane.f32.xlu0 %v5121_v20 }
 0xae5   : > { %4535 = vrot.lane.b32.xlu1 %v11318_v14, %s9964_s3 }
 0xae9   : > { %4539 = vrot.lane.b32.xlu1 %v11320_v50, %s9965_s14 }
 0xaed   : > { %4541 = vrot.lane.b32.xlu1 %v11318_v14, %s9965_s14 }
 0xaf1   : > { %4547 = vrot.lane.b32.xlu1 %v11318_v14, %s9966_s8 }
 0xb61   : > { %v5126_v32 = vpop.xlane.xlu1 %5125 }
 0xb62   : > { %v5128_v36 = vmul.f32 0.03125, %v5126_v32  ;;  %v5123_v37 = vpop.xlane.xlu0 %5122 }
 0xb63   : > { %v5127_v43 = vmul.f32 0.03125, %v5123_v37 }
 0xb64   : > { %v5130_v41 = vsub.f32 %v11301_v19, %v5128_v36 }
 0xb65   : > { %v5129_v51 = vsub.f32 %v11304_v3, %v5127_v43  ;;  %v11336_v33 = vpop.permute.xlu1 %4535 }
 0xb66   : > { %v5132_v39 = vmul.f32 %v5130_v41, %v5130_v41 }
 0xb67   : > { %v5131_v24 = vmul.f32 %v5129_v51, %v5129_v51 }
 0xb68   : > { %v5136_v54 = vsel %vm1488_vm0, %v5132_v39, 0.0 }
 0xb69   : > { %v5133_v13 = vsel %vm1488_vm0, %v5131_v24, 0.0  ;;  %v11340_v8 = vpop.permute.xlu1 %4539 }
 0xb6a   : > { %5134 = vadd.xlane.f32.xlu0 %v5133_v13  ;;  %v4551_v5 = vcombine.low %v11320_v50, %v11340_v8  ;;  %v4552_v6 = vcombine.high %v11320_v50, %v11340_v8 }
 0xb6c   : > { %v4559_v20 = vrot.slane %v4551_v5, %v10769_v52  ;;  %v4566_v22 = vrot.slane %v4552_v6, %v10769_v52 }
 0xb6d   : > { %v11344_v10 = vpop.permute.xlu1 %4541 }
 0xb6e   : > { %5137 = vadd.xlane.f32.xlu0 %v5136_v54  ;;  %v4619_v56 = vcombine.low %v11318_v14, %v11344_v10  ;;  %v4620_v17 = vcombine.high %v11318_v14, %v11344_v10 }
 0xb70   : > { %v4627_v63 = vrot.slane %v4619_v56, %v10769_v52  ;;  %v4634_v21 = vrot.slane %v4620_v17, %v10769_v52 }
 0xb71   : > { %v11358_v62 = vpop.permute.xlu1 %4547 }
 0xb72   : > { %v4635_v44 = vcombine.low %v11336_v33, %v11358_v62  ;;  %v4636_v4 = vcombine.high %v11336_v33, %v11358_v62 }
 0xb74   : > { %v4643_v28 = vrot.slane %v4635_v44, %v10769_v52  ;;  %v4650_v30 = vrot.slane %v4636_v4, %v10769_v52 }
 0xb76   : > { %v4651_v43 = vcombine.low %v4627_v63, %v4643_v28  ;;  %v4668_v24 = vcombine.high %v4634_v21, %v4650_v30 }
 0xb78   : > { %v4659_v45 = vrot.slane %v4651_v43, %v10787_v59  ;;  %v4682_v61 = vrot.slane %v4668_v24, %v10787_v59 }
 0xb84   : > { %4533 = vrot.lane.b32.xlu0 %v11320_v50, %s9964_s3 }
 0xb88   : > { %4545 = vrot.lane.b32.xlu0 %v11320_v50, %s9966_s8 }
 0xbf7   : > { %v5135_v2 = vpop.xlane.xlu0 %5134 }
 0xbf8   : > { %v5139_v38 = vmul.f32 0.03125, %v5135_v2 }
 0xbfa   : > { %v5141_v18 = vadd.f32 1e-12, %v5139_v38 }
 0xbfb   : > { %v5138_v23 = vpop.xlane.xlu0 %5137 }
 0xbfc   : > { %8825 = vrsqrt.f32 %v5141_v18  ;;  %v5140_v57 = vmul.f32 0.03125, %v5138_v23 }
 0xbfe   : > { %v5142_v1 = vadd.f32 1e-12, %v5140_v57 }
 0xbff   : > { %v11338_v31 = vpop.permute.xlu0 %4533 }
 0xc00   : > { %8827 = vrsqrt.f32 %v5142_v1 }
 0xc03   : > { %v11342_v0 = vpop.permute.xlu0 %4545 }
 0xc04   : > { %v4567_v11 = vcombine.low %v11338_v31, %v11342_v0  ;;  %v4568_v16 = vcombine.high %v11338_v31, %v11342_v0 }
 0xc06   : > { %v8826_v60 = vpop.eup %8825  ;;  %v4575_v15 = vrot.slane %v4567_v11, %v10769_v52  ;;  %v4582_v26 = vrot.slane %v4568_v16, %v10769_v52 }
 0xc07   : > { %v5145_v12 = vmul.f32 %v8826_v60, %v5129_v51  ;;  %v4667_v51 = vcombine.low %v4634_v21, %v4650_v30 }
 0xc08   : > { %v4583_v34 = vcombine.low %v4559_v20, %v4575_v15  ;;  %v4584_v32 = vcombine.high %v4559_v20, %v4575_v15  ;;  %v4599_v36 = vcombine.low %v4566_v22, %v4582_v26  ;;  %v4600_v37 = vcombine.high %v4566_v22, %v4582_v26 }
 0xc09   : > { %v5153_v46 = vmul.f32 %v7871_v29, %v5145_v12  ;;  %v4675_v42 = vrot.slane %v4667_v51, %v10787_v59 }
 0xc0a   : > { %v8828_v40 = vpop.eup %8827  ;;  %v4591_v13 = vrot.slane %v4583_v34, %v10787_v59  ;;  %v4598_v39 = vrot.slane %v4584_v32, %v10787_v59  ;;  %v4607_v54 = vrot.slane %v4599_v36, %v10787_v59  ;;  %v4614_v35 = vrot.slane %v4600_v37, %v10787_v59 }
 0xc0b   : > { %v5146_v9 = vmul.f32 %v8828_v40, %v5130_v41  ;;  %v5161_v49 = vadd.f32 %v7872_v7, %v5153_v46  ;;  %v4652_v41 = vcombine.high %v4627_v63, %v4643_v28  ;;  %v4771_v18 = vcombine.low %v4675_v42, %v4682_v61 }
 0xc0c   : > { %v4687_v48 = vcombine.low %v4591_v13, %v4598_v39  ;;  %v7863_v27 = vcombine.high %v4591_v13, %v4598_v39  ;;  %v4703_v55 = vcombine.low %v4607_v54, %v4614_v35  ;;  %v7864_v53 = vcombine.high %v4607_v54, %v4614_v35  ;;  %v7873_v39 = vld [vmem:[#allocation31] ss:$0 sm:$0xff] }
 0xc0d   : > { %v5154_v25 = vmul.f32 %v7871_v29, %v5146_v9  ;;  %8198 = vmatprep.mubr.msk.f32.mxu0 %vm1488_vm0, %v5161_v49  ;;  %v4666_v47 = vrot.slane %v4652_v41, %v10787_v59  ;;  %v7866_v23 = vcombine.high %v4675_v42, %v4682_v61  ;;  %v4778_v46 = vrot.slane %v4771_v18, %v10769_v52 }
 0xc0e   : > { %v4694_v57 = vrot.slane %v4687_v48, %v10769_v52  ;;  %v4702_v1 = vrot.slane %v7863_v27, %v10769_v52  ;;  %v4710_v60 = vrot.slane %v4703_v55, %v10769_v52  ;;  %v4718_v29 = vrot.slane %v7864_v53, %v10769_v52 }
 0xc0f   : > { %v5162_v58 = vadd.f32 %v7872_v7, %v5154_v25  ;;  %v4755_v2 = vcombine.low %v4659_v45, %v4666_v47  ;;  %v7865_v38 = vcombine.high %v4659_v45, %v4666_v47  ;;  %v4786_v40 = vrot.slane %v7866_v23, %v10769_v52 }
 0xc10   : > { %v4719_v9 = vcombine.low %v4694_v57, %v4702_v1  ;;  %v4735_v49 = vcombine.low %v4710_v60, %v4718_v29  ;;  %v4720_v56 = vcombine.high %v4694_v57, %v4702_v1  ;;  %v4736_v17 = vcombine.high %v4710_v60, %v4718_v29 }
 0xc11   : > { %8199 = vmatmul.mubr.msk.f32.vlgmr.msra.gmra.mrb[12].mxu0 %vm1488_vm0, %v5162_v58  ;;  %v4762_v12 = vrot.slane %v4755_v2, %v10769_v52  ;;  %v4770_v7 = vrot.slane %v7865_v38, %v10769_v52  ;;  %v4803_v58 = vcombine.low %v4778_v46, %v4786_v40  ;;  %v4804_v4 = vcombine.high %v4778_v46, %v4786_v40 }
 0xc12   : > { %v4727_v5 = vrot.slane %v4719_v9, %v10787_v59  ;;  %v4743_v6 = vrot.slane %v4735_v49, %v10787_v59  ;;  %v4734_v63 = vrot.slane %v4720_v56, %v10787_v59  ;;  %v4750_v21 = vrot.slane %v4736_v17, %v10787_v59 }
 0xc13   : > { %v4787_v25 = vcombine.low %v4762_v12, %v4770_v7  ;;  %v4811_v16 = vrot.slane %v4803_v58, %v10787_v59  ;;  %v4788_v44 = vcombine.high %v4762_v12, %v4770_v7  ;;  %v4818_v30 = vrot.slane %v4804_v4, %v10787_v59 }
 0xc14   : > { %v4751_v20 = vcombine.low %v4727_v5, %v4743_v6  ;;  %v4752_v15 = vcombine.high %v4727_v5, %v4743_v6  ;;  %v4753_v37 = vcombine.low %v4734_v63, %v4750_v21  ;;  %v4754_v41 = vcombine.high %v4734_v63, %v4750_v21 }
 0xc15   : > { %v4795_v11 = vrot.slane %v4787_v25, %v10787_v59  ;;  %v4802_v28 = vrot.slane %v4788_v44, %v10787_v59 }
 0xc17   : > { %v4819_v22 = vcombine.low %v4795_v11, %v4811_v16  ;;  %v4820_v26 = vcombine.high %v4795_v11, %v4811_v16  ;;  %v4821_v43 = vcombine.low %v4802_v28, %v4818_v30  ;;  %v4822_v51 = vcombine.high %v4802_v28, %v4818_v30 }
 0xc19   : > { %v8330_v34 = vpack.c.bf16 %v4819_v22, %v4751_v20  ;;  %v8336_v32 = vpack.c.bf16 %v4820_v26, %v4752_v15  ;;  %v11410_v24 = vpack.c.bf16 %v4821_v43, %v4753_v37  ;;  %v11412_v13 = vpack.c.bf16 %v4822_v51, %v4754_v41 }
 0xc1b   : > { %8332 = vmatprep.subr.msk.bf16.mxu1 %vm11398_vm6, %v8330_v34  ;;  %8338 = vmatprep.subr.msk.bf16.mxu0 %vm11398_vm6, %v8336_v32 }
 0xc1c   : > { %8335 = vmatpush3.bf16.xpose.msk.msra.mxu1 %vm11398_vm6, %v8330_v34  ;;  %8341 = vmatpush3.bf16.xpose.msk.msra.mxu0 %vm11398_vm6, %v8336_v32 }
 0xc1d   : > { %8344 = vmatprep.subr.msk.bf16.mxu1 %vm11398_vm6, %v11410_v24  ;;  %8350 = vmatprep.subr.msk.bf16.mxu0 %vm11398_vm6, %v11412_v13 }
 0xce4   : > { %v8200_v54 = vpop.f32.mrb[12].mxu0 }
 0xce5   : > { %v5252_v35 = vadd.f32 %v8200_v54, %v7873_v39  ;;  %v5246_v45 = vpop.f32.mrb[13].mxu0 }
 0xce6   : > { %v5247_v47 = vadd.f32 %v7873_v39, %v5246_v45 }
 0xce7   : > { %5259 = vrot.lane.b32.xlu1 %v5252_v35, %s9964_s3 }
 0xce8   : > { %5257 = vrot.lane.b32.xlu0 %v5247_v47, %s9964_s3 }
 0xceb   : > { %5263 = vrot.lane.b32.xlu1 %v5247_v47, %s9965_s14 }
 0xcec   : > { %5269 = vrot.lane.b32.xlu0 %v5247_v47, %s9966_s8 }
 0xcef   : > { %5271 = vrot.lane.b32.xlu1 %v5252_v35, %s9966_s8  ;;  %s6992_s8 = scalar_lea.sflag [#allocation46], %s10669_s9 }
 0xcf0   : > { %5265 = vrot.lane.b32.xlu0 %v5252_v35, %s9965_s14  ;;  %s7067_s14 = sshll.u32 %s11185_s26, 4  ;;  %s11678_s14 = int_to_ptr.vmem [resolvable:$true] %s7067_s14 }
 0xcf1   : > { %s9577_s24 = scalar_lea.vmem %s11678_s14, 512 }
 0xcf2   : > { %p9578_p13 = scmp.ne.s32.totalorder %s11678_s14, %s9577_s24 }
 0xcf4   : > { %p9579_p3 = pnand %p9578_p13, %p12131_p2 }
 0xcf6   : > { %p9580_p12 = pneg %p9579_p3 }
 0xd59   : > { %v5260_v42 = vpop.permute.xlu1 %5259 }
 0xd5a   : > { %v5258_v61 = vpop.permute.xlu0 %5257 }
 0xd5d   : > { %v5264_v48 = vpop.permute.xlu1 %5263 }
 0xd5e   : > { %v5275_v27 = vcombine.low %v5247_v47, %v5264_v48  ;;  %v5276_v55 = vcombine.high %v5247_v47, %v5264_v48  ;;  %v5270_v53 = vpop.permute.xlu0 %5269 }
 0xd5f   : > { %v5291_v2 = vcombine.low %v5258_v61, %v5270_v53  ;;  %v5292_v38 = vcombine.high %v5258_v61, %v5270_v53 }
 0xd60   : > { %v5283_v18 = vrot.slane %v5275_v27, %v10769_v52  ;;  %v5290_v23 = vrot.slane %v5276_v55, %v10769_v52 }
 0xd61   : > { %v5299_v57 = vrot.slane %v5291_v2, %v10769_v52  ;;  %v5306_v1 = vrot.slane %v5292_v38, %v10769_v52  ;;  %v5272_v60 = vpop.permute.xlu1 %5271 }
 0xd62   : > { %v5359_v29 = vcombine.low %v5260_v42, %v5272_v60  ;;  %v5360_v12 = vcombine.high %v5260_v42, %v5272_v60  ;;  %v5266_v7 = vpop.permute.xlu0 %5265 }
 0xd63   : > { %v5307_v46 = vcombine.low %v5283_v18, %v5299_v57  ;;  %v5308_v40 = vcombine.high %v5283_v18, %v5299_v57  ;;  %v5323_v9 = vcombine.low %v5290_v23, %v5306_v1  ;;  %v5324_v49 = vcombine.high %v5290_v23, %v5306_v1 }
 0xd64   : > { %v5367_v25 = vrot.slane %v5359_v29, %v10769_v52  ;;  %v5374_v58 = vrot.slane %v5360_v12, %v10769_v52  ;;  %v5343_v5 = vcombine.low %v5252_v35, %v5266_v7  ;;  %v5344_v6 = vcombine.high %v5252_v35, %v5266_v7 }
 0xd65   : > { %v5315_v11 = vrot.slane %v5307_v46, %v10787_v59  ;;  %v5322_v16 = vrot.slane %v5308_v40, %v10787_v59  ;;  %v5331_v56 = vrot.slane %v5323_v9, %v10787_v59  ;;  %v5338_v17 = vrot.slane %v5324_v49, %v10787_v59 }
 0xd66   : > { %v5351_v44 = vrot.slane %v5343_v5, %v10769_v52  ;;  %v5358_v4 = vrot.slane %v5344_v6, %v10769_v52 }
 0xd67   : > { %v5411_v20 = vcombine.low %v5315_v11, %v5322_v16  ;;  %v7876_v22 = vcombine.high %v5315_v11, %v5322_v16  ;;  %v5427_v15 = vcombine.low %v5331_v56, %v5338_v17  ;;  %v7877_v26 = vcombine.high %v5331_v56, %v5338_v17 }
 0xd68   : > { %v5375_v63 = vcombine.low %v5351_v44, %v5367_v25  ;;  %v5376_v21 = vcombine.high %v5351_v44, %v5367_v25  ;;  %v5391_v28 = vcombine.low %v5358_v4, %v5374_v58  ;;  %v5392_v30 = vcombine.high %v5358_v4, %v5374_v58 }
 0xd69   : > { %v5418_v34 = vrot.slane %v5411_v20, %v10769_v52  ;;  %v5426_v32 = vrot.slane %v7876_v22, %v10769_v52  ;;  %v5434_v37 = vrot.slane %v5427_v15, %v10769_v52  ;;  %v5442_v43 = vrot.slane %v7877_v26, %v10769_v52 }
 0xd6a   : > { %v5383_v41 = vrot.slane %v5375_v63, %v10787_v59  ;;  %v5390_v51 = vrot.slane %v5376_v21, %v10787_v59  ;;  %v5399_v39 = vrot.slane %v5391_v28, %v10787_v59  ;;  %v5406_v54 = vrot.slane %v5392_v30, %v10787_v59  ;;  %v1482_v30 = vld [vmem:[%s1260_s18] sm:$0xff]  ;;  %s11671_s18 = sshll.u32 %s10174_s11, 9 }
 0xd6b   : > { %v5443_v35 = vcombine.low %v5418_v34, %v5426_v32  ;;  %v5459_v45 = vcombine.low %v5434_v37, %v5442_v43  ;;  %v5444_v47 = vcombine.high %v5418_v34, %v5426_v32  ;;  %v5460_v42 = vcombine.high %v5434_v37, %v5442_v43  ;;  %s11675_s3 = scalar_lea.hbm %s12130_s13, %s11671_s18 }
 0xd6c   : > { %v5479_v61 = vcombine.low %v5383_v41, %v5390_v51  ;;  %v7878_v48 = vcombine.high %v5383_v41, %v5390_v51  ;;  %v5495_v27 = vcombine.low %v5399_v39, %v5406_v54  ;;  %v7879_v55 = vcombine.high %v5399_v39, %v5406_v54 }
 0xd6d   : > { %v5451_v53 = vrot.slane %v5443_v35, %v10787_v59  ;;  %v5467_v2 = vrot.slane %v5459_v45, %v10787_v59  ;;  %v5458_v7 = vrot.slane %v5444_v47, %v10787_v59  ;;  %v5474_v46 = vrot.slane %v5460_v42, %v10787_v59 }
 0xd6e   : > { %v5486_v38 = vrot.slane %v5479_v61, %v10769_v52  ;;  %v5494_v18 = vrot.slane %v7878_v48, %v10769_v52  ;;  %v5502_v23 = vrot.slane %v5495_v27, %v10769_v52  ;;  %v5510_v57 = vrot.slane %v7879_v55, %v10769_v52 }
 0xd6f   : > { %v5475_v1 = vcombine.low %v5451_v53, %v5467_v2  ;;  %v5476_v60 = vcombine.high %v5451_v53, %v5467_v2  ;;  %v5477_v16 = vcombine.low %v5458_v7, %v5474_v46  ;;  %v5478_v56 = vcombine.high %v5458_v7, %v5474_v46 }
 0xd70   : > { %v5511_v29 = vcombine.low %v5486_v38, %v5494_v18  ;;  %v5527_v12 = vcombine.low %v5502_v23, %v5510_v57  ;;  %v5512_v49 = vcombine.high %v5486_v38, %v5494_v18  ;;  %v5528_v25 = vcombine.high %v5502_v23, %v5510_v57 }
 0xd71   : > { %v5547_v40 = vmul.f32 0.35355338, %v5475_v1  ;;  %v5549_v9 = vmul.f32 0.35355338, %v5476_v60  ;;  %v5551_v22 = vmul.f32 0.35355338, %v5477_v16 }
 0xd72   : > { %v5519_v58 = vrot.slane %v5511_v29, %v10787_v59  ;;  %v5535_v5 = vrot.slane %v5527_v12, %v10787_v59  ;;  %v5526_v4 = vrot.slane %v5512_v49, %v10787_v59  ;;  %v5542_v20 = vrot.slane %v5528_v25, %v10787_v59 }
 0xd73   : > { %8205 = vmatprep.mubr.msk.f32.mxu1 %vm2516_vm1, %v5547_v40  ;;  %8212 = vmatprep.mubr.msk.f32.mxu0 %vm2516_vm1, %v5549_v9  ;;  %v5553_v15 = vmul.f32 0.35355338, %v5478_v56  ;;  %vm1485_vm7 = vcmp.gt.f32.partialorder %v1482_v30, 0.0 }
 0xd74   : > { %v5543_v6 = vcombine.low %v5519_v58, %v5535_v5  ;;  %v5544_v11 = vcombine.high %v5519_v58, %v5535_v5  ;;  %v5545_v26 = vcombine.low %v5526_v4, %v5542_v20  ;;  %v5546_v63 = vcombine.high %v5526_v4, %v5542_v20 }
 0xd76   : > { %v5548_v17 = vmul.f32 0.35355338, %v5543_v6  ;;  %v5550_v44 = vmul.f32 0.35355338, %v5544_v11  ;;  %v5552_v21 = vmul.f32 0.35355338, %v5545_v26 }
 0xd77   : > { %v5554_v28 = vmul.f32 0.35355338, %v5546_v63 }
 0xd78   : > { %8206 = vmatmul.mubr.msk.f32.vlgmr.msra.gmra.mrb[18].mxu1 %vm2516_vm1, %v5548_v17  ;;  %8213 = vmatmul.mubr.msk.f32.vlgmr.msra.gmra.mrb[14].mxu0 %vm2516_vm1, %v5550_v44 }
 0xd79   : > { %8347 = vmatpush3.bf16.xpose.msk.msra.mxu1 %vm11398_vm6, %v11410_v24  ;;  %8353 = vmatpush3.bf16.xpose.msk.msra.mxu0 %vm11398_vm6, %v11412_v13 }
 0xd7a   : > { %8219 = vmatprep.mubr.msk.f32.mxu1 %vm2516_vm1, %v5551_v22  ;;  %8226 = vmatprep.mubr.msk.f32.mxu0 %vm2516_vm1, %v5553_v15 }
 0xd80   : > { %8220 = vmatmul.mubr.msk.f32.vlgmr.msra.gmra.mrb[20].mxu1 %vm2516_vm1, %v5552_v21  ;;  %8227 = vmatmul.mubr.msk.f32.vlgmr.msra.gmra.mrb[16].mxu0 %vm2516_vm1, %v5554_v28 }
 0xe4b   : > { %v8207_v24 = vpop.f32.mrb[18].mxu1  ;;  %v8214_v34 = vpop.f32.mrb[14].mxu0 }
 0xe4c   : > { %v5906_v36 = vsel %vm1485_vm7, %v8207_v24, -3.4028235e+38  ;;  %v5908_v13 = vsel %vm1485_vm7, %v8214_v34, -3.4028235e+38  ;;  %v5633_v32 = vpop.f32.mrb[19].mxu1  ;;  %v5720_v37 = vpop.f32.mrb[15].mxu0 }
 0xe4d   : > { %v5922_v43 = vsel %vm4339_vm4, %v5908_v13, -inf  ;;  %v5916_v41 = vsel %vm4339_vm4, %v5906_v36, -inf  ;;  %v5905_v51 = vsel %vm1485_vm7, %v5633_v32, -3.4028235e+38  ;;  %v5907_v54 = vsel %vm1485_vm7, %v5720_v37, -3.4028235e+38 }
 0xe4e   : > { %5923 = vmax.xlane.f32.xlu0 %v5922_v43  ;;  %5917 = vmax.xlane.f32.xlu1 %v5916_v41  ;;  %v5913_v39 = vsel %vm4339_vm4, %v5905_v51, -inf  ;;  %v5919_v48 = vsel %vm4339_vm4, %v5907_v54, -inf }
 0xe52   : > { %5914 = vmax.xlane.f32.xlu0 %v5913_v39 }
 0xe53   : > { %v8228_v35 = vpop.f32.mrb[16].mxu0  ;;  %v8221_v45 = vpop.f32.mrb[20].mxu1 }
 0xe54   : > { %v5807_v47 = vpop.f32.mrb[21].mxu1  ;;  %v5894_v42 = vpop.f32.mrb[17].mxu0  ;;  %v5912_v53 = vsel %vm1485_vm7, %v8228_v35, -3.4028235e+38  ;;  %v5910_v38 = vsel %vm1485_vm7, %v8221_v45, -3.4028235e+38 }
 0xe55   : > { %v5911_v61 = vsel %vm1485_vm7, %v5894_v42, -3.4028235e+38  ;;  %v5909_v27 = vsel %vm1485_vm7, %v5807_v47, -3.4028235e+38  ;;  %v5934_v18 = vsel %vm4339_vm4, %v5912_v53, -inf  ;;  %v5928_v23 = vsel %vm4339_vm4, %v5910_v38, -inf }
 0xe56   : > { %v5931_v55 = vsel %vm4339_vm4, %v5911_v61, -inf  ;;  %5920 = vmax.xlane.f32.xlu0 %v5919_v48  ;;  %v5925_v2 = vsel %vm4339_vm4, %v5909_v27, -inf }
 0xe57   : > { %5932 = vmax.xlane.f32.xlu1 %v5931_v55 }
 0xe5a   : > { %5926 = vmax.xlane.f32.xlu0 %v5925_v2 }
 0xe5b   : > { %5935 = vmax.xlane.f32.xlu1 %v5934_v18 }
 0xe5e   : > { %5929 = vmax.xlane.f32.xlu0 %v5928_v23 }
 0xe6c   : > { %4825 = vrot.lane.b32.xlu1 %v11318_v14, %s9970_s1 }
 0xe70   : > { %4827 = vrot.lane.b32.xlu1 %v11338_v31, %s9970_s1 }
 0xe74   : > { %4829 = vrot.lane.b32.xlu1 %v11336_v33, %s9970_s1  ;;  %4823 = vrot.lane.b32.xlu0 %v11320_v50, %s9970_s1 }
 0xe78   : > { %4833 = vrot.lane.b32.xlu1 %v11344_v10, %s9970_s1  ;;  %4831 = vrot.lane.b32.xlu0 %v11340_v8, %s9970_s1 }
 0xe7c   : > { %4837 = vrot.lane.b32.xlu1 %v11358_v62, %s9970_s1  ;;  %4835 = vrot.lane.b32.xlu0 %v11342_v0, %s9970_s1  ;;  %s9974_s1 = smov [#allocation45]  }
 0xe7d   : > { %s9581_s20 = sshll.u32 %s9974_s1, 4  ;;  %s9582_s20 = int_to_ptr.vmem [resolvable:$false] %s9581_s20 }
 0xe7e   : > { %p9584_p8 = scmp.lt.s32.totalorder %s11678_s14, %s9582_s20 }
 0xedb   : > { %v5924_v14 = vpop.xlane.xlu0 %5923  ;;  %v5918_v31 = vpop.xlane.xlu1 %5917 }
 0xedc   : > { %v5940_v57 = vsub.f32 %v5908_v13, %v5924_v14  ;;  %v5938_v1 = vsub.f32 %v5906_v36, %v5918_v31 }
 0xede   : > { %v5947_v33 = vmul.f32 1.442695, %v5938_v1  ;;  %v5951_v60 = vmul.f32 1.442695, %v5940_v57 }
 0xedf   : > { %v5915_v29 = vpop.xlane.xlu0 %5914 }
 0xee0   : > { %v5937_v50 = vsub.f32 %v5905_v51, %v5915_v29  ;;  %8829 = vpow2.f32 %v5947_v33 }
 0xee1   : > { %8831 = vpow2.f32 %v5951_v60 }
 0xee2   : > { %v5945_v12 = vmul.f32 1.442695, %v5937_v50 }
 0xee3   : > { %v5921_v10 = vpop.xlane.xlu0 %5920 }
 0xee4   : > { %8833 = vpow2.f32 %v5945_v12  ;;  %v5933_v8 = vpop.xlane.xlu1 %5932  ;;  %v5939_v7 = vsub.f32 %v5907_v54, %v5921_v10 }
 0xee5   : > { %v5943_v46 = vsub.f32 %v5911_v61, %v5933_v8 }
 0xee6   : > { %v5949_v62 = vmul.f32 1.442695, %v5939_v7 }
 0xee7   : > { %v5927_v40 = vpop.xlane.xlu0 %5926  ;;  %v5957_v25 = vmul.f32 1.442695, %v5943_v46 }
 0xee8   : > { %8835 = vpow2.f32 %v5949_v62  ;;  %v5936_v0 = vpop.xlane.xlu1 %5935  ;;  %v5941_v9 = vsub.f32 %v5909_v27, %v5927_v40 }
 0xee9   : > { %v5944_v49 = vsub.f32 %v5912_v53, %v5936_v0 }
 0xeea   : > { %v5953_v58 = vmul.f32 1.442695, %v5941_v9  ;;  %v11506_v5 = vpop.eup %8829 }
 0xeeb   : > { %v5959_v6 = vmul.f32 1.442695, %v5944_v49  ;;  %v5930_v11 = vpop.xlane.xlu0 %5929  ;;  %v5964_v17 = vsel %vm4339_vm4, %v11506_v5, 0.0  ;;  %v11510_v44 = vpop.eup %8831 }
 0xeec   : > { %8837 = vpow2.f32 %v5953_v58  ;;  %v4826_v16 = vpop.permute.xlu1 %4825  ;;  %v5942_v56 = vsub.f32 %v5910_v38, %v5930_v11  ;;  %5965 = vadd.xlane.f32.xlu1 %v5964_v17  ;;  %v5970_v63 = vsel %vm4339_vm4, %v11510_v44, 0.0 }
 0xeed   : > { %8839 = vpow2.f32 %v5959_v6 }
 0xeee   : > { %v11512_v4 = vpop.eup %8833  ;;  %8841 = vpow2.f32 %v5957_v25  ;;  %v5955_v20 = vmul.f32 1.442695, %v5942_v56 }
 0xeef   : > { %v4824_v22 = vpop.permute.xlu0 %4823  ;;  %v5961_v15 = vsel %vm4339_vm4, %v11512_v4, 0.0 }
 0xef0   : > { %v4828_v26 = vpop.permute.xlu1 %4827  ;;  %5962 = vadd.xlane.f32.xlu0 %v5961_v15  ;;  %5971 = vadd.xlane.f32.xlu1 %v5970_v63  ;;  %8843 = vpow2.f32 %v5955_v20 }
 0xef2   : > { %v11518_v21 = vpop.eup %8835 }
 0xef3   : > { %v4832_v28 = vpop.permute.xlu0 %4831  ;;  %v5967_v30 = vsel %vm4339_vm4, %v11518_v21, 0.0 }
 0xef4   : > { %v4830_v24 = vpop.permute.xlu1 %4829  ;;  %5968 = vadd.xlane.f32.xlu0 %v5967_v30  ;;  %v4847_v36 = vcombine.low %v4824_v22, %v4832_v28  ;;  %v4848_v13 = vcombine.high %v4824_v22, %v4832_v28 }
 0xef6   : > { %v11522_v34 = vpop.eup %8837  ;;  %v4855_v47 = vrot.slane %v4847_v36, %v10769_v52  ;;  %v4862_v42 = vrot.slane %v4848_v13, %v10769_v52 }
 0xef7   : > { %v11524_v32 = vpop.eup %8839  ;;  %v4836_v37 = vpop.permute.xlu0 %4835  ;;  %v5973_v43 = vsel %vm4339_vm4, %v11522_v34, 0.0 }
 0xef8   : > { %v11528_v41 = vpop.eup %8841  ;;  %v4834_v51 = vpop.permute.xlu1 %4833  ;;  %v4863_v39 = vcombine.low %v4828_v26, %v4836_v37  ;;  %v4864_v54 = vcombine.high %v4828_v26, %v4836_v37  ;;  %v5982_v35 = vsel %vm4339_vm4, %v11524_v32, 0.0  ;;  %5974 = vadd.xlane.f32.xlu0 %v5973_v43 }
 0xef9   : > { %v4915_v45 = vcombine.low %v4826_v16, %v4834_v51  ;;  %5983 = vadd.xlane.f32.xlu1 %v5982_v35  ;;  %v4916_v27 = vcombine.high %v4826_v16, %v4834_v51  ;;  %v5979_v55 = vsel %vm4339_vm4, %v11528_v41, 0.0 }
 0xefa   : > { %v4871_v61 = vrot.slane %v4863_v39, %v10769_v52  ;;  %v4878_v48 = vrot.slane %v4864_v54, %v10769_v52  ;;  %v11538_v53 = vpop.eup %8843 }
 0xefb   : > { %v4923_v31 = vrot.slane %v4915_v45, %v10769_v52  ;;  %v4930_v12 = vrot.slane %v4916_v27, %v10769_v52  ;;  %v5976_v7 = vsel %vm4339_vm4, %v11538_v53, 0.0 }
 0xefc   : > { %v4879_v2 = vcombine.low %v4855_v47, %v4871_v61  ;;  %v4880_v38 = vcombine.high %v4855_v47, %v4871_v61  ;;  %v4895_v18 = vcombine.low %v4862_v42, %v4878_v48  ;;  %v4896_v23 = vcombine.high %v4862_v42, %v4878_v48  ;;  %v4838_v14 = vpop.permute.xlu1 %4837  ;;  %5980 = vadd.xlane.f32.xlu0 %v5979_v55 }
 0xefd   : > { %v4931_v57 = vcombine.low %v4830_v24, %v4838_v14  ;;  %v4932_v1 = vcombine.high %v4830_v24, %v4838_v14 }
 0xefe   : > { %v4887_v33 = vrot.slane %v4879_v2, %v10787_v59  ;;  %v4894_v60 = vrot.slane %v4880_v38, %v10787_v59  ;;  %v4903_v29 = vrot.slane %v4895_v18, %v10787_v59  ;;  %v4910_v50 = vrot.slane %v4896_v23, %v10787_v59 }
 0xeff   : > { %v4939_v10 = vrot.slane %v4931_v57, %v10769_v52  ;;  %v4946_v8 = vrot.slane %v4932_v1, %v10769_v52 }
 0xf00   : > { %v4983_v46 = vcombine.low %v4887_v33, %v4894_v60  ;;  %v7867_v62 = vcombine.high %v4887_v33, %v4894_v60  ;;  %v4999_v40 = vcombine.low %v4903_v29, %v4910_v50  ;;  %v7868_v0 = vcombine.high %v4903_v29, %v4910_v50  ;;  %5977 = vadd.xlane.f32.xlu0 %v5976_v7 }
 0xf01   : > { %v4947_v9 = vcombine.low %v4923_v31, %v4939_v10  ;;  %v4948_v49 = vcombine.high %v4923_v31, %v4939_v10  ;;  %v4963_v25 = vcombine.low %v4930_v12, %v4946_v8  ;;  %v4964_v58 = vcombine.high %v4930_v12, %v4946_v8 }
 0xf02   : > { %v4990_v6 = vrot.slane %v4983_v46, %v10769_v52  ;;  %v4998_v11 = vrot.slane %v7867_v62, %v10769_v52  ;;  %v5006_v16 = vrot.slane %v4999_v40, %v10769_v52  ;;  %v5014_v56 = vrot.slane %v7868_v0, %v10769_v52 }
 0xf03   : > { %v4955_v17 = vrot.slane %v4947_v9, %v10787_v59  ;;  %v4962_v20 = vrot.slane %v4948_v49, %v10787_v59  ;;  %v4971_v22 = vrot.slane %v4963_v25, %v10787_v59  ;;  %v4978_v15 = vrot.slane %v4964_v58, %v10787_v59 }
 0xf04   : > { %v5015_v26 = vcombine.low %v4990_v6, %v4998_v11  ;;  %v5031_v63 = vcombine.low %v5006_v16, %v5014_v56  ;;  %v5016_v28 = vcombine.high %v4990_v6, %v4998_v11  ;;  %v5032_v30 = vcombine.high %v5006_v16, %v5014_v56 }
 0xf05   : > { %v5051_v24 = vcombine.low %v4955_v17, %v4962_v20  ;;  %v7869_v36 = vcombine.high %v4955_v17, %v4962_v20  ;;  %v5067_v13 = vcombine.low %v4971_v22, %v4978_v15  ;;  %v7870_v37 = vcombine.high %v4971_v22, %v4978_v15 }
 0xf06   : > { %v5030_v43 = vrot.slane %v5016_v28, %v10787_v59  ;;  %v5046_v51 = vrot.slane %v5032_v30, %v10787_v59  ;;  %v5023_v47 = vrot.slane %v5015_v26, %v10787_v59  ;;  %v5039_v42 = vrot.slane %v5031_v63, %v10787_v59 }
 0xf07   : > { %v5058_v39 = vrot.slane %v5051_v24, %v10769_v52  ;;  %v5066_v54 = vrot.slane %v7869_v36, %v10769_v52  ;;  %v5074_v35 = vrot.slane %v5067_v13, %v10769_v52  ;;  %v5082_v45 = vrot.slane %v7870_v37, %v10769_v52 }
 0xf08   : > { %v5050_v61 = vcombine.high %v5030_v43, %v5046_v51  ;;  %v5047_v31 = vcombine.low %v5023_v47, %v5039_v42  ;;  %v5049_v57 = vcombine.low %v5030_v43, %v5046_v51  ;;  %v5048_v10 = vcombine.high %v5023_v47, %v5039_v42 }
 0xf09   : > { %v5083_v48 = vcombine.low %v5058_v39, %v5066_v54  ;;  %v5099_v27 = vcombine.low %v5074_v35, %v5082_v45  ;;  %v5084_v55 = vcombine.high %v5058_v39, %v5066_v54  ;;  %v5100_v2 = vcombine.high %v5074_v35, %v5082_v45 }
 0xf0b   : > { %v5091_v38 = vrot.slane %v5083_v48, %v10787_v59  ;;  %v5107_v18 = vrot.slane %v5099_v27, %v10787_v59  ;;  %v5098_v23 = vrot.slane %v5084_v55, %v10787_v59  ;;  %v5114_v14 = vrot.slane %v5100_v2, %v10787_v59 }
 0xf0d   : > { %v5115_v1 = vcombine.low %v5091_v38, %v5107_v18  ;;  %v5117_v33 = vcombine.low %v5098_v23, %v5114_v14  ;;  %v5116_v60 = vcombine.high %v5091_v38, %v5107_v18  ;;  %v5118_v29 = vcombine.high %v5098_v23, %v5114_v14 }
 0xf0f   : > { %v8354_v50 = vpack.c.bf16 %v5115_v1, %v5047_v31  ;;  %v8362_v12 = vpack.c.bf16 %v5117_v33, %v5049_v57  ;;  %v8366_v8 = vpack.c.bf16 %v5118_v29, %v5050_v61  ;;  %v8358_v7 = vpack.c.bf16 %v5116_v60, %v5048_v10 }
 0xf11   : > { %8355 = vmatprep.subr.bf16.mxu1 %v8354_v50  ;;  %8363 = vmatprep.subr.bf16.mxu0 %v8362_v12 }
 0xf12   : > { %8357 = vmatpush3.bf16.msra.mxu1 %v8354_v50  ;;  %8365 = vmatpush3.bf16.msra.mxu0 %v8362_v12 }
 0xf13   : > { %8359 = vmatprep.subr.bf16.mxu1 %v8358_v7 }
 0xf79   : > { %v5966_v46 = vpop.xlane.xlu1 %5965 }
 0xf7a   : > { %8845 = vrcp.f32 %v5966_v46 }
 0xf7d   : > { %v5963_v62 = vpop.xlane.xlu0 %5962  ;;  %v5972_v40 = vpop.xlane.xlu1 %5971 }
 0xf7e   : > { %8847 = vrcp.f32 %v5963_v62 }
 0xf7f   : > { %8849 = vrcp.f32 %v5972_v40 }
 0xf81   : > { %v5969_v0 = vpop.xlane.xlu0 %5968 }
 0xf82   : > { %8851 = vrcp.f32 %v5969_v0 }
 0xf84   : > { %v8846_v9 = vpop.eup %8845 }
 0xf85   : > { %v5975_v49 = vpop.xlane.xlu0 %5974  ;;  %v6002_v25 = vmul.f32 %v8846_v9, %v11506_v5 }
 0xf86   : > { %v5984_v58 = vpop.xlane.xlu1 %5983  ;;  %8853 = vrcp.f32 %v5975_v49 }
 0xf87   : > { %8855 = vrcp.f32 %v5984_v58  ;;  %6013 = vst.msk [vmem:[%s11572_s19] sm:$0xff] %vm4339_vm4, %v6002_v25 }
 0xf88   : > { %v8848_v6 = vpop.eup %8847 }
 0xf89   : > { %v8850_v11 = vpop.eup %8849  ;;  %v5981_v16 = vpop.xlane.xlu0 %5980  ;;  %v6001_v56 = vmul.f32 %v8848_v6, %v11512_v4 }
 0xf8a   : > { %v6004_v17 = vmul.f32 %v8850_v11, %v11510_v44  ;;  %8857 = vrcp.f32 %v5981_v16 }
 0xf8b   : > { %6009 = vst.msk [vmem:[%s11579_s5] sm:$0xff] %vm4339_vm4, %v6001_v56  ;;  %8233 = vmatprep.mubr.msk.f32.mxu1 %vm4339_vm4, %v6001_v56 }
 0xf8c   : > { %v8852_v5 = vpop.eup %8851  ;;  %6014 = vst.msk [vmem:[%s11572_s19 + $0x8] sm:$0xff] %vm4339_vm4, %v6004_v17  ;;  %8234 = vmatmul.mubr.msk.f32.vlgmr.msra.gmra.mrb[22].mxu1 %vm4339_vm4, %v6002_v25 }
 0xf8d   : > { %8361 = vmatpush3.bf16.msra.mxu1 %v8358_v7  ;;  %v5978_v4 = vpop.xlane.xlu0 %5977  ;;  %v6003_v44 = vmul.f32 %v8852_v5, %v11518_v21 }
 0xf8e   : > { %8367 = vmatprep.subr.bf16.mxu1 %v8366_v8  ;;  %8859 = vrcp.f32 %v5978_v4 }
 0xf8f   : > { %6010 = vst.msk [vmem:[%s11579_s5 + $0x8] sm:$0xff] %vm4339_vm4, %v6003_v44  ;;  %8240 = vmatprep.mubr.msk.f32.mxu1 %vm4339_vm4, %v6003_v44 }
 0xf90   : > { %v8854_v20 = vpop.eup %8853  ;;  %8241 = vmatmul.mubr.msk.f32.vlgmr.msra.gmra.mrb[24].mxu1 %vm4339_vm4, %v6004_v17 }
 0xf91   : > { %v8856_v22 = vpop.eup %8855  ;;  %8369 = vmatpush3.bf16.msra.mxu1 %v8366_v8  ;;  %v6005_v15 = vmul.f32 %v8854_v20, %v11522_v34 }
 0xf92   : > { %v6008_v26 = vmul.f32 %v8856_v22, %v11524_v32 }
 0xf93   : > { %6011 = vst.msk [vmem:[%s11579_s5 + $0x10] sm:$0xff] %vm4339_vm4, %v6005_v15  ;;  %8247 = vmatprep.mubr.msk.f32.mxu0 %vm4339_vm4, %v6005_v15 }
 0xf94   : > { %v8858_v21 = vpop.eup %8857  ;;  %6016 = vst.msk [vmem:[%s11572_s19 + $0x18] sm:$0xff] %vm4339_vm4, %v6008_v26 }
 0xf95   : > { %v6007_v63 = vmul.f32 %v8858_v21, %v11528_v41 }
 0xf97   : > { %6012 = vst.msk [vmem:[%s11579_s5 + $0x18] sm:$0xff] %vm4339_vm4, %v6007_v63  ;;  %8254 = vmatprep.mubr.msk.f32.mxu1 %vm4339_vm4, %v6007_v63 }
 0xf98   : > { %v8860_v28 = vpop.eup %8859  ;;  %8255 = vmatmul.mubr.msk.f32.vlgmr.msra.gmra.mrb[26].mxu1 %vm4339_vm4, %v6008_v26 }
 0xf99   : > { %v6006_v34 = vmul.f32 %v8860_v28, %v11538_v53 }
 0xf9b   : > { %6015 = vst.msk [vmem:[%s11572_s19 + $0x10] sm:$0xff] %vm4339_vm4, %v6006_v34  ;;  %8248 = vmatmul.mubr.msk.f32.vlgmr.msra.gmra.mrb[18].mxu0 %vm4339_vm4, %v6006_v34 }
0x105f   : > { %v8235_v32 = vpop.f32.mrb[22].mxu1 }
0x1060   : > { %v6089_v30 = vpop.f32.mrb[23].mxu1 }
0x1063   : > { %v8242_v24 = vpop.f32.mrb[24].mxu1 }
0x1064   : > { %v6170_v36 = vpop.f32.mrb[25].mxu1 }
0x106b   : > { %v8256_v13 = vpop.f32.mrb[26].mxu1 }
0x106c   : > { %v6425_v37 = vcombine.low %v8242_v24, %v8256_v13  ;;  %v6426_v41 = vcombine.high %v8242_v24, %v8256_v13  ;;  %v6332_v43 = vpop.f32.mrb[27].mxu1 }
0x106d   : > { %v6357_v51 = vcombine.low %v6170_v36, %v6332_v43  ;;  %v6358_v39 = vcombine.high %v6170_v36, %v6332_v43 }
0x106e   : > { %v8249_v54 = vpop.f32.mrb[18].mxu0  ;;  %v6433_v61 = vrot.slane %v6425_v37, %v10769_v52  ;;  %v6440_v48 = vrot.slane %v6426_v41, %v10769_v52 }
0x106f   : > { %v6409_v35 = vcombine.low %v8235_v32, %v8249_v54  ;;  %v6410_v45 = vcombine.high %v8235_v32, %v8249_v54  ;;  %v6251_v47 = vpop.f32.mrb[19].mxu0  ;;  %v6365_v2 = vrot.slane %v6357_v51, %v10769_v52  ;;  %v6372_v38 = vrot.slane %v6358_v39, %v10769_v52  ;;  %v6643_v51 = vld [vmem:[#allocation32] sm:$0xff] }
0x1070   : > { %v6341_v42 = vcombine.low %v6089_v30, %v6251_v47  ;;  %v6342_v53 = vcombine.high %v6089_v30, %v6251_v47  ;;  %v6645_v47 = vld [vmem:[#allocation32 + $0x10] sm:$0xff] }
0x1071   : > { %v6417_v27 = vrot.slane %v6409_v35, %v10769_v52  ;;  %v6424_v55 = vrot.slane %v6410_v45, %v10769_v52  ;;  %v6644_v45 = vld [vmem:[#allocation32 + $0x8] sm:$0xff] }
0x1072   : > { %v6349_v18 = vrot.slane %v6341_v42, %v10769_v52  ;;  %v6356_v23 = vrot.slane %v6342_v53, %v10769_v52  ;;  %v6646_v42 = vld [vmem:[#allocation32 + $0x18] sm:$0xff] }
0x1073   : > { %v6441_v14 = vcombine.low %v6417_v27, %v6433_v61  ;;  %v6442_v31 = vcombine.high %v6417_v27, %v6433_v61  ;;  %v6457_v57 = vcombine.low %v6424_v55, %v6440_v48  ;;  %v6458_v1 = vcombine.high %v6424_v55, %v6440_v48 }
0x1074   : > { %v6373_v33 = vcombine.low %v6349_v18, %v6365_v2  ;;  %v6374_v60 = vcombine.high %v6349_v18, %v6365_v2  ;;  %v6389_v29 = vcombine.low %v6356_v23, %v6372_v38  ;;  %v6390_v50 = vcombine.high %v6356_v23, %v6372_v38 }
0x1075   : > { %v6449_v12 = vrot.slane %v6441_v14, %v10787_v59  ;;  %v6456_v10 = vrot.slane %v6442_v31, %v10787_v59  ;;  %v6465_v8 = vrot.slane %v6457_v57, %v10787_v59  ;;  %v6472_v7 = vrot.slane %v6458_v1, %v10787_v59 }
0x1076   : > { %v6381_v46 = vrot.slane %v6373_v33, %v10787_v59  ;;  %v6388_v62 = vrot.slane %v6374_v60, %v10787_v59  ;;  %v6397_v40 = vrot.slane %v6389_v29, %v10787_v59  ;;  %v6404_v0 = vrot.slane %v6390_v50, %v10787_v59 }
0x1077   : > { %v6545_v9 = vcombine.low %v6449_v12, %v6456_v10  ;;  %v7906_v49 = vcombine.high %v6449_v12, %v6456_v10  ;;  %v6561_v25 = vcombine.low %v6465_v8, %v6472_v7  ;;  %v7907_v58 = vcombine.high %v6465_v8, %v6472_v7 }
0x1078   : > { %v6477_v6 = vcombine.low %v6381_v46, %v6388_v62  ;;  %v7904_v11 = vcombine.high %v6381_v46, %v6388_v62  ;;  %v6493_v16 = vcombine.low %v6397_v40, %v6404_v0  ;;  %v7905_v56 = vcombine.high %v6397_v40, %v6404_v0  ;;  %v7908_v46 = vld [vmem:[#allocation34] ss:$0 sm:$0xff] }
0x1079   : > { %v6552_v17 = vrot.slane %v6545_v9, %v10769_v52  ;;  %v6560_v5 = vrot.slane %v7906_v49, %v10769_v52  ;;  %v6568_v4 = vrot.slane %v6561_v25, %v10769_v52  ;;  %v6576_v44 = vrot.slane %v7907_v58, %v10769_v52 }
0x107a   : > { %v6484_v20 = vrot.slane %v6477_v6, %v10769_v52  ;;  %v6492_v22 = vrot.slane %v7904_v11, %v10769_v52  ;;  %v6500_v15 = vrot.slane %v6493_v16, %v10769_v52  ;;  %v6508_v26 = vrot.slane %v7905_v56, %v10769_v52 }
0x107b   : > { %v6577_v21 = vcombine.low %v6552_v17, %v6560_v5  ;;  %v6593_v63 = vcombine.low %v6568_v4, %v6576_v44  ;;  %v6578_v28 = vcombine.high %v6552_v17, %v6560_v5  ;;  %v6594_v34 = vcombine.high %v6568_v4, %v6576_v44 }
0x107c   : > { %v6509_v32 = vcombine.low %v6484_v20, %v6492_v22  ;;  %v6525_v30 = vcombine.low %v6500_v15, %v6508_v26  ;;  %v6510_v24 = vcombine.high %v6484_v20, %v6492_v22  ;;  %v6526_v36 = vcombine.high %v6500_v15, %v6508_v26  ;;  %v6781_v22 = vld [vmem:[#allocation35] sm:$0xff]  ;;  %v6782_v15 = vld [vmem:[#allocation35 + $0x8] sm:$0xff] }
0x107d   : > { %v6585_v13 = vrot.slane %v6577_v21, %v10787_v59  ;;  %v6601_v37 = vrot.slane %v6593_v63, %v10787_v59  ;;  %v6592_v41 = vrot.slane %v6578_v28, %v10787_v59  ;;  %v6608_v43 = vrot.slane %v6594_v34, %v10787_v59  ;;  %v6783_v21 = vld [vmem:[#allocation35 + $0x10] sm:$0xff]  ;;  %v6784_v63 = vld [vmem:[#allocation35 + $0x18] sm:$0xff]  ;;  %v6875_v34 = vld [vmem:[#allocation38] sm:$0xff] }
0x107e   : > { %v6517_v39 = vrot.slane %v6509_v32, %v10787_v59  ;;  %v6533_v52 = vrot.slane %v6525_v30, %v10787_v59  ;;  %v6524_v54 = vrot.slane %v6510_v24, %v10787_v59  ;;  %v6540_v35 = vrot.slane %v6526_v36, %v10787_v59  ;;  %v6876_v32 = vld [vmem:[#allocation38 + $0x8] sm:$0xff]  ;;  %v6877_v30 = vld [vmem:[#allocation38 + $0x10] sm:$0xff]  ;;  %v6878_v36 = vld [vmem:[#allocation38 + $0x18] sm:$0xff] }
0x107f   : > { %v6610_v53 = vcombine.high %v6585_v13, %v6601_v37  ;;  %v6611_v61 = vcombine.low %v6592_v41, %v6608_v43  ;;  %v6612_v48 = vcombine.high %v6592_v41, %v6608_v43  ;;  %v6609_v27 = vcombine.low %v6585_v13, %v6601_v37  ;;  %v6879_v37 = vld [vmem:[#allocation38 + $0x20] sm:$0xff]  ;;  %v6880_v41 = vld [vmem:[#allocation38 + $0x28] sm:$0xff] }
0x1080   : > { %v6542_v55 = vcombine.high %v6517_v39, %v6533_v52  ;;  %v6544_v2 = vcombine.high %v6524_v54, %v6540_v35  ;;  %v6543_v38 = vcombine.low %v6524_v54, %v6540_v35  ;;  %v6541_v18 = vcombine.low %v6517_v39, %v6533_v52 }
0x1081   : > { %6617 = vrot.lane.b32.xlu1 %v6610_v53, %s12022_s23  ;;  %v8370_v23 = vpack.c.bf16 %v6644_v45, %v6643_v51  ;;  %v8374_v14 = vpack.c.bf16 %v6646_v42, %v6645_v47  ;;  %v8378_v26 = vpack.c.bf16 %v6782_v15, %v6781_v22  ;;  %v8382_v28 = vpack.c.bf16 %v6784_v63, %v6783_v21  ;;  %v7911_v42 = vld [vmem:[#allocation17] ss:$0 sm:$0xff] }
0x1082   : > { %6615 = vrot.lane.b32.xlu0 %v6542_v55, %s12022_s23  ;;  %v8386_v24 = vpack.c.bf16 %v6876_v32, %v6875_v34  ;;  %v8390_v13 = vpack.c.bf16 %v6878_v36, %v6877_v30  ;;  %v8394_v43 = vpack.c.bf16 %v6880_v41, %v6879_v37 }
0x1083   : > { %8371 = vmatprep.subr.bf16.mxu0 %v8370_v23  ;;  %8379 = vmatprep.subr.bf16.mxu1 %v8378_v26 }
0x1084   : > { %8373 = vmatpush3.bf16.msra.mxu0 %v8370_v23  ;;  %8381 = vmatpush3.bf16.msra.mxu1 %v8378_v26  ;;  %v6881_v23 = vld [vmem:[#allocation38 + $0x30] sm:$0xff] }
0x1085   : > { %6625 = vrot.lane.b32.xlu1 %v6611_v61, %s9972_s6  ;;  %8375 = vmatprep.subr.bf16.mxu0 %v8374_v14  ;;  %v7912_v61 = vld [vmem:[#allocation19] ss:$0 sm:$0xff] }
0x1086   : > { %6631 = vrot.lane.b32.xlu0 %v6544_v2, %s9973_s4  ;;  %8383 = vmatprep.subr.bf16.mxu1 %v8382_v28 }
0x1088   : > { %8377 = vmatpush3.bf16.msra.mxu0 %v8374_v14  ;;  %8385 = vmatpush3.bf16.msra.mxu1 %v8382_v28  ;;  %v6882_v14 = vld [vmem:[#allocation38 + $0x38] sm:$0xff] }
0x1089   : > { %6623 = vrot.lane.b32.xlu1 %v6543_v38, %s9972_s6  ;;  %8387 = vmatprep.subr.bf16.mxu0 %v8386_v24  ;;  %s9583_s6 = scalar_lea.vmem %s9582_s20, 1024 }
0x108a   : > { %p9585_p9 = scmp.lt.s32.totalorder %s9583_s6, %s9577_s24 }
0x108c   : > { %p9586_p6 = por %p9585_p9, %p9584_p8 }
0x108d   : > { %6633 = vrot.lane.b32.xlu1 %v6612_v48, %s9973_s4 }
0x108e   : > { %p9587_p0 = pnand %p9586_p6, %p9580_p12 }
0x10f3   : > { %v6618_v59 = vpop.permute.xlu1 %6617 }
0x10f4   : > { %v6616_v31 = vpop.permute.xlu0 %6615  ;;  %v6638_v12 = vsel %vm2516_vm1, %v6609_v27, %v6618_v59  ;;  %v8398_v59 = vpack.c.bf16 %v6882_v14, %v6881_v23 }
0x10f5   : > { %v6637_v1 = vsel %vm2516_vm1, %v6541_v18, %v6616_v31  ;;  %v7913_v31 = vld [vmem:[#allocation37] ss:$0 sm:$0xff] }
0x10f7   : > { %v6626_v57 = vpop.permute.xlu1 %6625 }
0x10f8   : > { %v6632_v60 = vpop.permute.xlu0 %6631  ;;  %v6640_v10 = vsel %vm4339_vm4, %v6638_v12, %v6626_v57 }
0x10fb   : > { %v6624_v33 = vpop.permute.xlu1 %6623 }
0x10fc   : > { %v6639_v29 = vsel %vm4339_vm4, %v6637_v1, %v6624_v33 }
0x10fd   : > { %v6641_v50 = vsel %vm4342_vm5, %v6639_v29, %v6632_v60 }
0x10fe   : > { %8265 = vmatprep.mubr.msk.f32.mxu0 %vm1488_vm0, %v6641_v50 }
0x10ff   : > { %v6634_v8 = vpop.permute.xlu1 %6633 }
0x1100   : > { %v6642_v7 = vsel %vm4342_vm5, %v6640_v10, %v6634_v8 }
0x1101   : > { %8266 = vmatmul.mubr.msk.f32.vlgmr.msra.gmra.mrb[20].mxu0 %vm1488_vm0, %v6642_v7 }
0x1102   : > { %8389 = vmatpush3.bf16.msra.mxu0 %v8386_v24 }
0x1103   : > { %8391 = vmatprep.subr.bf16.mxu0 %v8390_v13 }
0x1106   : > { %8393 = vmatpush3.bf16.msra.mxu0 %v8390_v13 }
0x1107   : > { %8395 = vmatprep.subr.bf16.mxu0 %v8394_v43 }
0x110a   : > { %8397 = vmatpush3.bf16.msra.mxu0 %v8394_v43 }
0x110b   : > { %8399 = vmatprep.subr.bf16.mxu0 %v8398_v59 }
0x110e   : > { %8401 = vmatpush3.bf16.msra.mxu0 %v8398_v59 }
0x11d4   : > { %v8267_v62 = vpop.f32.mrb[20].mxu0 }
0x11d5   : > { %v6732_v40 = vadd.f32 %v8267_v62, %v7908_v46  ;;  %v6726_v0 = vpop.f32.mrb[21].mxu0 }
0x11d6   : > { %v6727_v9 = vadd.f32 %v7908_v46, %v6726_v0 }
0x11d7   : > { %v11655_v49 = vadd.f32 %v6732_v40, %v11301_v19 }
0x11d8   : > { %v11658_v25 = vadd.f32 %v6727_v9, %v11304_v3 }
0x11d9   : > { %v6742_v58 = vsel %vm1488_vm0, %v11655_v49, 0.0 }
0x11da   : > { %6743 = vadd.xlane.f32.xlu1 %v6742_v58  ;;  %v6739_v6 = vsel %vm1488_vm0, %v11658_v25, 0.0 }
0x11db   : > { %6740 = vadd.xlane.f32.xlu0 %v6739_v6 }
0x1267   : > { %v6744_v11 = vpop.xlane.xlu1 %6743 }
0x1268   : > { %v6746_v16 = vmul.f32 0.03125, %v6744_v11  ;;  %v6741_v56 = vpop.xlane.xlu0 %6740 }
0x1269   : > { %v6745_v17 = vmul.f32 0.03125, %v6741_v56 }
0x126a   : > { %v6748_v5 = vsub.f32 %v11655_v49, %v6746_v16 }
0x126b   : > { %v6747_v19 = vsub.f32 %v11658_v25, %v6745_v17 }
0x126c   : > { %v6750_v44 = vmul.f32 %v6748_v5, %v6748_v5 }
0x126d   : > { %v6749_v4 = vmul.f32 %v6747_v19, %v6747_v19 }
0x126e   : > { %v6754_v20 = vsel %vm1488_vm0, %v6750_v44, 0.0 }
0x126f   : > { %v6751_v3 = vsel %vm1488_vm0, %v6749_v4, 0.0 }
0x1270   : > { %6752 = vadd.xlane.f32.xlu0 %v6751_v3 }
0x1274   : > { %6755 = vadd.xlane.f32.xlu0 %v6754_v20 }
0x12fd   : > { %v6753_v51 = vpop.xlane.xlu0 %6752 }
0x12fe   : > { %v6757_v39 = vmul.f32 0.03125, %v6753_v51 }
0x1300   : > { %v6759_v52 = vadd.f32 1e-12, %v6757_v39 }
0x1301   : > { %v6756_v54 = vpop.xlane.xlu0 %6755 }
0x1302   : > { %8861 = vrsqrt.f32 %v6759_v52  ;;  %v6758_v35 = vmul.f32 0.03125, %v6756_v54 }
0x1304   : > { %v6760_v45 = vadd.f32 1e-12, %v6758_v35 }
0x1306   : > { %8863 = vrsqrt.f32 %v6760_v45 }
0x130c   : > { %v8862_v47 = vpop.eup %8861 }
0x130d   : > { %v6763_v53 = vmul.f32 %v8862_v47, %v6747_v19 }
0x130f   : > { %v6771_v48 = vmul.f32 %v7911_v42, %v6763_v53 }
0x1310   : > { %v8864_v27 = vpop.eup %8863 }
0x1311   : > { %v6764_v55 = vmul.f32 %v8864_v27, %v6748_v5  ;;  %v6779_v2 = vadd.f32 %v7912_v61, %v6771_v48 }
0x1313   : > { %v6772_v38 = vmul.f32 %v7911_v42, %v6764_v55  ;;  %8276 = vmatprep.mubr.msk.f32.mxu1 %vm1488_vm0, %v6779_v2 }
0x1315   : > { %v6780_v18 = vadd.f32 %v7912_v61, %v6772_v38 }
0x1317   : > { %8277 = vmatmul.mubr.msk.f32.vlgmr.msra.gmra.mrb[28].mxu1 %vm1488_vm0, %v6780_v18 }
0x13ea   : > { %v8278_v57 = vpop.f32.mrb[28].mxu1 }
0x13eb   : > { %v6870_v1 = vadd.f32 %v8278_v57, %v7913_v31  ;;  %v6864_v33 = vpop.f32.mrb[29].mxu1 }
0x13ec   : > { %v6865_v60 = vadd.f32 %v7913_v31, %v6864_v33 }
0x13ed   : > { %v6874_v50 = vmax.f32 %v6870_v1, 0.0 }
0x13ee   : > { %v6873_v29 = vmax.f32 %v6865_v60, 0.0 }
0x13f0   : > { %8295 = vmatprep.mubr.msk.f32.mxu0 %vm6890_vm8, %v6873_v29 }
0x13f1   : > { %8296 = vmatmul.mubr.msk.f32.vlgmr.msra.gmra.mrb[22].mxu0 %vm6890_vm8, %v6874_v50 }
0x13f2   : > { %9590 = shalt.err (!%p9587_p0)
}
0x13f3   : > { %s9591_s26 = scalar_lea.hbm %s11675_s3, 512  ;;  %s9595_s4 = scalar_lea.hbm %s12130_s13, 1024 }
0x13f4   : > { %p9592_p4 = scmp.ne.s32.totalorder %s11675_s3, %s9591_s26  ;;  %p9596_p5 = scmp.lt.u32.totalorder %s11675_s3, %s12130_s13 }
0x13f5   : > { %p9597_p7 = scmp.lt.u32.totalorder %s9595_s4, %s9591_s26  ;;  %p9599_p13 = scmp.lt.u32.totalorder %s9591_s26, %s11675_s3 }
0x13f6   : > { %p9593_p10 = pnand %p9592_p4, %p12131_p2 }
0x13f7   : > { %p9598_p11 = por %p9597_p7, %p9596_p5 }
0x13f8   : > { %p9594_p1 = pneg %p9593_p10 }
0x13f9   : > { %p9600_p3 = por %p9599_p13, %p9598_p11 }
0x13fb   : > { %p9601_p12 = pnand %p9600_p3, %p9594_p1 }
0x13fd   : > { %9604 = shalt.err (!%p9601_p12)
}
0x13fe   : > { %s12021_s24 = smov 128   ;;  %s11705_s1 = scalar_lea.hbm %s10141_s21, %s11671_s18 }
0x13ff   : > { %8503 = dma.vmem_to_hbm [thread:$0]  (%p12131_p2), %s11678_s14, 512, %s11675_s3, %s6992_s8, %s12021_s24, %s12021_s24, %s12022_s23  }
0x1400   : > { %s7099_s20 = sshll.u32 %s11136_s10, 4  ;;  %s7115_s6 = sshll.u32 %s11579_s5, 4  ;;  %s11709_s20 = int_to_ptr.vmem [resolvable:$true] %s7099_s20  ;;  %s11736_s6 = int_to_ptr.vmem [resolvable:$true] %s7115_s6 }
0x1401   : > { %s7002_s26 = scalar_lea.sflag [#allocation49], %s10669_s9  ;;  %s9605_s4 = scalar_lea.vmem %s11709_s20, 512 }
0x1402   : > { %p9606_p8 = scmp.ne.s32.totalorder %s11709_s20, %s9605_s4  ;;  %s9976_s12 = smov [#allocation48]  }
0x1403   : > { %s9609_s13 = sshll.u32 %s9976_s12, 4  ;;  %s9610_s13 = int_to_ptr.vmem [resolvable:$false] %s9609_s13 }
0x1404   : > { %p9607_p9 = pnand %p9606_p8, %p12131_p2  ;;  %s9611_s17 = scalar_lea.vmem %s9610_s13, 1024 }
0x1405   : > { %p9612_p0 = scmp.lt.s32.totalorder %s11709_s20, %s9610_s13  ;;  %p9613_p4 = scmp.lt.s32.totalorder %s9611_s17, %s9605_s4 }
0x1406   : > { %p9608_p6 = pneg %p9607_p9 }
0x1407   : > { %p9614_p10 = por %p9613_p4, %p9612_p0 }
0x1409   : > { %p9615_p1 = pnand %p9614_p10, %p9608_p6 }
0x140b   : > { %9618 = shalt.err (!%p9615_p1)
}
0x140c   : > { %s9619_s10 = scalar_lea.hbm %s11705_s1, 512  ;;  %s9623_s12 = scalar_lea.hbm %s10141_s21, 1024 }
0x140d   : > { %p9620_p5 = scmp.ne.s32.totalorder %s11705_s1, %s9619_s10  ;;  %p9624_p13 = scmp.lt.u32.totalorder %s11705_s1, %s10141_s21 }
0x140e   : > { %p9625_p3 = scmp.lt.u32.totalorder %s9623_s12, %s9619_s10  ;;  %p9627_p8 = scmp.lt.u32.totalorder %s9619_s10, %s11705_s1 }
0x140f   : > { %p9621_p7 = pnand %p9620_p5, %p12131_p2 }
0x1410   : > { %p9626_p12 = por %p9625_p3, %p9624_p13 }
0x1411   : > { %p9622_p11 = pneg %p9621_p7 }
0x1412   : > { %p9628_p9 = por %p9627_p8, %p9626_p12 }
0x1414   : > { %p9629_p6 = pnand %p9628_p9, %p9622_p11 }
0x1416   : > { %9632 = shalt.err (!%p9629_p6)
}
0x1417   : > { %s12132_s17 = sld [smem:[#allocation100_spill]]  ;;  %s11740_s13 = scalar_lea.hbm %s10136_s30, %s11671_s18 }
0x1418   : > { %8505 = dma.vmem_to_hbm [thread:$0]  (%p12131_p2), %s11709_s20, 512, %s11705_s1, %s7002_s26, %s12021_s24, %s12021_s24, %s12022_s23  }
0x1419   : > { %s7083_s3 = sshll.u32 %s11173_s16, 4  ;;  %s9977_s10 = smov [#allocation47]   ;;  %s11747_s3 = int_to_ptr.vmem [resolvable:$true] %s7083_s3 }
0x141a   : > { %s9633_s4 = scalar_lea.vmem %s11747_s3, 512  ;;  %s9637_s1 = sshll.u32 %s9977_s10, 4  ;;  %s9638_s1 = int_to_ptr.vmem [resolvable:$false] %s9637_s1 }
0x141b   : > { %p9634_p0 = scmp.ne.s32.totalorder %s11747_s3, %s9633_s4  ;;  %s9639_s5 = scalar_lea.vmem %s9638_s1, 1024 }
0x141c   : > { %p9640_p1 = scmp.lt.s32.totalorder %s11747_s3, %s9638_s1  ;;  %p9641_p5 = scmp.lt.s32.totalorder %s9639_s5, %s9633_s4 }
0x141d   : > { %s11745_s14 = scalar_lea.hbm %s12132_s17, %s11671_s18  ;;  %p9635_p4 = pnand %p9634_p0, %p12131_p2 }
0x141e   : > { %p9642_p7 = por %p9641_p5, %p9640_p1 }
0x141f   : > { %p9636_p10 = pneg %p9635_p4 }
0x1421   : > { %p9643_p11 = pnand %p9642_p7, %p9636_p10 }
0x1423   : > { %9646 = shalt.err (!%p9643_p11)
}
0x1424   : > { %s9647_s16 = scalar_lea.hbm %s11740_s13, 512  ;;  %s9651_s20 = scalar_lea.hbm %s10136_s30, 1024 }
0x1425   : > { %p9648_p13 = scmp.ne.s32.totalorder %s11740_s13, %s9647_s16  ;;  %p9652_p8 = scmp.lt.u32.totalorder %s11740_s13, %s10136_s30 }
0x1426   : > { %p9653_p9 = scmp.lt.u32.totalorder %s9651_s20, %s9647_s16  ;;  %p9655_p0 = scmp.lt.u32.totalorder %s9647_s16, %s11740_s13 }
0x1427   : > { %p9649_p3 = pnand %p9648_p13, %p12131_p2 }
0x1428   : > { %p9654_p6 = por %p9653_p9, %p9652_p8 }
0x1429   : > { %p9650_p12 = pneg %p9649_p3 }
0x142a   : > { %p9656_p4 = por %p9655_p0, %p9654_p6 }
0x142c   : > { %p9657_p10 = pnand %p9656_p4, %p9650_p12 }
0x142e   : > { %9660 = shalt.err (!%p9657_p10)
}
0x142f   : > { %8504 = dma.vmem_to_hbm [thread:$0]  (%p12131_p2), %s11747_s3, 512, %s11740_s13, %s6992_s8, %s12021_s24, %s12021_s24, %s12022_s23  }
0x1430   : > { %s9661_s12 = scalar_lea.vmem %s11736_s6, 512  ;;  %s9978_s4 = smov [#allocation50]  }
0x1431   : > { %p9662_p1 = scmp.ne.s32.totalorder %s11736_s6, %s9661_s12  ;;  %s9665_s10 = sshll.u32 %s9978_s4, 4  ;;  %s9666_s10 = int_to_ptr.vmem [resolvable:$false] %s9665_s10 }
0x1432   : > { %s9667_s1 = scalar_lea.vmem %s9666_s10, 1024  ;;  %p9668_p11 = scmp.lt.s32.totalorder %s11736_s6, %s9666_s10 }
0x1433   : > { %p9663_p5 = pnand %p9662_p1, %p12131_p2  ;;  %p9669_p13 = scmp.lt.s32.totalorder %s9667_s1, %s9661_s12 }
0x1435   : > { %p9664_p7 = pneg %p9663_p5  ;;  %p9670_p3 = por %p9669_p13, %p9668_p11 }
0x1437   : > { %p9671_p12 = pnand %p9670_p3, %p9664_p7 }
0x1439   : > { %9674 = shalt.err (!%p9671_p12)
}
0x143a   : > { %s9675_s8 = scalar_lea.hbm %s11745_s14, 512  ;;  %s9679_s13 = scalar_lea.hbm %s12132_s17, 1024 }
0x143b   : > { %p9676_p8 = scmp.ne.s32.totalorder %s11745_s14, %s9675_s8  ;;  %p9680_p0 = scmp.lt.u32.totalorder %s11745_s14, %s12132_s17 }
0x143c   : > { %p9681_p4 = scmp.lt.u32.totalorder %s9679_s13, %s9675_s8  ;;  %p9683_p1 = scmp.lt.u32.totalorder %s9675_s8, %s11745_s14 }
0x143d   : > { %p9677_p9 = pnand %p9676_p8, %p12131_p2 }
0x143e   : > { %p9682_p10 = por %p9681_p4, %p9680_p0 }
0x143f   : > { %p9678_p6 = pneg %p9677_p9 }
0x1440   : > { %p9684_p5 = por %p9683_p1, %p9682_p10 }
0x1442   : > { %p9685_p7 = pnand %p9684_p5, %p9678_p6 }
0x1444   : > { %9688 = shalt.err (!%p9685_p7)
}
0x1445   : > { %s12133_s3 = sld [smem:[#allocation101_spill]]  ;;  %s7131_s16 = sshll.u32 %s11572_s19, 4  ;;  %s11798_s16 = int_to_ptr.vmem [resolvable:$true] %s7131_s16 }
0x1446   : > { %8506 = dma.vmem_to_hbm [thread:$0]  (%p12131_p2), %s11736_s6, 512, %s11745_s14, %s7002_s26, %s12021_s24, %s12021_s24, %s12022_s23  }
0x1447   : > { %s7012_s20 = scalar_lea.sflag [#allocation52], %s10658_s25  ;;  %s9689_s12 = scalar_lea.vmem %s11798_s16, 512 }
0x1448   : > { %p9690_p11 = scmp.ne.s32.totalorder %s11798_s16, %s9689_s12  ;;  %s9979_s4 = smov [#allocation51]  }
0x1449   : > { %s9693_s10 = sshll.u32 %s9979_s4, 4  ;;  %s9694_s10 = int_to_ptr.vmem [resolvable:$false] %s9693_s10 }
0x144a   : > { %p9691_p13 = pnand %p9690_p11, %p12131_p2  ;;  %s9695_s1 = scalar_lea.vmem %s9694_s10, 1024 }
0x144b   : > { %s11795_s5 = scalar_lea.hbm %s12133_s3, %s11671_s18  ;;  %p9696_p12 = scmp.lt.s32.totalorder %s11798_s16, %s9694_s10 }
0x144c   : > { %p9692_p3 = pneg %p9691_p13  ;;  %p9697_p8 = scmp.lt.s32.totalorder %s9695_s1, %s9689_s12 }
0x144e   : > { %p9698_p9 = por %p9697_p8, %p9696_p12 }
0x1450   : > { %p9699_p6 = pnand %p9698_p9, %p9692_p3 }
0x1452   : > { %9702 = shalt.err (!%p9699_p6)
}
0x1453   : > { %s9703_s19 = scalar_lea.hbm %s11795_s5, 512  ;;  %s9707_s6 = scalar_lea.hbm %s12133_s3, 1024 }
0x1454   : > { %p9704_p0 = scmp.ne.s32.totalorder %s11795_s5, %s9703_s19  ;;  %p9708_p1 = scmp.lt.u32.totalorder %s11795_s5, %s12133_s3 }
0x1455   : > { %p9709_p5 = scmp.lt.u32.totalorder %s9707_s6, %s9703_s19  ;;  %p9711_p11 = scmp.lt.u32.totalorder %s9703_s19, %s11795_s5 }
0x1456   : > { %p9705_p4 = pnand %p9704_p0, %p12131_p2 }
0x1457   : > { %p9710_p7 = por %p9709_p5, %p9708_p1 }
0x1458   : > { %p9706_p10 = pneg %p9705_p4 }
0x1459   : > { %p9712_p13 = por %p9711_p11, %p9710_p7 }
0x145b   : > { %p9713_p3 = pnand %p9712_p13, %p9706_p10 }
0x145d   : > { %9716 = shalt.err (!%p9713_p3)
}
0x145e   : > { %s12134_s26 = sld [smem:[#allocation97_spill]]  ;;  %s12135_s14 = sld [smem:[#allocation96_spill]]  ;;  %v7916_v12 = vld [vmem:[#allocation40] ss:$0 sm:$0xff] }
0x145f   : > { %8507 = dma.vmem_to_hbm [thread:$0]  (%p12131_p2), %s11798_s16, 512, %s11795_s5, %s7012_s20, %s12021_s24, %s12021_s24, %s12022_s23  }
0x1460   : > { %s7927_s8 = sshll.u32 %s10174_s11, 7  ;;  %s1433_s13 = scalar_lea.vmem [#allocation42], %s10672_s15 }
0x1461   : > { %s12136_s12 = sld [smem:[#allocation98_spill]]  ;;  %s7038_s4 = sshll.u32 %s1433_s13, 4  ;;  %s11833_s4 = int_to_ptr.vmem [resolvable:$true] %s7038_s4 }
0x1462   : > { %s7051_s10 = sshll.u32 %s11152_s27, 4  ;;  %s1426_s1 = scalar_lea.vmem [#allocation41], %s10672_s15  ;;  %s11841_s10 = int_to_ptr.vmem [resolvable:$true] %s7051_s10 }
0x1463   : > { %s7025_s19 = sshll.u32 %s1426_s1, 4  ;;  %s6982_s5 = scalar_lea.sflag [#allocation43], %s10669_s9  ;;  %s11839_s19 = int_to_ptr.vmem [resolvable:$true] %s7025_s19 }
0x1464   : > { %s11830_s6 = scalar_lea.hbm %s12134_s26, %s7927_s8  ;;  %s11837_s11 = scalar_lea.hbm %s12135_s14, %s7927_s8 }
0x1465   : > { %s9717_s16 = scalar_lea.vmem %s11833_s4, 128  ;;  %s9980_s20 = smov [#allocation42]  }
0x1466   : > { %p9718_p12 = scmp.ne.s32.totalorder %s11833_s4, %s9717_s16  ;;  %s9721_s24 = sshll.u32 %s9980_s20, 4  ;;  %s9722_s24 = int_to_ptr.vmem [resolvable:$false] %s9721_s24 }
0x1467   : > { %s11846_s27 = scalar_lea.hbm %s12136_s12, %s11671_s18  ;;  %s9723_s23 = scalar_lea.vmem %s9722_s24, 256 }
0x1468   : > { %p9719_p8 = pnand %p9718_p12, %p12131_p2  ;;  %p9724_p6 = scmp.lt.s32.totalorder %s11833_s4, %s9722_s24 }
0x1469   : > { %p9725_p0 = scmp.lt.s32.totalorder %s9723_s23, %s9717_s16 }
0x146a   : > { %p9720_p9 = pneg %p9719_p8 }
0x146b   : > { %p9726_p4 = por %p9725_p0, %p9724_p6 }
0x146d   : > { %p9727_p10 = pnand %p9726_p4, %p9720_p9 }
0x14c4   : > { %v8297_v10 = vpop.f32.mrb[22].mxu0 }
0x14c5   : > { %v6969_v8 = vadd.f32 %v8297_v10, %v7916_v12  ;;  %v6963_v7 = vpop.f32.mrb[23].mxu0 }
0x14c6   : > { %v6964_v46 = vadd.f32 %v7916_v12, %v6963_v7 }
0x14c7   : > { %v6973_v62 = vadd.f32 %v6969_v8, %v11655_v49 }
0x14c8   : > { %v6972_v40 = vadd.f32 %v6964_v46, %v11658_v25 }
0x14c9   : > { %6975 = vst.msk [vmem:[%s1433_s13] sm:$0xff] %vm1488_vm0, %v6973_v62 }
0x14ca   : > { %9730 = shalt.err (!%p9727_p10)
}
0x14cb   : > { %s9731_s18 = scalar_lea.hbm %s11830_s6, 128  ;;  %s9735_s8 = scalar_lea.hbm %s12134_s26, 256 }
0x14cc   : > { %p9732_p1 = scmp.ne.s32.totalorder %s11830_s6, %s9731_s18  ;;  %p9736_p11 = scmp.lt.u32.totalorder %s11830_s6, %s12134_s26 }
0x14cd   : > { %p9737_p13 = scmp.lt.u32.totalorder %s9735_s8, %s9731_s18  ;;  %p9739_p12 = scmp.lt.u32.totalorder %s9731_s18, %s11830_s6 }
0x14ce   : > { %p9733_p5 = pnand %p9732_p1, %p12131_p2 }
0x14cf   : > { %p9738_p3 = por %p9737_p13, %p9736_p11 }
0x14d0   : > { %p9734_p7 = pneg %p9733_p5 }
0x14d1   : > { %p9740_p8 = por %p9739_p12, %p9738_p3 }
0x14d3   : > { %p9741_p9 = pnand %p9740_p8, %p9734_p7 }
0x14d5   : > { %9744 = shalt.err (!%p9741_p9)
}
0x14d6   : > { %8501 = dma.vmem_to_hbm [thread:$0]  (%p12131_p2), %s11833_s4, 128, %s11830_s6, %s6982_s5   ;;  %6974 = vst.msk [vmem:[%s1426_s1] sm:$0xff] %vm1488_vm0, %v6972_v40 }
0x14d7   : > { %s6977_s23 = scalar_lea.sflag [#allocation4], %s10658_s25  ;;  %s9745_s24 = scalar_lea.vmem %s11839_s19, 128 }
0x14d8   : > { %p9746_p6 = scmp.ne.s32.totalorder %s11839_s19, %s9745_s24  ;;  %s9981_s13 = smov [#allocation41]  }
0x14d9   : > { %s9749_s16 = sshll.u32 %s9981_s13, 4  ;;  %s9750_s16 = int_to_ptr.vmem [resolvable:$false] %s9749_s16 }
0x14da   : > { %p9747_p0 = pnand %p9746_p6, %p12131_p2  ;;  %s9751_s20 = scalar_lea.vmem %s9750_s16, 256 }
0x14db   : > { %p9752_p10 = scmp.lt.s32.totalorder %s11839_s19, %s9750_s16  ;;  %p9753_p1 = scmp.lt.s32.totalorder %s9751_s20, %s9745_s24 }
0x14dc   : > { %p9748_p4 = pneg %p9747_p0 }
0x14dd   : > { %p9754_p5 = por %p9753_p1, %p9752_p10 }
0x14df   : > { %p9755_p7 = pnand %p9754_p5, %p9748_p4 }
0x14e1   : > { %9758 = shalt.err (!%p9755_p7)
}
0x14e2   : > { %s9759_s25 = scalar_lea.hbm %s11837_s11, 128  ;;  %s9763_s15 = scalar_lea.hbm %s12135_s14, 256 }
0x14e3   : > { %p9760_p11 = scmp.ne.s32.totalorder %s11837_s11, %s9759_s25  ;;  %p9764_p12 = scmp.lt.u32.totalorder %s11837_s11, %s12135_s14 }
0x14e4   : > { %p9765_p8 = scmp.lt.u32.totalorder %s9763_s15, %s9759_s25  ;;  %p9767_p6 = scmp.lt.u32.totalorder %s9759_s25, %s11837_s11 }
0x14e5   : > { %p9761_p13 = pnand %p9760_p11, %p12131_p2 }
0x14e6   : > { %p9766_p9 = por %p9765_p8, %p9764_p12 }
0x14e7   : > { %p9762_p3 = pneg %p9761_p13 }
0x14e8   : > { %p9768_p0 = por %p9767_p6, %p9766_p9 }
0x14ea   : > { %p9769_p4 = pnand %p9768_p0, %p9762_p3 }
0x14ec   : > { %9772 = shalt.err (!%p9769_p4)
}
0x14ed   : > { %8500 = dma.vmem_to_hbm [thread:$0]  (%p12131_p2), %s11839_s19, 128, %s11837_s11, %s6977_s23  }
0x14ee   : > { %s9773_s4 = scalar_lea.vmem %s11841_s10, 512  ;;  %s9982_s1 = smov [#allocation44]  }
0x14ef   : > { %p9774_p10 = scmp.ne.s32.totalorder %s11841_s10, %s9773_s4  ;;  %s9777_s6 = sshll.u32 %s9982_s1, 4  ;;  %s9778_s6 = int_to_ptr.vmem [resolvable:$false] %s9777_s6 }
0x14f0   : > { %s9779_s18 = scalar_lea.vmem %s9778_s6, 1024  ;;  %p9780_p7 = scmp.lt.s32.totalorder %s11841_s10, %s9778_s6 }
0x14f1   : > { %p9775_p1 = pnand %p9774_p10, %p12131_p2  ;;  %p9781_p11 = scmp.lt.s32.totalorder %s9779_s18, %s9773_s4 }
0x14f3   : > { %p9776_p5 = pneg %p9775_p1  ;;  %p9782_p13 = por %p9781_p11, %p9780_p7 }
0x14f5   : > { %p9783_p3 = pnand %p9782_p13, %p9776_p5 }
0x14f7   : > { %9786 = shalt.err (!%p9783_p3)
}
0x14f8   : > { %s9787_s19 = scalar_lea.hbm %s11846_s27, 512  ;;  %s9791_s11 = scalar_lea.hbm %s12136_s12, 1024 }
0x14f9   : > { %p9788_p12 = scmp.ne.s32.totalorder %s11846_s27, %s9787_s19  ;;  %p9792_p6 = scmp.lt.u32.totalorder %s11846_s27, %s12136_s12 }
0x14fa   : > { %p9793_p0 = scmp.lt.u32.totalorder %s9791_s11, %s9787_s19  ;;  %p9795_p10 = scmp.lt.u32.totalorder %s9787_s19, %s11846_s27 }
0x14fb   : > { %p9789_p8 = pnand %p9788_p12, %p12131_p2 }
0x14fc   : > { %p9794_p4 = por %p9793_p0, %p9792_p6 }
0x14fd   : > { %p9790_p9 = pneg %p9789_p8 }
0x14fe   : > { %p9796_p1 = por %p9795_p10, %p9794_p4 }
0x1500   : > { %p9797_p5 = pnand %p9796_p1, %p9790_p9 }
0x1502   : > { %9800 = shalt.err (!%p9797_p5)
}
0x1503   : > { %s12137_s8 = smov 8   ;;  %s12138_s23 = smov 128  }
0x1504   : > { %8502 = dma.vmem_to_hbm [thread:$0]  (%p12131_p2), %s11841_s10, 512, %s11846_s27, %s6982_s5, %s12138_s23, %s12138_s23, %s12137_s8  }
0x1505 PF: > { %s12139_s24 = sld [smem:[#allocation105_spill]]  ;;  %s7146_s13 = sand.u32 1, %s9891_s0  }
0x1506   : > { %p12141_p11 = scmp.ge.s32.totalorder %s9903_s2, 2  ;;  %s7147_s7 = scalar_lea.sflag [#allocation4], %s7146_s13 }
0x150b   : > { %p12140_p7 = scmp.ne.s32.totalorder %s12139_s24, 0 }
0x150d   : > { %p11916_p13 = pnand %p12141_p11, %p12140_p7 }
0x150f   : > { %9870 = dma.done.wait (!%p11916_p13), %s7147_s7, 128  }
0x1510   : > { %9872 = vsyncadd (!%p11916_p13), %s7147_s7, 4294967168  ;;  %s12143_s9 = sadd.s32 4294967294, %s9903_s2  }
0x1511   : > { %s7155_s10 = sand.u32 1, %s12143_s9  }
0x1512   : > { %s7156_s27 = scalar_lea.sflag [#allocation43], %s7155_s10 }
0x1513   : > { %9874 = dma.done.wait (!%p11916_p13), %s7156_s27, 640  }
0x1514   : > { %9876 = vsyncadd (!%p11916_p13), %s7156_s27, 4294966656  ;;  %s7174_s0 = scalar_lea.sflag [#allocation46], %s7155_s10 }
0x1515   : > { %9878 = dma.done.wait (!%p11916_p13), %s7174_s0, 1024  }
0x1516   : > { %9880 = vsyncadd (!%p11916_p13), %s7174_s0, 4294966272  ;;  %s7192_s5 = scalar_lea.sflag [#allocation49], %s7155_s10 }
0x1517   : > { %9882 = dma.done.wait (!%p11916_p13), %s7192_s5, 1024  }
0x1518   : > { %9884 = vsyncadd (!%p11916_p13), %s7192_s5, 4294966272  ;;  %s7210_s2 = scalar_lea.sflag [#allocation52], %s7146_s13 }
0x1519   : > { %9886 = dma.done.wait (!%p11916_p13), %s7210_s2, 512  }
0x151a   : > { %9888 = vsyncadd (!%p11916_p13), %s7210_s2, 4294966784  ;;  %s12144_s2 = sld [smem:[#allocation103_spill]]  ;;  %s12145_s20 = sld [smem:[#allocation102_spill]] }
0x151b   : > { %s12146_s1 = sld [smem:[#allocation104_spill]]  ;;  %s12147_s0 = smov %s9895_s28 }
0x1520   : > { %p107_p2 = scmp.ge.s32.totalorder %s12144_s2, 4   ;;  %s12148_s28 = smov %s12145_s20 }
0x1522   :  { %109 = sbr.rel (!%p107_p2) target bundleno = 97 (0x61), region = 438 }
0x1529   :  { %7215 = vsyncpa [#allocation3], 1 }
0x152a   :  { %7217 = vsyncpa [#allocation3 + $0x1], 1 }
0x152b   :  { %7218 = vsyncpa [#allocation6], 1 }
0x152c   :  { %7220 = vsyncpa [#allocation6 + $0x1], 1 }
0x152d   :  { %7221 = vsyncpa [#allocation9], 1 }
0x152e   :  { %7223 = vsyncpa [#allocation9 + $0x1], 1 }
0x152f   :  { %7224 = vsyncpa [#allocation12], 1 }
0x1530   :  { %7225 = vsyncpa [#allocation15], 1 }
0x1531   :  { %7226 = vsyncpa [#allocation18], 1 }
0x1532   :  { %7227 = vsyncpa [#allocation21], 1 }
0x1533   :  { %7228 = vsyncpa [#allocation24], 1 }
0x1534   :  { %7229 = vsyncpa [#allocation27], 1 }
0x1535   :  { %7230 = vsyncpa [#allocation30], 1 }
0x1536   :  { %7231 = vsyncpa [#allocation33], 1 }
0x1537   :  { %7232 = vsyncpa [#allocation36], 1 }
0x1538   :  { %7233 = vsyncpa [#allocation39], 1 }
0x1539   :  { %7234 = vsyncpa [#allocation4], 1 }
0x153a   :  { %7236 = vsyncpa [#allocation4 + $0x1], 1 }
0x153b   :  { %7237 = vsyncpa [#allocation43], 1 }
0x153c   :  { %7239 = vsyncpa [#allocation43 + $0x1], 1 }
0x153d   :  { %7240 = vsyncpa [#allocation46], 1 }
0x153e   :  { %7242 = vsyncpa [#allocation46 + $0x1], 1 }
0x153f   :  { %7243 = vsyncpa [#allocation49], 1 }
0x1540   :  { %7245 = vsyncpa [#allocation49 + $0x1], 1 }
0x1541   :  { %7246 = vsyncpa [#allocation52], 1 }
0x1542   :  { %7248 = vsyncpa [#allocation52 + $0x1], 1 }

</bundles_post_ra>
